<compile_context>
chip_gen: v6e
topology: v6e:2x2x1
jax: 0.10.0
libtpu: 0.0.40
codegen_flags: <defaults>
</compile_context>

<pallas_src>
import functools

import numpy as np
import jax
import jax.numpy as jnp
from jax.experimental import pallas as pl
from jax.experimental.pallas import tpu as pltpu


def _spatial_attention_kernel(x_ref, wm_ref, wx_ref, o_ref, *, k, H, W):
    """Fused channel mean/max + kxk conv (roll + masked weights) + sigmoid.

    x_ref:  VMEM (Nb, C, H*W)   activation block (any float dtype, lane-dense).
    wm_ref: VMEM (k*k, H*W) f32 per-tap conv weight for the MEAN channel,
                                pre-multiplied by that tap's zero-padding mask.
    wx_ref: VMEM (k*k, H*W) f32 same for the MAX channel.
    o_ref:  VMEM (Nb, 1, H*W)   output block.
    """
    HW = H * W
    pad = (k - 1) // 2

    # Channel statistics: lane-dense (C = sublanes, H*W = lanes) reduction.
    x = x_ref[...].astype(jnp.float32)            # (Nb, C, HW), cast in-register
    mean_map = jnp.mean(x, axis=1)                # (Nb, HW)
    max_map = jnp.max(x, axis=1)                  # (Nb, HW)

    # k*k cross-correlation over the two stat channels, fully in registers.
    # Shift for tap (kh, kw) on the flattened map is s = (kh-pad)*W + (kw-pad);
    # pltpu.roll wraps, and the wrapped / row-crossing lanes are zeroed because
    # the masked weight table is 0 exactly where the tap is out of bounds.
    n_acc = 4                                     # break the dependency chain
    accs = [jnp.zeros_like(mean_map) for _ in range(n_acc)]
    slot = 0
    for kh in range(k):
        dh = kh - pad
        for kw in range(k):
            dw = kw - pad
            t = kh * k + kw
            shift = (-(dh * W + dw)) % HW         # roll[i] = map[(i + s) % HW]
            if shift == 0:
                rm, rx = mean_map, max_map
            else:
                rm = pltpu.roll(mean_map, shift, axis=1)
                rx = pltpu.roll(max_map, shift, axis=1)
            wm = wm_ref[t:t + 1, :]               # (1, HW) masked weight row
            wx = wx_ref[t:t + 1, :]
            accs[slot % n_acc] = accs[slot % n_acc] + wm * rm
            slot += 1
            accs[slot % n_acc] = accs[slot % n_acc] + wx * rx
            slot += 1

    conv = (accs[0] + accs[1]) + (accs[2] + accs[3])
    # Lane-dense (multiple-of-128) unmasked store.
    o_ref[...] = jax.nn.sigmoid(conv)[:, None, :].astype(o_ref.dtype)


def spatial_attention(x, conv_w, *, block_n=1):
    """x: (N, C, H, W) float; conv_w: (1, 2, k, k) (PyTorch OIHW layout).

    Returns sigmoid(conv2d(cat([mean_c(x), max_c(x)], 1), conv_w, pad=k//2)),
    shape (N, 1, H, W), dtype of x.

    block_n: images per grid step.  1 => size-N parallel axis (both v7x TCs
    busy); N => whole batch per step (best on single-TC v5e/v6e).
    """
    N, C, H, W = x.shape
    k = conv_w.shape[-1]
    assert conv_w.shape == (1, 2, k, k), conv_w.shape
    assert k % 2 == 1, "padding = k//2 matches PyTorch only for odd k (3 or 7)"
    assert N % block_n == 0, (N, block_n)
    pad = k // 2
    HW = H * W

    # Static zero-padding validity mask per tap (built once, host-side).
    oh = np.arange(H).reshape(H, 1)
    ow = np.arange(W).reshape(1, W)
    masks = np.zeros((k * k, HW), np.float32)
    for kh in range(k):
        for kw in range(k):
            ih = oh + (kh - pad)
            iw = ow + (kw - pad)
            valid = (ih >= 0) & (ih < H) & (iw >= 0) & (iw < W)
            masks[kh * k + kw] = valid.reshape(HW).astype(np.float32)
    masks_j = jnp.asarray(masks)

    # Masked per-tap weight tables: channel 0 of the concatenated conv input
    # is the mean map, channel 1 the max map (matches torch.cat([avg, max])).
    w = conv_w.astype(jnp.float32)
    wm_tbl = w[0, 0].reshape(k * k, 1) * masks_j      # (k*k, HW)
    wx_tbl = w[0, 1].reshape(k * k, 1) * masks_j      # (k*k, HW)

    # Lane-dense layout: free contiguous reshape in HBM, no dtype upcast.
    x_flat = x.reshape(N, C, HW)

    grid_spec = pltpu.PrefetchScalarGridSpec(
        num_scalar_prefetch=0,
        grid=(N // block_n,),
        in_specs=[
            pl.BlockSpec((block_n, C, HW), lambda n: (n, 0, 0)),
            pl.BlockSpec((k * k, HW), lambda n: (0, 0)),
            pl.BlockSpec((k * k, HW), lambda n: (0, 0)),
        ],
        out_specs=pl.BlockSpec((block_n, 1, HW), lambda n: (n, 0, 0)),
    )
    out = pl.pallas_call(
        functools.partial(_spatial_attention_kernel, k=k, H=H, W=W),
        out_shape=jax.ShapeDtypeStruct((N, 1, HW), x.dtype),
        grid_spec=grid_spec,
        compiler_params=pltpu.CompilerParams(
            dimension_semantics=("parallel",)),
    )(x_flat, wm_tbl, wx_tbl)
    return out.reshape(N, 1, H, W)


def _reference(x, conv_w):
    """Pure-JAX reference of the PyTorch module (correctness check)."""
    avg = jnp.mean(x, axis=1, keepdims=True)
    mx = jnp.max(x, axis=1, keepdims=True)
    inp = jnp.concatenate([avg, mx], axis=1)
    k = conv_w.shape[-1]
    pad = (k - 1) // 2
    out = jax.lax.conv_general_dilated(
        inp, conv_w, window_strides=(1, 1),
        padding=[(pad, pad), (pad, pad)],
        dimension_numbers=("NCHW", "OIHW", "NCHW"),
        precision=jax.lax.Precision.HIGHEST)
    return jax.nn.sigmoid(out)


if __name__ == "__main__":
    key = jax.random.PRNGKey(0)
    kx, kw = jax.random.split(key)

    N, C, H, W, K = 2, 4, 16, 16, 7
    x = jax.random.normal(kx, (N, C, H, W), jnp.float32)
    # PyTorch Conv2d default init: U(-b, b) with b = 1/sqrt(fan_in) = 1/sqrt(2*k*k)
    bound = 1.0 / (2 * K * K) ** 0.5
    conv_w = jax.random.uniform(kw, (1, 2, K, K), jnp.float32, -bound, bound)

    ref = _reference(x, conv_w)

    # One image per grid step: size-2 parallel axis (2-core sharding on v7x).
    out = jax.block_until_ready(spatial_attention(x, conv_w, block_n=1))
    assert out.shape == (N, 1, H, W)
    assert bool(jnp.all(jnp.isfinite(out)))
    assert bool(jnp.allclose(out, ref, rtol=1e-4, atol=1e-5)), \
        float(jnp.max(jnp.abs(out - ref)))

    # Whole batch per grid step (what a single-TensorCore v5e/v6e would use).
    out_b = jax.block_until_ready(spatial_attention(x, conv_w, block_n=N))
    assert bool(jnp.allclose(out_b, ref, rtol=1e-4, atol=1e-5)), \
        float(jnp.max(jnp.abs(out_b - ref)))

    print("KERNEL_OK")
</pallas_src>

<mosaic_0001>
module attributes {stable_mosaic.version = 11 : i64} {
  func.func @_spatial_attention_kernel(%arg0: i32, %arg1: memref<1x4x256xf32, #tpu.memory_space<vmem>>, %arg2: memref<49x256xf32, #tpu.memory_space<vmem>>, %arg3: memref<49x256xf32, #tpu.memory_space<vmem>>, %arg4: memref<1x1x256xf32, #tpu.memory_space<vmem>>) attributes {dimension_semantics = [#tpu.dimension_semantics<parallel>], iteration_bounds = array<i64: 2>, scalar_prefetch = 0 : i64, scratch_operands = 0 : i64, tpu.core_type = #tpu.core_type<tc>, window_params = [{transform_indices = @transform_0, window_bounds = array<i64: 1, 4, 256>}, {pipeline_mode = #tpu.pipeline_mode<synchronous>, transform_indices = @transform_1, window_bounds = array<i64: 49, 256>}, {pipeline_mode = #tpu.pipeline_mode<synchronous>, transform_indices = @transform_2, window_bounds = array<i64: 49, 256>}, {transform_indices = @transform_3, window_bounds = array<i64: 1, 1, 256>}]} {
    %c0 = arith.constant 0 : index
    %c0_0 = arith.constant 0 : index
    %c0_1 = arith.constant 0 : index
    %0 = vector.load %arg1[%c0, %c0_0, %c0_1] : memref<1x4x256xf32, #tpu.memory_space<vmem>>, vector<1x4x256xf32>
    %cst = arith.constant dense<0.000000e+00> : vector<1x256xf32>
    %1 = vector.multi_reduction <add>, %0, %cst [1] : vector<1x4x256xf32> to vector<1x256xf32>
    %cst_2 = arith.constant 4.000000e+00 : f32
    %2 = vector.broadcast %cst_2 : f32 to vector<1x256xf32>
    %3 = arith.divf %1, %2 : vector<1x256xf32>
    %cst_3 = arith.constant dense<0xFF800000> : vector<1x256xf32>
    %4 = vector.multi_reduction <maximumf>, %0, %cst_3 [1] : vector<1x4x256xf32> to vector<1x256xf32>
    %cst_4 = arith.constant 0.000000e+00 : f32
    %5 = vector.broadcast %cst_4 : f32 to vector<1x256xf32>
    %cst_5 = arith.constant 0.000000e+00 : f32
    %6 = vector.broadcast %cst_5 : f32 to vector<1x256xf32>
    %cst_6 = arith.constant 0.000000e+00 : f32
    %7 = vector.broadcast %cst_6 : f32 to vector<1x256xf32>
    %cst_7 = arith.constant 0.000000e+00 : f32
    %8 = vector.broadcast %cst_7 : f32 to vector<1x256xf32>
    %c51_i32 = arith.constant 51 : i32
    %9 = tpu.dynamic_rotate %3 by %c51_i32 dim 1 : vector<1x256xf32>, i32 -> vector<1x256xf32>
    %c51_i32_8 = arith.constant 51 : i32
    %10 = tpu.dynamic_rotate %4 by %c51_i32_8 dim 1 : vector<1x256xf32>, i32 -> vector<1x256xf32>
    %c0_9 = arith.constant 0 : index
    %c0_10 = arith.constant 0 : index
    %11 = vector.load %arg2[%c0_9, %c0_10] : memref<49x256xf32, #tpu.memory_space<vmem>>, vector<1x256xf32>
    %c0_11 = arith.constant 0 : index
    %c0_12 = arith.constant 0 : index
    %12 = vector.load %arg3[%c0_11, %c0_12] : memref<49x256xf32, #tpu.memory_space<vmem>>, vector<1x256xf32>
    %13 = arith.mulf %11, %9 : vector<1x256xf32>
    %14 = arith.addf %5, %13 : vector<1x256xf32>
    %15 = arith.mulf %12, %10 : vector<1x256xf32>
    %16 = arith.addf %6, %15 : vector<1x256xf32>
    %c50_i32 = arith.constant 50 : i32
    %17 = tpu.dynamic_rotate %3 by %c50_i32 dim 1 : vector<1x256xf32>, i32 -> vector<1x256xf32>
    %c50_i32_13 = arith.constant 50 : i32
    %18 = tpu.dynamic_rotate %4 by %c50_i32_13 dim 1 : vector<1x256xf32>, i32 -> vector<1x256xf32>
    %c1 = arith.constant 1 : index
    %c0_14 = arith.constant 0 : index
    %19 = vector.load %arg2[%c1, %c0_14] : memref<49x256xf32, #tpu.memory_space<vmem>>, vector<1x256xf32>
    %c1_15 = arith.constant 1 : index
    %c0_16 = arith.constant 0 : index
    %20 = vector.load %arg3[%c1_15, %c0_16] : memref<49x256xf32, #tpu.memory_space<vmem>>, vector<1x256xf32>
    %21 = arith.mulf %19, %17 : vector<1x256xf32>
    %22 = arith.addf %7, %21 : vector<1x256xf32>
    %23 = arith.mulf %20, %18 : vector<1x256xf32>
    %24 = arith.addf %8, %23 : vector<1x256xf32>
    %c49_i32 = arith.constant 49 : i32
    %25 = tpu.dynamic_rotate %3 by %c49_i32 dim 1 : vector<1x256xf32>, i32 -> vector<1x256xf32>
    %c49_i32_17 = arith.constant 49 : i32
    %26 = tpu.dynamic_rotate %4 by %c49_i32_17 dim 1 : vector<1x256xf32>, i32 -> vector<1x256xf32>
    %c2 = arith.constant 2 : index
    %c0_18 = arith.constant 0 : index
    %27 = vector.load %arg2[%c2, %c0_18] : memref<49x256xf32, #tpu.memory_space<vmem>>, vector<1x256xf32>
    %c2_19 = arith.constant 2 : index
    %c0_20 = arith.constant 0 : index
    %28 = vector.load %arg3[%c2_19, %c0_20] : memref<49x256xf32, #tpu.memory_space<vmem>>, vector<1x256xf32>
    %29 = arith.mulf %27, %25 : vector<1x256xf32>
    %30 = arith.addf %14, %29 : vector<1x256xf32>
    %31 = arith.mulf %28, %26 : vector<1x256xf32>
    %32 = arith.addf %16, %31 : vector<1x256xf32>
    %c48_i32 = arith.constant 48 : i32
    %33 = tpu.dynamic_rotate %3 by %c48_i32 dim 1 : vector<1x256xf32>, i32 -> vector<1x256xf32>
    %c48_i32_21 = arith.constant 48 : i32
    %34 = tpu.dynamic_rotate %4 by %c48_i32_21 dim 1 : vector<1x256xf32>, i32 -> vector<1x256xf32>
    %c3 = arith.constant 3 : index
    %c0_22 = arith.constant 0 : index
    %35 = vector.load %arg2[%c3, %c0_22] : memref<49x256xf32, #tpu.memory_space<vmem>>, vector<1x256xf32>
    %c3_23 = arith.constant 3 : index
    %c0_24 = arith.constant 0 : index
    %36 = vector.load %arg3[%c3_23, %c0_24] : memref<49x256xf32, #tpu.memory_space<vmem>>, vector<1x256xf32>
    %37 = arith.mulf %35, %33 : vector<1x256xf32>
    %38 = arith.addf %22, %37 : vector<1x256xf32>
    %39 = arith.mulf %36, %34 : vector<1x256xf32>
    %40 = arith.addf %24, %39 : vector<1x256xf32>
    %c47_i32 = arith.constant 47 : i32
    %41 = tpu.dynamic_rotate %3 by %c47_i32 dim 1 : vector<1x256xf32>, i32 -> vector<1x256xf32>
    %c47_i32_25 = arith.constant 47 : i32
    %42 = tpu.dynamic_rotate %4 by %c47_i32_25 dim 1 : vector<1x256xf32>, i32 -> vector<1x256xf32>
    %c4 = arith.constant 4 : index
    %c0_26 = arith.constant 0 : index
    %43 = vector.load %arg2[%c4, %c0_26] : memref<49x256xf32, #tpu.memory_space<vmem>>, vector<1x256xf32>
    %c4_27 = arith.constant 4 : index
    %c0_28 = arith.constant 0 : index
    %44 = vector.load %arg3[%c4_27, %c0_28] : memref<49x256xf32, #tpu.memory_space<vmem>>, vector<1x256xf32>
    %45 = arith.mulf %43, %41 : vector<1x256xf32>
    %46 = arith.addf %30, %45 : vector<1x256xf32>
    %47 = arith.mulf %44, %42 : vector<1x256xf32>
    %48 = arith.addf %32, %47 : vector<1x256xf32>
    %c46_i32 = arith.constant 46 : i32
    %49 = tpu.dynamic_rotate %3 by %c46_i32 dim 1 : vector<1x256xf32>, i32 -> vector<1x256xf32>
    %c46_i32_29 = arith.constant 46 : i32
    %50 = tpu.dynamic_rotate %4 by %c46_i32_29 dim 1 : vector<1x256xf32>, i32 -> vector<1x256xf32>
    %c5 = arith.constant 5 : index
    %c0_30 = arith.constant 0 : index
    %51 = vector.load %arg2[%c5, %c0_30] : memref<49x256xf32, #tpu.memory_space<vmem>>, vector<1x256xf32>
    %c5_31 = arith.constant 5 : index
    %c0_32 = arith.constant 0 : index
    %52 = vector.load %arg3[%c5_31, %c0_32] : memref<49x256xf32, #tpu.memory_space<vmem>>, vector<1x256xf32>
    %53 = arith.mulf %51, %49 : vector<1x256xf32>
    %54 = arith.addf %38, %53 : vector<1x256xf32>
    %55 = arith.mulf %52, %50 : vector<1x256xf32>
    %56 = arith.addf %40, %55 : vector<1x256xf32>
    %c45_i32 = arith.constant 45 : i32
    %57 = tpu.dynamic_rotate %3 by %c45_i32 dim 1 : vector<1x256xf32>, i32 -> vector<1x256xf32>
    %c45_i32_33 = arith.constant 45 : i32
    %58 = tpu.dynamic_rotate %4 by %c45_i32_33 dim 1 : vector<1x256xf32>, i32 -> vector<1x256xf32>
    %c6 = arith.constant 6 : index
    %c0_34 = arith.constant 0 : index
    %59 = vector.load %arg2[%c6, %c0_34] : memref<49x256xf32, #tpu.memory_space<vmem>>, vector<1x256xf32>
    %c6_35 = arith.constant 6 : index
    %c0_36 = arith.constant 0 : index
    %60 = vector.load %arg3[%c6_35, %c0_36] : memref<49x256xf32, #tpu.memory_space<vmem>>, vector<1x256xf32>
    %61 = arith.mulf %59, %57 : vector<1x256xf32>
    %62 = arith.addf %46, %61 : vector<1x256xf32>
    %63 = arith.mulf %60, %58 : vector<1x256xf32>
    %64 = arith.addf %48, %63 : vector<1x256xf32>
    %c35_i32 = arith.constant 35 : i32
    %65 = tpu.dynamic_rotate %3 by %c35_i32 dim 1 : vector<1x256xf32>, i32 -> vector<1x256xf32>
    %c35_i32_37 = arith.constant 35 : i32
    %66 = tpu.dynamic_rotate %4 by %c35_i32_37 dim 1 : vector<1x256xf32>, i32 -> vector<1x256xf32>
    %c7 = arith.constant 7 : index
    %c0_38 = arith.constant 0 : index
    %67 = vector.load %arg2[%c7, %c0_38] : memref<49x256xf32, #tpu.memory_space<vmem>>, vector<1x256xf32>
    %c7_39 = arith.constant 7 : index
    %c0_40 = arith.constant 0 : index
    %68 = vector.load %arg3[%c7_39, %c0_40] : memref<49x256xf32, #tpu.memory_space<vmem>>, vector<1x256xf32>
    %69 = arith.mulf %67, %65 : vector<1x256xf32>
    %70 = arith.addf %54, %69 : vector<1x256xf32>
    %71 = arith.mulf %68, %66 : vector<1x256xf32>
    %72 = arith.addf %56, %71 : vector<1x256xf32>
    %c34_i32 = arith.constant 34 : i32
    %73 = tpu.dynamic_rotate %3 by %c34_i32 dim 1 : vector<1x256xf32>, i32 -> vector<1x256xf32>
    %c34_i32_41 = arith.constant 34 : i32
    %74 = tpu.dynamic_rotate %4 by %c34_i32_41 dim 1 : vector<1x256xf32>, i32 -> vector<1x256xf32>
    %c8 = arith.constant 8 : index
    %c0_42 = arith.constant 0 : index
    %75 = vector.load %arg2[%c8, %c0_42] : memref<49x256xf32, #tpu.memory_space<vmem>>, vector<1x256xf32>
    %c8_43 = arith.constant 8 : index
    %c0_44 = arith.constant 0 : index
    %76 = vector.load %arg3[%c8_43, %c0_44] : memref<49x256xf32, #tpu.memory_space<vmem>>, vector<1x256xf32>
    %77 = arith.mulf %75, %73 : vector<1x256xf32>
    %78 = arith.addf %62, %77 : vector<1x256xf32>
    %79 = arith.mulf %76, %74 : vector<1x256xf32>
    %80 = arith.addf %64, %79 : vector<1x256xf32>
    %c33_i32 = arith.constant 33 : i32
    %81 = tpu.dynamic_rotate %3 by %c33_i32 dim 1 : vector<1x256xf32>, i32 -> vector<1x256xf32>
    %c33_i32_45 = arith.constant 33 : i32
    %82 = tpu.dynamic_rotate %4 by %c33_i32_45 dim 1 : vector<1x256xf32>, i32 -> vector<1x256xf32>
    %c9 = arith.constant 9 : index
    %c0_46 = arith.constant 0 : index
    %83 = vector.load %arg2[%c9, %c0_46] : memref<49x256xf32, #tpu.memory_space<vmem>>, vector<1x256xf32>
    %c9_47 = arith.constant 9 : index
    %c0_48 = arith.constant 0 : index
    %84 = vector.load %arg3[%c9_47, %c0_48] : memref<49x256xf32, #tpu.memory_space<vmem>>, vector<1x256xf32>
    %85 = arith.mulf %83, %81 : vector<1x256xf32>
    %86 = arith.addf %70, %85 : vector<1x256xf32>
    %87 = arith.mulf %84, %82 : vector<1x256xf32>
    %88 = arith.addf %72, %87 : vector<1x256xf32>
    %c32_i32 = arith.constant 32 : i32
    %89 = tpu.dynamic_rotate %3 by %c32_i32 dim 1 : vector<1x256xf32>, i32 -> vector<1x256xf32>
    %c32_i32_49 = arith.constant 32 : i32
    %90 = tpu.dynamic_rotate %4 by %c32_i32_49 dim 1 : vector<1x256xf32>, i32 -> vector<1x256xf32>
    %c10 = arith.constant 10 : index
    %c0_50 = arith.constant 0 : index
    %91 = vector.load %arg2[%c10, %c0_50] : memref<49x256xf32, #tpu.memory_space<vmem>>, vector<1x256xf32>
    %c10_51 = arith.constant 10 : index
    %c0_52 = arith.constant 0 : index
    %92 = vector.load %arg3[%c10_51, %c0_52] : memref<49x256xf32, #tpu.memory_space<vmem>>, vector<1x256xf32>
    %93 = arith.mulf %91, %89 : vector<1x256xf32>
    %94 = arith.addf %78, %93 : vector<1x256xf32>
    %95 = arith.mulf %92, %90 : vector<1x256xf32>
    %96 = arith.addf %80, %95 : vector<1x256xf32>
    %c31_i32 = arith.constant 31 : i32
    %97 = tpu.dynamic_rotate %3 by %c31_i32 dim 1 : vector<1x256xf32>, i32 -> vector<1x256xf32>
    %c31_i32_53 = arith.constant 31 : i32
    %98 = tpu.dynamic_rotate %4 by %c31_i32_53 dim 1 : vector<1x256xf32>, i32 -> vector<1x256xf32>
    %c11 = arith.constant 11 : index
    %c0_54 = arith.constant 0 : index
    %99 = vector.load %arg2[%c11, %c0_54] : memref<49x256xf32, #tpu.memory_space<vmem>>, vector<1x256xf32>
    %c11_55 = arith.constant 11 : index
    %c0_56 = arith.constant 0 : index
    %100 = vector.load %arg3[%c11_55, %c0_56] : memref<49x256xf32, #tpu.memory_space<vmem>>, vector<1x256xf32>
    %101 = arith.mulf %99, %97 : vector<1x256xf32>
    %102 = arith.addf %86, %101 : vector<1x256xf32>
    %103 = arith.mulf %100, %98 : vector<1x256xf32>
    %104 = arith.addf %88, %103 : vector<1x256xf32>
    %c30_i32 = arith.constant 30 : i32
    %105 = tpu.dynamic_rotate %3 by %c30_i32 dim 1 : vector<1x256xf32>, i32 -> vector<1x256xf32>
    %c30_i32_57 = arith.constant 30 : i32
    %106 = tpu.dynamic_rotate %4 by %c30_i32_57 dim 1 : vector<1x256xf32>, i32 -> vector<1x256xf32>
    %c12 = arith.constant 12 : index
    %c0_58 = arith.constant 0 : index
    %107 = vector.load %arg2[%c12, %c0_58] : memref<49x256xf32, #tpu.memory_space<vmem>>, vector<1x256xf32>
    %c12_59 = arith.constant 12 : index
    %c0_60 = arith.constant 0 : index
    %108 = vector.load %arg3[%c12_59, %c0_60] : memref<49x256xf32, #tpu.memory_space<vmem>>, vector<1x256xf32>
    %109 = arith.mulf %107, %105 : vector<1x256xf32>
    %110 = arith.addf %94, %109 : vector<1x256xf32>
    %111 = arith.mulf %108, %106 : vector<1x256xf32>
    %112 = arith.addf %96, %111 : vector<1x256xf32>
    %c29_i32 = arith.constant 29 : i32
    %113 = tpu.dynamic_rotate %3 by %c29_i32 dim 1 : vector<1x256xf32>, i32 -> vector<1x256xf32>
    %c29_i32_61 = arith.constant 29 : i32
    %114 = tpu.dynamic_rotate %4 by %c29_i32_61 dim 1 : vector<1x256xf32>, i32 -> vector<1x256xf32>
    %c13 = arith.constant 13 : index
    %c0_62 = arith.constant 0 : index
    %115 = vector.load %arg2[%c13, %c0_62] : memref<49x256xf32, #tpu.memory_space<vmem>>, vector<1x256xf32>
    %c13_63 = arith.constant 13 : index
    %c0_64 = arith.constant 0 : index
    %116 = vector.load %arg3[%c13_63, %c0_64] : memref<49x256xf32, #tpu.memory_space<vmem>>, vector<1x256xf32>
    %117 = arith.mulf %115, %113 : vector<1x256xf32>
    %118 = arith.addf %102, %117 : vector<1x256xf32>
    %119 = arith.mulf %116, %114 : vector<1x256xf32>
    %120 = arith.addf %104, %119 : vector<1x256xf32>
    %c19_i32 = arith.constant 19 : i32
    %121 = tpu.dynamic_rotate %3 by %c19_i32 dim 1 : vector<1x256xf32>, i32 -> vector<1x256xf32>
    %c19_i32_65 = arith.constant 19 : i32
    %122 = tpu.dynamic_rotate %4 by %c19_i32_65 dim 1 : vector<1x256xf32>, i32 -> vector<1x256xf32>
    %c14 = arith.constant 14 : index
    %c0_66 = arith.constant 0 : index
    %123 = vector.load %arg2[%c14, %c0_66] : memref<49x256xf32, #tpu.memory_space<vmem>>, vector<1x256xf32>
    %c14_67 = arith.constant 14 : index
    %c0_68 = arith.constant 0 : index
    %124 = vector.load %arg3[%c14_67, %c0_68] : memref<49x256xf32, #tpu.memory_space<vmem>>, vector<1x256xf32>
    %125 = arith.mulf %123, %121 : vector<1x256xf32>
    %126 = arith.addf %110, %125 : vector<1x256xf32>
    %127 = arith.mulf %124, %122 : vector<1x256xf32>
    %128 = arith.addf %112, %127 : vector<1x256xf32>
    %c18_i32 = arith.constant 18 : i32
    %129 = tpu.dynamic_rotate %3 by %c18_i32 dim 1 : vector<1x256xf32>, i32 -> vector<1x256xf32>
    %c18_i32_69 = arith.constant 18 : i32
    %130 = tpu.dynamic_rotate %4 by %c18_i32_69 dim 1 : vector<1x256xf32>, i32 -> vector<1x256xf32>
    %c15 = arith.constant 15 : index
    %c0_70 = arith.constant 0 : index
    %131 = vector.load %arg2[%c15, %c0_70] : memref<49x256xf32, #tpu.memory_space<vmem>>, vector<1x256xf32>
    %c15_71 = arith.constant 15 : index
    %c0_72 = arith.constant 0 : index
    %132 = vector.load %arg3[%c15_71, %c0_72] : memref<49x256xf32, #tpu.memory_space<vmem>>, vector<1x256xf32>
    %133 = arith.mulf %131, %129 : vector<1x256xf32>
    %134 = arith.addf %118, %133 : vector<1x256xf32>
    %135 = arith.mulf %132, %130 : vector<1x256xf32>
    %136 = arith.addf %120, %135 : vector<1x256xf32>
    %c17_i32 = arith.constant 17 : i32
    %137 = tpu.dynamic_rotate %3 by %c17_i32 dim 1 : vector<1x256xf32>, i32 -> vector<1x256xf32>
    %c17_i32_73 = arith.constant 17 : i32
    %138 = tpu.dynamic_rotate %4 by %c17_i32_73 dim 1 : vector<1x256xf32>, i32 -> vector<1x256xf32>
    %c16 = arith.constant 16 : index
    %c0_74 = arith.constant 0 : index
    %139 = vector.load %arg2[%c16, %c0_74] : memref<49x256xf32, #tpu.memory_space<vmem>>, vector<1x256xf32>
    %c16_75 = arith.constant 16 : index
    %c0_76 = arith.constant 0 : index
    %140 = vector.load %arg3[%c16_75, %c0_76] : memref<49x256xf32, #tpu.memory_space<vmem>>, vector<1x256xf32>
    %141 = arith.mulf %139, %137 : vector<1x256xf32>
    %142 = arith.addf %126, %141 : vector<1x256xf32>
    %143 = arith.mulf %140, %138 : vector<1x256xf32>
    %144 = arith.addf %128, %143 : vector<1x256xf32>
    %c16_i32 = arith.constant 16 : i32
    %145 = tpu.dynamic_rotate %3 by %c16_i32 dim 1 : vector<1x256xf32>, i32 -> vector<1x256xf32>
    %c16_i32_77 = arith.constant 16 : i32
    %146 = tpu.dynamic_rotate %4 by %c16_i32_77 dim 1 : vector<1x256xf32>, i32 -> vector<1x256xf32>
    %c17 = arith.constant 17 : index
    %c0_78 = arith.constant 0 : index
    %147 = vector.load %arg2[%c17, %c0_78] : memref<49x256xf32, #tpu.memory_space<vmem>>, vector<1x256xf32>
    %c17_79 = arith.constant 17 : index
    %c0_80 = arith.constant 0 : index
    %148 = vector.load %arg3[%c17_79, %c0_80] : memref<49x256xf32, #tpu.memory_space<vmem>>, vector<1x256xf32>
    %149 = arith.mulf %147, %145 : vector<1x256xf32>
    %150 = arith.addf %134, %149 : vector<1x256xf32>
    %151 = arith.mulf %148, %146 : vector<1x256xf32>
    %152 = arith.addf %136, %151 : vector<1x256xf32>
    %c15_i32 = arith.constant 15 : i32
    %153 = tpu.dynamic_rotate %3 by %c15_i32 dim 1 : vector<1x256xf32>, i32 -> vector<1x256xf32>
    %c15_i32_81 = arith.constant 15 : i32
    %154 = tpu.dynamic_rotate %4 by %c15_i32_81 dim 1 : vector<1x256xf32>, i32 -> vector<1x256xf32>
    %c18 = arith.constant 18 : index
    %c0_82 = arith.constant 0 : index
    %155 = vector.load %arg2[%c18, %c0_82] : memref<49x256xf32, #tpu.memory_space<vmem>>, vector<1x256xf32>
    %c18_83 = arith.constant 18 : index
    %c0_84 = arith.constant 0 : index
    %156 = vector.load %arg3[%c18_83, %c0_84] : memref<49x256xf32, #tpu.memory_space<vmem>>, vector<1x256xf32>
    %157 = arith.mulf %155, %153 : vector<1x256xf32>
    %158 = arith.addf %142, %157 : vector<1x256xf32>
    %159 = arith.mulf %156, %154 : vector<1x256xf32>
    %160 = arith.addf %144, %159 : vector<1x256xf32>
    %c14_i32 = arith.constant 14 : i32
    %161 = tpu.dynamic_rotate %3 by %c14_i32 dim 1 : vector<1x256xf32>, i32 -> vector<1x256xf32>
    %c14_i32_85 = arith.constant 14 : i32
    %162 = tpu.dynamic_rotate %4 by %c14_i32_85 dim 1 : vector<1x256xf32>, i32 -> vector<1x256xf32>
    %c19 = arith.constant 19 : index
    %c0_86 = arith.constant 0 : index
    %163 = vector.load %arg2[%c19, %c0_86] : memref<49x256xf32, #tpu.memory_space<vmem>>, vector<1x256xf32>
    %c19_87 = arith.constant 19 : index
    %c0_88 = arith.constant 0 : index
    %164 = vector.load %arg3[%c19_87, %c0_88] : memref<49x256xf32, #tpu.memory_space<vmem>>, vector<1x256xf32>
    %165 = arith.mulf %163, %161 : vector<1x256xf32>
    %166 = arith.addf %150, %165 : vector<1x256xf32>
    %167 = arith.mulf %164, %162 : vector<1x256xf32>
    %168 = arith.addf %152, %167 : vector<1x256xf32>
    %c13_i32 = arith.constant 13 : i32
    %169 = tpu.dynamic_rotate %3 by %c13_i32 dim 1 : vector<1x256xf32>, i32 -> vector<1x256xf32>
    %c13_i32_89 = arith.constant 13 : i32
    %170 = tpu.dynamic_rotate %4 by %c13_i32_89 dim 1 : vector<1x256xf32>, i32 -> vector<1x256xf32>
    %c20 = arith.constant 20 : index
    %c0_90 = arith.constant 0 : index
    %171 = vector.load %arg2[%c20, %c0_90] : memref<49x256xf32, #tpu.memory_space<vmem>>, vector<1x256xf32>
    %c20_91 = arith.constant 20 : index
    %c0_92 = arith.constant 0 : index
    %172 = vector.load %arg3[%c20_91, %c0_92] : memref<49x256xf32, #tpu.memory_space<vmem>>, vector<1x256xf32>
    %173 = arith.mulf %171, %169 : vector<1x256xf32>
    %174 = arith.addf %158, %173 : vector<1x256xf32>
    %175 = arith.mulf %172, %170 : vector<1x256xf32>
    %176 = arith.addf %160, %175 : vector<1x256xf32>
    %c3_i32 = arith.constant 3 : i32
    %177 = tpu.dynamic_rotate %3 by %c3_i32 dim 1 : vector<1x256xf32>, i32 -> vector<1x256xf32>
    %c3_i32_93 = arith.constant 3 : i32
    %178 = tpu.dynamic_rotate %4 by %c3_i32_93 dim 1 : vector<1x256xf32>, i32 -> vector<1x256xf32>
    %c21 = arith.constant 21 : index
    %c0_94 = arith.constant 0 : index
    %179 = vector.load %arg2[%c21, %c0_94] : memref<49x256xf32, #tpu.memory_space<vmem>>, vector<1x256xf32>
    %c21_95 = arith.constant 21 : index
    %c0_96 = arith.constant 0 : index
    %180 = vector.load %arg3[%c21_95, %c0_96] : memref<49x256xf32, #tpu.memory_space<vmem>>, vector<1x256xf32>
    %181 = arith.mulf %179, %177 : vector<1x256xf32>
    %182 = arith.addf %166, %181 : vector<1x256xf32>
    %183 = arith.mulf %180, %178 : vector<1x256xf32>
    %184 = arith.addf %168, %183 : vector<1x256xf32>
    %c2_i32 = arith.constant 2 : i32
    %185 = tpu.dynamic_rotate %3 by %c2_i32 dim 1 : vector<1x256xf32>, i32 -> vector<1x256xf32>
    %c2_i32_97 = arith.constant 2 : i32
    %186 = tpu.dynamic_rotate %4 by %c2_i32_97 dim 1 : vector<1x256xf32>, i32 -> vector<1x256xf32>
    %c22 = arith.constant 22 : index
    %c0_98 = arith.constant 0 : index
    %187 = vector.load %arg2[%c22, %c0_98] : memref<49x256xf32, #tpu.memory_space<vmem>>, vector<1x256xf32>
    %c22_99 = arith.constant 22 : index
    %c0_100 = arith.constant 0 : index
    %188 = vector.load %arg3[%c22_99, %c0_100] : memref<49x256xf32, #tpu.memory_space<vmem>>, vector<1x256xf32>
    %189 = arith.mulf %187, %185 : vector<1x256xf32>
    %190 = arith.addf %174, %189 : vector<1x256xf32>
    %191 = arith.mulf %188, %186 : vector<1x256xf32>
    %192 = arith.addf %176, %191 : vector<1x256xf32>
    %c1_i32 = arith.constant 1 : i32
    %193 = tpu.dynamic_rotate %3 by %c1_i32 dim 1 : vector<1x256xf32>, i32 -> vector<1x256xf32>
    %c1_i32_101 = arith.constant 1 : i32
    %194 = tpu.dynamic_rotate %4 by %c1_i32_101 dim 1 : vector<1x256xf32>, i32 -> vector<1x256xf32>
    %c23 = arith.constant 23 : index
    %c0_102 = arith.constant 0 : index
    %195 = vector.load %arg2[%c23, %c0_102] : memref<49x256xf32, #tpu.memory_space<vmem>>, vector<1x256xf32>
    %c23_103 = arith.constant 23 : index
    %c0_104 = arith.constant 0 : index
    %196 = vector.load %arg3[%c23_103, %c0_104] : memref<49x256xf32, #tpu.memory_space<vmem>>, vector<1x256xf32>
    %197 = arith.mulf %195, %193 : vector<1x256xf32>
    %198 = arith.addf %182, %197 : vector<1x256xf32>
    %199 = arith.mulf %196, %194 : vector<1x256xf32>
    %200 = arith.addf %184, %199 : vector<1x256xf32>
    %c24 = arith.constant 24 : index
    %c0_105 = arith.constant 0 : index
    %201 = vector.load %arg2[%c24, %c0_105] : memref<49x256xf32, #tpu.memory_space<vmem>>, vector<1x256xf32>
    %c24_106 = arith.constant 24 : index
    %c0_107 = arith.constant 0 : index
    %202 = vector.load %arg3[%c24_106, %c0_107] : memref<49x256xf32, #tpu.memory_space<vmem>>, vector<1x256xf32>
    %203 = arith.mulf %201, %3 : vector<1x256xf32>
    %204 = arith.addf %190, %203 : vector<1x256xf32>
    %205 = arith.mulf %202, %4 : vector<1x256xf32>
    %206 = arith.addf %192, %205 : vector<1x256xf32>
    %c255_i32 = arith.constant 255 : i32
    %207 = tpu.dynamic_rotate %3 by %c255_i32 dim 1 : vector<1x256xf32>, i32 -> vector<1x256xf32>
    %c255_i32_108 = arith.constant 255 : i32
    %208 = tpu.dynamic_rotate %4 by %c255_i32_108 dim 1 : vector<1x256xf32>, i32 -> vector<1x256xf32>
    %c25 = arith.constant 25 : index
    %c0_109 = arith.constant 0 : index
    %209 = vector.load %arg2[%c25, %c0_109] : memref<49x256xf32, #tpu.memory_space<vmem>>, vector<1x256xf32>
    %c25_110 = arith.constant 25 : index
    %c0_111 = arith.constant 0 : index
    %210 = vector.load %arg3[%c25_110, %c0_111] : memref<49x256xf32, #tpu.memory_space<vmem>>, vector<1x256xf32>
    %211 = arith.mulf %209, %207 : vector<1x256xf32>
    %212 = arith.addf %198, %211 : vector<1x256xf32>
    %213 = arith.mulf %210, %208 : vector<1x256xf32>
    %214 = arith.addf %200, %213 : vector<1x256xf32>
    %c254_i32 = arith.constant 254 : i32
    %215 = tpu.dynamic_rotate %3 by %c254_i32 dim 1 : vector<1x256xf32>, i32 -> vector<1x256xf32>
    %c254_i32_112 = arith.constant 254 : i32
    %216 = tpu.dynamic_rotate %4 by %c254_i32_112 dim 1 : vector<1x256xf32>, i32 -> vector<1x256xf32>
    %c26 = arith.constant 26 : index
    %c0_113 = arith.constant 0 : index
    %217 = vector.load %arg2[%c26, %c0_113] : memref<49x256xf32, #tpu.memory_space<vmem>>, vector<1x256xf32>
    %c26_114 = arith.constant 26 : index
    %c0_115 = arith.constant 0 : index
    %218 = vector.load %arg3[%c26_114, %c0_115] : memref<49x256xf32, #tpu.memory_space<vmem>>, vector<1x256xf32>
    %219 = arith.mulf %217, %215 : vector<1x256xf32>
    %220 = arith.addf %204, %219 : vector<1x256xf32>
    %221 = arith.mulf %218, %216 : vector<1x256xf32>
    %222 = arith.addf %206, %221 : vector<1x256xf32>
    %c253_i32 = arith.constant 253 : i32
    %223 = tpu.dynamic_rotate %3 by %c253_i32 dim 1 : vector<1x256xf32>, i32 -> vector<1x256xf32>
    %c253_i32_116 = arith.constant 253 : i32
    %224 = tpu.dynamic_rotate %4 by %c253_i32_116 dim 1 : vector<1x256xf32>, i32 -> vector<1x256xf32>
    %c27 = arith.constant 27 : index
    %c0_117 = arith.constant 0 : index
    %225 = vector.load %arg2[%c27, %c0_117] : memref<49x256xf32, #tpu.memory_space<vmem>>, vector<1x256xf32>
    %c27_118 = arith.constant 27 : index
    %c0_119 = arith.constant 0 : index
    %226 = vector.load %arg3[%c27_118, %c0_119] : memref<49x256xf32, #tpu.memory_space<vmem>>, vector<1x256xf32>
    %227 = arith.mulf %225, %223 : vector<1x256xf32>
    %228 = arith.addf %212, %227 : vector<1x256xf32>
    %229 = arith.mulf %226, %224 : vector<1x256xf32>
    %230 = arith.addf %214, %229 : vector<1x256xf32>
    %c243_i32 = arith.constant 243 : i32
    %231 = tpu.dynamic_rotate %3 by %c243_i32 dim 1 : vector<1x256xf32>, i32 -> vector<1x256xf32>
    %c243_i32_120 = arith.constant 243 : i32
    %232 = tpu.dynamic_rotate %4 by %c243_i32_120 dim 1 : vector<1x256xf32>, i32 -> vector<1x256xf32>
    %c28 = arith.constant 28 : index
    %c0_121 = arith.constant 0 : index
    %233 = vector.load %arg2[%c28, %c0_121] : memref<49x256xf32, #tpu.memory_space<vmem>>, vector<1x256xf32>
    %c28_122 = arith.constant 28 : index
    %c0_123 = arith.constant 0 : index
    %234 = vector.load %arg3[%c28_122, %c0_123] : memref<49x256xf32, #tpu.memory_space<vmem>>, vector<1x256xf32>
    %235 = arith.mulf %233, %231 : vector<1x256xf32>
    %236 = arith.addf %220, %235 : vector<1x256xf32>
    %237 = arith.mulf %234, %232 : vector<1x256xf32>
    %238 = arith.addf %222, %237 : vector<1x256xf32>
    %c242_i32 = arith.constant 242 : i32
    %239 = tpu.dynamic_rotate %3 by %c242_i32 dim 1 : vector<1x256xf32>, i32 -> vector<1x256xf32>
    %c242_i32_124 = arith.constant 242 : i32
    %240 = tpu.dynamic_rotate %4 by %c242_i32_124 dim 1 : vector<1x256xf32>, i32 -> vector<1x256xf32>
    %c29 = arith.constant 29 : index
    %c0_125 = arith.constant 0 : index
    %241 = vector.load %arg2[%c29, %c0_125] : memref<49x256xf32, #tpu.memory_space<vmem>>, vector<1x256xf32>
    %c29_126 = arith.constant 29 : index
    %c0_127 = arith.constant 0 : index
    %242 = vector.load %arg3[%c29_126, %c0_127] : memref<49x256xf32, #tpu.memory_space<vmem>>, vector<1x256xf32>
    %243 = arith.mulf %241, %239 : vector<1x256xf32>
    %244 = arith.addf %228, %243 : vector<1x256xf32>
    %245 = arith.mulf %242, %240 : vector<1x256xf32>
    %246 = arith.addf %230, %245 : vector<1x256xf32>
    %c241_i32 = arith.constant 241 : i32
    %247 = tpu.dynamic_rotate %3 by %c241_i32 dim 1 : vector<1x256xf32>, i32 -> vector<1x256xf32>
    %c241_i32_128 = arith.constant 241 : i32
    %248 = tpu.dynamic_rotate %4 by %c241_i32_128 dim 1 : vector<1x256xf32>, i32 -> vector<1x256xf32>
    %c30 = arith.constant 30 : index
    %c0_129 = arith.constant 0 : index
    %249 = vector.load %arg2[%c30, %c0_129] : memref<49x256xf32, #tpu.memory_space<vmem>>, vector<1x256xf32>
    %c30_130 = arith.constant 30 : index
    %c0_131 = arith.constant 0 : index
    %250 = vector.load %arg3[%c30_130, %c0_131] : memref<49x256xf32, #tpu.memory_space<vmem>>, vector<1x256xf32>
    %251 = arith.mulf %249, %247 : vector<1x256xf32>
    %252 = arith.addf %236, %251 : vector<1x256xf32>
    %253 = arith.mulf %250, %248 : vector<1x256xf32>
    %254 = arith.addf %238, %253 : vector<1x256xf32>
    %c240_i32 = arith.constant 240 : i32
    %255 = tpu.dynamic_rotate %3 by %c240_i32 dim 1 : vector<1x256xf32>, i32 -> vector<1x256xf32>
    %c240_i32_132 = arith.constant 240 : i32
    %256 = tpu.dynamic_rotate %4 by %c240_i32_132 dim 1 : vector<1x256xf32>, i32 -> vector<1x256xf32>
    %c31 = arith.constant 31 : index
    %c0_133 = arith.constant 0 : index
    %257 = vector.load %arg2[%c31, %c0_133] : memref<49x256xf32, #tpu.memory_space<vmem>>, vector<1x256xf32>
    %c31_134 = arith.constant 31 : index
    %c0_135 = arith.constant 0 : index
    %258 = vector.load %arg3[%c31_134, %c0_135] : memref<49x256xf32, #tpu.memory_space<vmem>>, vector<1x256xf32>
    %259 = arith.mulf %257, %255 : vector<1x256xf32>
    %260 = arith.addf %244, %259 : vector<1x256xf32>
    %261 = arith.mulf %258, %256 : vector<1x256xf32>
    %262 = arith.addf %246, %261 : vector<1x256xf32>
    %c239_i32 = arith.constant 239 : i32
    %263 = tpu.dynamic_rotate %3 by %c239_i32 dim 1 : vector<1x256xf32>, i32 -> vector<1x256xf32>
    %c239_i32_136 = arith.constant 239 : i32
    %264 = tpu.dynamic_rotate %4 by %c239_i32_136 dim 1 : vector<1x256xf32>, i32 -> vector<1x256xf32>
    %c32 = arith.constant 32 : index
    %c0_137 = arith.constant 0 : index
    %265 = vector.load %arg2[%c32, %c0_137] : memref<49x256xf32, #tpu.memory_space<vmem>>, vector<1x256xf32>
    %c32_138 = arith.constant 32 : index
    %c0_139 = arith.constant 0 : index
    %266 = vector.load %arg3[%c32_138, %c0_139] : memref<49x256xf32, #tpu.memory_space<vmem>>, vector<1x256xf32>
    %267 = arith.mulf %265, %263 : vector<1x256xf32>
    %268 = arith.addf %252, %267 : vector<1x256xf32>
    %269 = arith.mulf %266, %264 : vector<1x256xf32>
    %270 = arith.addf %254, %269 : vector<1x256xf32>
    %c238_i32 = arith.constant 238 : i32
    %271 = tpu.dynamic_rotate %3 by %c238_i32 dim 1 : vector<1x256xf32>, i32 -> vector<1x256xf32>
    %c238_i32_140 = arith.constant 238 : i32
    %272 = tpu.dynamic_rotate %4 by %c238_i32_140 dim 1 : vector<1x256xf32>, i32 -> vector<1x256xf32>
    %c33 = arith.constant 33 : index
    %c0_141 = arith.constant 0 : index
    %273 = vector.load %arg2[%c33, %c0_141] : memref<49x256xf32, #tpu.memory_space<vmem>>, vector<1x256xf32>
    %c33_142 = arith.constant 33 : index
    %c0_143 = arith.constant 0 : index
    %274 = vector.load %arg3[%c33_142, %c0_143] : memref<49x256xf32, #tpu.memory_space<vmem>>, vector<1x256xf32>
    %275 = arith.mulf %273, %271 : vector<1x256xf32>
    %276 = arith.addf %260, %275 : vector<1x256xf32>
    %277 = arith.mulf %274, %272 : vector<1x256xf32>
    %278 = arith.addf %262, %277 : vector<1x256xf32>
    %c237_i32 = arith.constant 237 : i32
    %279 = tpu.dynamic_rotate %3 by %c237_i32 dim 1 : vector<1x256xf32>, i32 -> vector<1x256xf32>
    %c237_i32_144 = arith.constant 237 : i32
    %280 = tpu.dynamic_rotate %4 by %c237_i32_144 dim 1 : vector<1x256xf32>, i32 -> vector<1x256xf32>
    %c34 = arith.constant 34 : index
    %c0_145 = arith.constant 0 : index
    %281 = vector.load %arg2[%c34, %c0_145] : memref<49x256xf32, #tpu.memory_space<vmem>>, vector<1x256xf32>
    %c34_146 = arith.constant 34 : index
    %c0_147 = arith.constant 0 : index
    %282 = vector.load %arg3[%c34_146, %c0_147] : memref<49x256xf32, #tpu.memory_space<vmem>>, vector<1x256xf32>
    %283 = arith.mulf %281, %279 : vector<1x256xf32>
    %284 = arith.addf %268, %283 : vector<1x256xf32>
    %285 = arith.mulf %282, %280 : vector<1x256xf32>
    %286 = arith.addf %270, %285 : vector<1x256xf32>
    %c227_i32 = arith.constant 227 : i32
    %287 = tpu.dynamic_rotate %3 by %c227_i32 dim 1 : vector<1x256xf32>, i32 -> vector<1x256xf32>
    %c227_i32_148 = arith.constant 227 : i32
    %288 = tpu.dynamic_rotate %4 by %c227_i32_148 dim 1 : vector<1x256xf32>, i32 -> vector<1x256xf32>
    %c35 = arith.constant 35 : index
    %c0_149 = arith.constant 0 : index
    %289 = vector.load %arg2[%c35, %c0_149] : memref<49x256xf32, #tpu.memory_space<vmem>>, vector<1x256xf32>
    %c35_150 = arith.constant 35 : index
    %c0_151 = arith.constant 0 : index
    %290 = vector.load %arg3[%c35_150, %c0_151] : memref<49x256xf32, #tpu.memory_space<vmem>>, vector<1x256xf32>
    %291 = arith.mulf %289, %287 : vector<1x256xf32>
    %292 = arith.addf %276, %291 : vector<1x256xf32>
    %293 = arith.mulf %290, %288 : vector<1x256xf32>
    %294 = arith.addf %278, %293 : vector<1x256xf32>
    %c226_i32 = arith.constant 226 : i32
    %295 = tpu.dynamic_rotate %3 by %c226_i32 dim 1 : vector<1x256xf32>, i32 -> vector<1x256xf32>
    %c226_i32_152 = arith.constant 226 : i32
    %296 = tpu.dynamic_rotate %4 by %c226_i32_152 dim 1 : vector<1x256xf32>, i32 -> vector<1x256xf32>
    %c36 = arith.constant 36 : index
    %c0_153 = arith.constant 0 : index
    %297 = vector.load %arg2[%c36, %c0_153] : memref<49x256xf32, #tpu.memory_space<vmem>>, vector<1x256xf32>
    %c36_154 = arith.constant 36 : index
    %c0_155 = arith.constant 0 : index
    %298 = vector.load %arg3[%c36_154, %c0_155] : memref<49x256xf32, #tpu.memory_space<vmem>>, vector<1x256xf32>
    %299 = arith.mulf %297, %295 : vector<1x256xf32>
    %300 = arith.addf %284, %299 : vector<1x256xf32>
    %301 = arith.mulf %298, %296 : vector<1x256xf32>
    %302 = arith.addf %286, %301 : vector<1x256xf32>
    %c225_i32 = arith.constant 225 : i32
    %303 = tpu.dynamic_rotate %3 by %c225_i32 dim 1 : vector<1x256xf32>, i32 -> vector<1x256xf32>
    %c225_i32_156 = arith.constant 225 : i32
    %304 = tpu.dynamic_rotate %4 by %c225_i32_156 dim 1 : vector<1x256xf32>, i32 -> vector<1x256xf32>
    %c37 = arith.constant 37 : index
    %c0_157 = arith.constant 0 : index
    %305 = vector.load %arg2[%c37, %c0_157] : memref<49x256xf32, #tpu.memory_space<vmem>>, vector<1x256xf32>
    %c37_158 = arith.constant 37 : index
    %c0_159 = arith.constant 0 : index
    %306 = vector.load %arg3[%c37_158, %c0_159] : memref<49x256xf32, #tpu.memory_space<vmem>>, vector<1x256xf32>
    %307 = arith.mulf %305, %303 : vector<1x256xf32>
    %308 = arith.addf %292, %307 : vector<1x256xf32>
    %309 = arith.mulf %306, %304 : vector<1x256xf32>
    %310 = arith.addf %294, %309 : vector<1x256xf32>
    %c224_i32 = arith.constant 224 : i32
    %311 = tpu.dynamic_rotate %3 by %c224_i32 dim 1 : vector<1x256xf32>, i32 -> vector<1x256xf32>
    %c224_i32_160 = arith.constant 224 : i32
    %312 = tpu.dynamic_rotate %4 by %c224_i32_160 dim 1 : vector<1x256xf32>, i32 -> vector<1x256xf32>
    %c38 = arith.constant 38 : index
    %c0_161 = arith.constant 0 : index
    %313 = vector.load %arg2[%c38, %c0_161] : memref<49x256xf32, #tpu.memory_space<vmem>>, vector<1x256xf32>
    %c38_162 = arith.constant 38 : index
    %c0_163 = arith.constant 0 : index
    %314 = vector.load %arg3[%c38_162, %c0_163] : memref<49x256xf32, #tpu.memory_space<vmem>>, vector<1x256xf32>
    %315 = arith.mulf %313, %311 : vector<1x256xf32>
    %316 = arith.addf %300, %315 : vector<1x256xf32>
    %317 = arith.mulf %314, %312 : vector<1x256xf32>
    %318 = arith.addf %302, %317 : vector<1x256xf32>
    %c223_i32 = arith.constant 223 : i32
    %319 = tpu.dynamic_rotate %3 by %c223_i32 dim 1 : vector<1x256xf32>, i32 -> vector<1x256xf32>
    %c223_i32_164 = arith.constant 223 : i32
    %320 = tpu.dynamic_rotate %4 by %c223_i32_164 dim 1 : vector<1x256xf32>, i32 -> vector<1x256xf32>
    %c39 = arith.constant 39 : index
    %c0_165 = arith.constant 0 : index
    %321 = vector.load %arg2[%c39, %c0_165] : memref<49x256xf32, #tpu.memory_space<vmem>>, vector<1x256xf32>
    %c39_166 = arith.constant 39 : index
    %c0_167 = arith.constant 0 : index
    %322 = vector.load %arg3[%c39_166, %c0_167] : memref<49x256xf32, #tpu.memory_space<vmem>>, vector<1x256xf32>
    %323 = arith.mulf %321, %319 : vector<1x256xf32>
    %324 = arith.addf %308, %323 : vector<1x256xf32>
    %325 = arith.mulf %322, %320 : vector<1x256xf32>
    %326 = arith.addf %310, %325 : vector<1x256xf32>
    %c222_i32 = arith.constant 222 : i32
    %327 = tpu.dynamic_rotate %3 by %c222_i32 dim 1 : vector<1x256xf32>, i32 -> vector<1x256xf32>
    %c222_i32_168 = arith.constant 222 : i32
    %328 = tpu.dynamic_rotate %4 by %c222_i32_168 dim 1 : vector<1x256xf32>, i32 -> vector<1x256xf32>
    %c40 = arith.constant 40 : index
    %c0_169 = arith.constant 0 : index
    %329 = vector.load %arg2[%c40, %c0_169] : memref<49x256xf32, #tpu.memory_space<vmem>>, vector<1x256xf32>
    %c40_170 = arith.constant 40 : index
    %c0_171 = arith.constant 0 : index
    %330 = vector.load %arg3[%c40_170, %c0_171] : memref<49x256xf32, #tpu.memory_space<vmem>>, vector<1x256xf32>
    %331 = arith.mulf %329, %327 : vector<1x256xf32>
    %332 = arith.addf %316, %331 : vector<1x256xf32>
    %333 = arith.mulf %330, %328 : vector<1x256xf32>
    %334 = arith.addf %318, %333 : vector<1x256xf32>
    %c221_i32 = arith.constant 221 : i32
    %335 = tpu.dynamic_rotate %3 by %c221_i32 dim 1 : vector<1x256xf32>, i32 -> vector<1x256xf32>
    %c221_i32_172 = arith.constant 221 : i32
    %336 = tpu.dynamic_rotate %4 by %c221_i32_172 dim 1 : vector<1x256xf32>, i32 -> vector<1x256xf32>
    %c41 = arith.constant 41 : index
    %c0_173 = arith.constant 0 : index
    %337 = vector.load %arg2[%c41, %c0_173] : memref<49x256xf32, #tpu.memory_space<vmem>>, vector<1x256xf32>
    %c41_174 = arith.constant 41 : index
    %c0_175 = arith.constant 0 : index
    %338 = vector.load %arg3[%c41_174, %c0_175] : memref<49x256xf32, #tpu.memory_space<vmem>>, vector<1x256xf32>
    %339 = arith.mulf %337, %335 : vector<1x256xf32>
    %340 = arith.addf %324, %339 : vector<1x256xf32>
    %341 = arith.mulf %338, %336 : vector<1x256xf32>
    %342 = arith.addf %326, %341 : vector<1x256xf32>
    %c211_i32 = arith.constant 211 : i32
    %343 = tpu.dynamic_rotate %3 by %c211_i32 dim 1 : vector<1x256xf32>, i32 -> vector<1x256xf32>
    %c211_i32_176 = arith.constant 211 : i32
    %344 = tpu.dynamic_rotate %4 by %c211_i32_176 dim 1 : vector<1x256xf32>, i32 -> vector<1x256xf32>
    %c42 = arith.constant 42 : index
    %c0_177 = arith.constant 0 : index
    %345 = vector.load %arg2[%c42, %c0_177] : memref<49x256xf32, #tpu.memory_space<vmem>>, vector<1x256xf32>
    %c42_178 = arith.constant 42 : index
    %c0_179 = arith.constant 0 : index
    %346 = vector.load %arg3[%c42_178, %c0_179] : memref<49x256xf32, #tpu.memory_space<vmem>>, vector<1x256xf32>
    %347 = arith.mulf %345, %343 : vector<1x256xf32>
    %348 = arith.addf %332, %347 : vector<1x256xf32>
    %349 = arith.mulf %346, %344 : vector<1x256xf32>
    %350 = arith.addf %334, %349 : vector<1x256xf32>
    %c210_i32 = arith.constant 210 : i32
    %351 = tpu.dynamic_rotate %3 by %c210_i32 dim 1 : vector<1x256xf32>, i32 -> vector<1x256xf32>
    %c210_i32_180 = arith.constant 210 : i32
    %352 = tpu.dynamic_rotate %4 by %c210_i32_180 dim 1 : vector<1x256xf32>, i32 -> vector<1x256xf32>
    %c43 = arith.constant 43 : index
    %c0_181 = arith.constant 0 : index
    %353 = vector.load %arg2[%c43, %c0_181] : memref<49x256xf32, #tpu.memory_space<vmem>>, vector<1x256xf32>
    %c43_182 = arith.constant 43 : index
    %c0_183 = arith.constant 0 : index
    %354 = vector.load %arg3[%c43_182, %c0_183] : memref<49x256xf32, #tpu.memory_space<vmem>>, vector<1x256xf32>
    %355 = arith.mulf %353, %351 : vector<1x256xf32>
    %356 = arith.addf %340, %355 : vector<1x256xf32>
    %357 = arith.mulf %354, %352 : vector<1x256xf32>
    %358 = arith.addf %342, %357 : vector<1x256xf32>
    %c209_i32 = arith.constant 209 : i32
    %359 = tpu.dynamic_rotate %3 by %c209_i32 dim 1 : vector<1x256xf32>, i32 -> vector<1x256xf32>
    %c209_i32_184 = arith.constant 209 : i32
    %360 = tpu.dynamic_rotate %4 by %c209_i32_184 dim 1 : vector<1x256xf32>, i32 -> vector<1x256xf32>
    %c44 = arith.constant 44 : index
    %c0_185 = arith.constant 0 : index
    %361 = vector.load %arg2[%c44, %c0_185] : memref<49x256xf32, #tpu.memory_space<vmem>>, vector<1x256xf32>
    %c44_186 = arith.constant 44 : index
    %c0_187 = arith.constant 0 : index
    %362 = vector.load %arg3[%c44_186, %c0_187] : memref<49x256xf32, #tpu.memory_space<vmem>>, vector<1x256xf32>
    %363 = arith.mulf %361, %359 : vector<1x256xf32>
    %364 = arith.addf %348, %363 : vector<1x256xf32>
    %365 = arith.mulf %362, %360 : vector<1x256xf32>
    %366 = arith.addf %350, %365 : vector<1x256xf32>
    %c208_i32 = arith.constant 208 : i32
    %367 = tpu.dynamic_rotate %3 by %c208_i32 dim 1 : vector<1x256xf32>, i32 -> vector<1x256xf32>
    %c208_i32_188 = arith.constant 208 : i32
    %368 = tpu.dynamic_rotate %4 by %c208_i32_188 dim 1 : vector<1x256xf32>, i32 -> vector<1x256xf32>
    %c45 = arith.constant 45 : index
    %c0_189 = arith.constant 0 : index
    %369 = vector.load %arg2[%c45, %c0_189] : memref<49x256xf32, #tpu.memory_space<vmem>>, vector<1x256xf32>
    %c45_190 = arith.constant 45 : index
    %c0_191 = arith.constant 0 : index
    %370 = vector.load %arg3[%c45_190, %c0_191] : memref<49x256xf32, #tpu.memory_space<vmem>>, vector<1x256xf32>
    %371 = arith.mulf %369, %367 : vector<1x256xf32>
    %372 = arith.addf %356, %371 : vector<1x256xf32>
    %373 = arith.mulf %370, %368 : vector<1x256xf32>
    %374 = arith.addf %358, %373 : vector<1x256xf32>
    %c207_i32 = arith.constant 207 : i32
    %375 = tpu.dynamic_rotate %3 by %c207_i32 dim 1 : vector<1x256xf32>, i32 -> vector<1x256xf32>
    %c207_i32_192 = arith.constant 207 : i32
    %376 = tpu.dynamic_rotate %4 by %c207_i32_192 dim 1 : vector<1x256xf32>, i32 -> vector<1x256xf32>
    %c46 = arith.constant 46 : index
    %c0_193 = arith.constant 0 : index
    %377 = vector.load %arg2[%c46, %c0_193] : memref<49x256xf32, #tpu.memory_space<vmem>>, vector<1x256xf32>
    %c46_194 = arith.constant 46 : index
    %c0_195 = arith.constant 0 : index
    %378 = vector.load %arg3[%c46_194, %c0_195] : memref<49x256xf32, #tpu.memory_space<vmem>>, vector<1x256xf32>
    %379 = arith.mulf %377, %375 : vector<1x256xf32>
    %380 = arith.addf %364, %379 : vector<1x256xf32>
    %381 = arith.mulf %378, %376 : vector<1x256xf32>
    %382 = arith.addf %366, %381 : vector<1x256xf32>
    %c206_i32 = arith.constant 206 : i32
    %383 = tpu.dynamic_rotate %3 by %c206_i32 dim 1 : vector<1x256xf32>, i32 -> vector<1x256xf32>
    %c206_i32_196 = arith.constant 206 : i32
    %384 = tpu.dynamic_rotate %4 by %c206_i32_196 dim 1 : vector<1x256xf32>, i32 -> vector<1x256xf32>
    %c47 = arith.constant 47 : index
    %c0_197 = arith.constant 0 : index
    %385 = vector.load %arg2[%c47, %c0_197] : memref<49x256xf32, #tpu.memory_space<vmem>>, vector<1x256xf32>
    %c47_198 = arith.constant 47 : index
    %c0_199 = arith.constant 0 : index
    %386 = vector.load %arg3[%c47_198, %c0_199] : memref<49x256xf32, #tpu.memory_space<vmem>>, vector<1x256xf32>
    %387 = arith.mulf %385, %383 : vector<1x256xf32>
    %388 = arith.addf %372, %387 : vector<1x256xf32>
    %389 = arith.mulf %386, %384 : vector<1x256xf32>
    %390 = arith.addf %374, %389 : vector<1x256xf32>
    %c205_i32 = arith.constant 205 : i32
    %391 = tpu.dynamic_rotate %3 by %c205_i32 dim 1 : vector<1x256xf32>, i32 -> vector<1x256xf32>
    %c205_i32_200 = arith.constant 205 : i32
    %392 = tpu.dynamic_rotate %4 by %c205_i32_200 dim 1 : vector<1x256xf32>, i32 -> vector<1x256xf32>
    %c48 = arith.constant 48 : index
    %c0_201 = arith.constant 0 : index
    %393 = vector.load %arg2[%c48, %c0_201] : memref<49x256xf32, #tpu.memory_space<vmem>>, vector<1x256xf32>
    %c48_202 = arith.constant 48 : index
    %c0_203 = arith.constant 0 : index
    %394 = vector.load %arg3[%c48_202, %c0_203] : memref<49x256xf32, #tpu.memory_space<vmem>>, vector<1x256xf32>
    %395 = arith.mulf %393, %391 : vector<1x256xf32>
    %396 = arith.addf %380, %395 : vector<1x256xf32>
    %397 = arith.mulf %394, %392 : vector<1x256xf32>
    %398 = arith.addf %382, %397 : vector<1x256xf32>
    %399 = arith.addf %396, %398 : vector<1x256xf32>
    %400 = arith.addf %388, %390 : vector<1x256xf32>
    %401 = arith.addf %399, %400 : vector<1x256xf32>
    %402 = arith.negf %401 : vector<1x256xf32>
    %403 = math.exp %402 : vector<1x256xf32>
    %cst_204 = arith.constant 1.000000e+00 : f32
    %404 = vector.broadcast %cst_204 : f32 to vector<1x256xf32>
    %405 = arith.addf %404, %403 : vector<1x256xf32>
    %406 = arith.divf %404, %405 : vector<1x256xf32>
    %407 = vector.shape_cast %406 : vector<1x256xf32> to vector<1x1x256xf32>
    %c0_205 = arith.constant 0 : index
    %c0_206 = arith.constant 0 : index
    %c0_207 = arith.constant 0 : index
    %408 = vector.load %arg4[%c0_205, %c0_206, %c0_207] : memref<1x1x256xf32, #tpu.memory_space<vmem>>, vector<1x1x256xf32>
    tpu.vector_store %arg4[%c0_205, %c0_206, %c0_207], %407 {strides = array<i32>} : memref<1x1x256xf32, #tpu.memory_space<vmem>>, vector<1x1x256xf32>,
    return
  }
  func.func @transform_0(%arg0: i32) -> (i32, i32, i32) {
    %c0_i32 = arith.constant 0 : i32
    %c0_i32_0 = arith.constant 0 : i32
    %c0_i32_1 = arith.constant 0 : i32
    return %arg0, %c0_i32, %c0_i32_0 : i32, i32, i32
  }
  func.func @transform_1(%arg0: i32) -> (i32, i32) {
    %c0_i32 = arith.constant 0 : i32
    %c0_i32_0 = arith.constant 0 : i32
    %c0_i32_1 = arith.constant 0 : i32
    return %c0_i32, %c0_i32_0 : i32, i32
  }
  func.func @transform_2(%arg0: i32) -> (i32, i32) {
    %c0_i32 = arith.constant 0 : i32
    %c0_i32_0 = arith.constant 0 : i32
    %c0_i32_1 = arith.constant 0 : i32
    return %c0_i32, %c0_i32_0 : i32, i32
  }
  func.func @transform_3(%arg0: i32) -> (i32, i32, i32) {
    %c0_i32 = arith.constant 0 : i32
    %c0_i32_0 = arith.constant 0 : i32
    %c0_i32_1 = arith.constant 0 : i32
    return %arg0, %c0_i32, %c0_i32_0 : i32, i32, i32
  }
}

</mosaic_0001>

<bundles_post_ra>
// kernel: tpu_custom_call.1
= control target key start
LH: loop header
LB: loop body
LE: loop exit
PB: predicated region body
PF: predicated region fallthrough
CT: control target
= control target key end

     0   :  { %8 = vsyncpa [#allocation3], 0  ;;  %s4960_s0 = inlined_call_operand.hbm [shape: f32[2,4,256], index: 0, kind: input, shape index: {}]   ;;  %s4961_s1 = inlined_call_operand.hbm [shape: f32[49,256], index: 1, kind: input, shape index: {}]   ;;  %s4962_s2 = inlined_call_operand.hbm [shape: f32[49,256], index: 2, kind: input, shape index: {}]   ;;  %s4963_s3 = inlined_call_operand.hbm [shape: f32[2,1,256], index: 3, kind: output, shape index: {}]  }
   0x1   :  { %10 = vsyncpa [#allocation3 + $0x1], 0 }
   0x2   :  { %11 = vsyncpa [#allocation6], 0 }
   0x3   :  { %12 = vsyncpa [#allocation4], 0 }
   0x4   :  { %14 = vsyncpa [#allocation4 + $0x1], 0  ;;  %s3519_s12 = smov 0   ;;  %s3521_s13 = smov 0  }
   0x5   :  { %s3523_s14 = smov 0   ;;  %s3525_s15 = smov 0  }
   0x6 LB: > { %s3540_s16 = sadd.s32 4294967295, %s3442_s15   ;;  %s3150_s17 = sadd.s32 4294967294, %s3442_s15   ;;  %s3442_s15 = sphi %s3525_s15, %s5043_s15   ;;  %s3438_s14 = sphi %s3523_s14, %s5042_s14   ;;  %s3434_s13 = sphi %s3521_s13, %s5041_s13   ;;  %s3430_s12 = sphi %s3519_s12, %s5040_s12  }
   0x7   : > { %p40_p0 = scmp.ne.s32.totalorder %s3434_s13, %s3430_s12  ;;  %p4964_p1 = scmp.eq.s32.totalorder %s3540_s16, 0 }
   0x8   : > { %p112_p3 = scmp.eq.s32.totalorder %s3150_s17, 1  ;;  %p3151_p5 = scmp.ge.s32.totalorder %s3442_s15, 1 }
   0x9   : > { %p3549_p4 = por %p4964_p1, %p40_p0  ;;  %p119_p7 = scmp.lt.s32.totalorder %s3442_s15, 3 }
   0xa   : > { %p3554_p6 = por %p112_p3, %p40_p0  ;;  %s3444_s21 = smov [#allocation5]  }
   0xb   : > { %s4987_s18 = scalar_select %p3549_p4, 1, 0 }
   0xc   : > { %s4988_s19 = scalar_select %p3554_p6, 1, 0 }
   0xd   : > { %p3559_p8 = pnand %p3151_p5, %p119_p7  ;;  %s131_s22 = sshll.u32 %s3444_s21, 4  ;;  %s132_s22 = int_to_ptr.vmem [resolvable:$true] %s131_s22 }
   0xe   : > { %s3445_s24 = smov [#allocation7]   ;;  %s3305_s26 = scalar_lea.vmem %s132_s22, 1792 }
   0xf   : > { %s4989_s20 = scalar_select %p3559_p8, 1, 0 }
  0x10   : > { %p3183_p9 = pneg %p3559_p8  ;;  %s144_s25 = sshll.u32 %s3445_s24, 4  ;;  %s145_s25 = int_to_ptr.vmem [resolvable:$true] %s144_s25 }
  0x11   : > { %p3306_p13 = scmp.ne.s32.totalorder %s132_s22, %s3305_s26  ;;  %p3313_p5 = scmp.lt.s32.totalorder %s132_s22, %s132_s22 }
  0x12   : > { %p3568_p11 = pnand %p3183_p9, %p4964_p1  ;;  %p3314_p7 = scmp.lt.s32.totalorder %s3305_s26, %s3305_s26 }
  0x14   : > { %p3296_p12 = pneg %p3568_p11  ;;  %p3315_p10 = por %p3314_p7, %p3313_p5 }
  0x16   : > { %p3308_p0 = pnand %p3306_p13, %p3296_p12 }
  0x18   : > { %p3309_p3 = pneg %p3308_p0 }
  0x1a   : > { %p3316_p9 = pnand %p3315_p10, %p3309_p3 }
  0x1c   : > { %3319 = shalt.err (!%p3316_p9)
}
  0x1d   : > { %s3446_s27 = smov 256   ;;  %s3447_s28 = smov 16  }
  0x1e   : > { %3186 = dma.hbm_to_vmem [thread:$0]  (!%p3568_p11), %s4961_s1, 1792, %s132_s22, [#allocation6], %s3446_s27, %s3446_s27, %s3447_s28  }
  0x1f   : > { %s3331_s4 = scalar_lea.vmem %s145_s25, 1792  ;;  %p3339_p2 = scmp.lt.s32.totalorder %s145_s25, %s145_s25 }
  0x20   : > { %p3332_p1 = scmp.ne.s32.totalorder %s145_s25, %s3331_s4  ;;  %p3340_p6 = scmp.lt.s32.totalorder %s3331_s4, %s3331_s4 }
  0x22   : > { %p3334_p13 = pnand %p3332_p1, %p3296_p12  ;;  %p3341_p5 = por %p3340_p6, %p3339_p2 }
  0x24   : > { %p3335_p0 = pneg %p3334_p13 }
  0x26   : > { %p3342_p10 = pnand %p3341_p5, %p3335_p0 }
  0x28   : > { %3345 = shalt.err (!%p3342_p10)
}
  0x29   : > { %3189 = dma.hbm_to_vmem [thread:$0]  (!%p3568_p11), %s4962_s2, 1792, %s145_s25, [#allocation6], %s3446_s27, %s3446_s27, %s3447_s28  }
  0x2a   : > { %s3591_s7 = sadd.s32 1, %s3442_s15   ;;  %s27_s8 = sadd.s32 1, %s3438_s14 }
  0x2b   : > { %s24_s9 = ssub.s32 %s3442_s15, %s3591_s7  ;;  %p34_p1 = scmp.ne.s32.totalorder %s3438_s14, %s3434_s13 }
  0x2c   : > { %p25_p2 = scmp.eq.s32.totalorder %s24_s9, 0  ;;  %p35_p6 = scmp.eq.s32.totalorder %s3442_s15, 0 }
  0x2d   : > { %p4991_p12 = scmp.eq.s32.totalorder %s3540_s16, 1  ;;  %p3200_p7 = scmp.lt.s32.totalorder %s3442_s15, 2 }
  0x2e   : > { %s3607_s11 = scalar_select %p25_p2, %s3438_s14, %s27_s8  }
  0x2f   : > { %p3601_p3 = por %p4991_p12, %p34_p1  ;;  %p36_p9 = por %p35_p6, %p34_p1 }
  0x30   : > { %s158_s17 = sand.u32 1, %s3438_s14   ;;  %s3169_s22 = sshll.u32 %s3442_s15, 7 }
  0x31   : > { %s4992_s10 = scalar_select %p3601_p3, 1, 0 }
  0x32   : > { %s3155_s21 = sshll.u32 %s158_s17, 3  ;;  %s3614_s25 = scalar_lea.hbm %s4960_s0, %s3169_s22 }
  0x33   : > { %s162_s26 = scalar_lea.vmem [#allocation2], %s3155_s21  ;;  %p3616_p11 = pnand %p3200_p7, %p36_p9 }
  0x34   : > { %s170_s27 = sshll.u32 %s162_s26, 4  ;;  %s159_s29 = scalar_lea.sflag [#allocation3], %s158_s17  ;;  %s171_s27 = int_to_ptr.vmem [resolvable:$true] %s170_s27 }
  0x35   : > { %s3346_s30 = scalar_lea.hbm %s3614_s25, 128  ;;  %p3348_p0 = pneg %p3616_p11 }
  0x36   : > { %p3347_p13 = scmp.ne.s32.totalorder %s3614_s25, %s3346_s30  ;;  %s3351_s6 = scalar_lea.hbm %s4960_s0, 256 }
  0x37   : > { %p3352_p1 = scmp.lt.s32.totalorder %s3614_s25, %s4960_s0  ;;  %p3353_p2 = scmp.lt.s32.totalorder %s3351_s6, %s3346_s30 }
  0x38   : > { %p3349_p5 = pnand %p3348_p0, %p3347_p13 }
  0x39   : > { %p3354_p6 = por %p3353_p2, %p3352_p1 }
  0x3a   : > { %p3350_p10 = pneg %p3349_p5 }
  0x3c   : > { %p3355_p12 = pnand %p3354_p6, %p3350_p10 }
  0x3e   : > { %3358 = shalt.err (!%p3355_p12)
}
  0x3f   : > { %s3359_s21 = scalar_lea.vmem %s171_s27, 128  ;;  %s3448_s17 = smov [#allocation2]  }
  0x40   : > { %p3360_p7 = scmp.ne.s32.totalorder %s171_s27, %s3359_s21  ;;  %s3364_s22 = sshll.u32 %s3448_s17, 4  ;;  %s3365_s22 = int_to_ptr.vmem [resolvable:$false] %s3364_s22 }
  0x41   : > { %s3366_s23 = scalar_lea.vmem %s3365_s22, 256  ;;  %p3367_p13 = scmp.lt.s32.totalorder %s171_s27, %s3365_s22 }
  0x42   : > { %p3362_p9 = pnand %p3360_p7, %p3348_p0  ;;  %p3368_p5 = scmp.lt.s32.totalorder %s3366_s23, %s3359_s21 }
  0x44   : > { %p3363_p3 = pneg %p3362_p9  ;;  %p3369_p4 = por %p3368_p5, %p3367_p13 }
  0x46   : > { %p3370_p8 = pnand %p3369_p4, %p3363_p3 }
  0x48   : > { %3373 = shalt.err (!%p3370_p8)
}
  0x49   : > { %3193 = dma.hbm_to_vmem [thread:$0]  (!%p3616_p11), %s3614_s25, 128, %s171_s27, %s159_s29  }
  0x4a   : > { %p4994_p10 = scmp.ne.s32.totalorder %s4989_s20, 0 }
  0x4c   : > { %179 = sbr.rel (%p4994_p10) target bundleno = 658 (0x292), region = 32 }
  0x51   : > { %s3637_s24 = sand.u32 1, %s3434_s13   ;;  %p4995_p0 = scmp.ne.s32.totalorder %s4987_s18, 0 }
  0x52   : > { %s3159_s26 = sshll.u32 %s3637_s24, 3  ;;  %s182_s30 = scalar_lea.sflag [#allocation3], %s3637_s24 }
  0x53   : > { %s185_s4 = scalar_lea.vmem [#allocation2], %s3159_s26 }
  0x54   : > { %3417 = dma.done.wait (%p4995_p0), %s182_s30, 128  }
  0x55   : > { %3419 = vsyncadd (%p4995_p0), %s182_s30, 4294967168  ;;  %p4996_p4 = scmp.eq.s32.totalorder %s3540_s16, 0 }
  0x57   : > { %3421 = dma.done.wait (%p4996_p4), [#allocation6], 3584   ;;  %p4997_p8 = pmov %p4996_p4 }
  0x58   : > { %vm220_vm0 = vcmask 1043456   ;;  %v216_v0 = vld [vmem:[%s185_s4] sm:$0xff]  ;;  %s3449_s18 = smov 50   ;;  %s3450_s20 = smov 51  }
  0x59   : > { %3423 = vsyncadd (%p4997_p8), [#allocation6], 4294963712  ;;  %v238_v1 = vsel %vm220_vm0, %v216_v0, -inf  ;;  %v218_v2 = vcombine.high %v216_v0, %v216_v0  ;;  %v221_v3 = vsel %vm220_vm0, %v216_v0, 0.0  ;;  %s3451_s25 = smov 49   ;;  %s3452_s27 = smov 48  }
  0x5a   : > { %v239_v4 = vrot.slane %v238_v1, 4  ;;  %v222_v5 = vrot.slane %v221_v3, 4  ;;  %s3453_s28 = smov 47   ;;  %s3454_s29 = smov 46  }
  0x5b   : > { %v245_v6 = vsel %vm220_vm0, %v218_v2, -inf  ;;  %v228_v7 = vsel %vm220_vm0, %v218_v2, 0.0  ;;  %s3455_s5 = smov 45   ;;  %s3456_s6 = smov 35  }
  0x5c   : > { %v240_v8 = vmax.f32 %v238_v1, %v239_v4  ;;  %v246_v9 = vrot.slane %v245_v6, 4  ;;  %v223_v10 = vadd.f32 %v222_v5, %v221_v3  ;;  %v229_v11 = vrot.slane %v228_v7, 4  ;;  %s3457_s8 = smov 34   ;;  %s3458_s9 = smov 33  }
  0x5d   : > { %s3459_s21 = smov 32   ;;  %s3460_s17 = smov 31  }
  0x5e   : > { %v241_v12 = vrot.slane %v240_v8, 2  ;;  %v247_v13 = vmax.f32 %v245_v6, %v246_v9  ;;  %v224_v14 = vrot.slane %v223_v10, 2  ;;  %v230_v15 = vadd.f32 %v229_v11, %v228_v7  ;;  %s3461_s22 = smov 30   ;;  %s3462_s23 = smov 29  }
  0x5f   : > { %s3463_s26 = smov 19   ;;  %s3464_s30 = smov 18  }
  0x60   : > { %v242_v16 = vmax.f32 %v240_v8, %v241_v12  ;;  %v248_v17 = vrot.slane %v247_v13, 2  ;;  %v225_v18 = vadd.f32 %v224_v14, %v223_v10  ;;  %v231_v22 = vrot.slane %v230_v15, 2  ;;  %s3465_s4 = smov 17   ;;  %p5037_p11 = scmp.ne.s32.totalorder %s4992_s10, 0 }
  0x62   : > { %v243_v19 = vrot.slane %v242_v16, 1  ;;  %v249_v20 = vmax.f32 %v247_v13, %v248_v17  ;;  %v226_v21 = vrot.slane %v225_v18, 1  ;;  %v232_v27 = vadd.f32 %v231_v22, %v230_v15 }
  0x64   : > { %v3649_v23 = vmax.f32 %v242_v16, %v243_v19  ;;  %v250_v24 = vrot.slane %v249_v20, 1  ;;  %v227_v26 = vadd.f32 %v226_v21, %v225_v18  ;;  %v233_v29 = vrot.slane %v232_v27, 1 }
  0x66   : > { %316 = vrot.lane.b32.xlu0 %v3649_v23, %s3449_s18  ;;  %261 = vrot.lane.b32.xlu1 %v3649_v23, %s3450_s20  ;;  %v3653_v25 = vmax.f32 %v249_v20, %v250_v24  ;;  %v3657_v28 = vmul.f32 0.25, %v227_v26  ;;  %v234_v30 = vadd.f32 %v233_v29, %v232_v27  ;;  %v4974_v26 = vlaneseq }
  0x68   : > { %v3663_v31 = vmul.f32 0.25, %v234_v30  ;;  %v3890_v30 = vand.u32 127, %v4974_v26 }
  0x6a   : > { %373 = vrot.lane.b32.xlu0 %v3649_v23, %s3451_s25  ;;  %263 = vrot.lane.b32.xlu1 %v3653_v25, %s3450_s20  ;;  %vm258_vm1 = vcmp.lt.s32.totalorder %v3890_v30, 51  ;;  %vm313_vm2 = vcmp.lt.s32.totalorder %v3890_v30, 50  ;;  %vm370_vm3 = vcmp.lt.s32.totalorder %v3890_v30, 49  ;;  %vm427_vm4 = vcmp.lt.s32.totalorder %v3890_v30, 48 }
  0x6b   : > { %vm484_vm5 = vcmp.lt.s32.totalorder %v3890_v30, 47  ;;  %vm541_vm6 = vcmp.lt.s32.totalorder %v3890_v30, 46  ;;  %vm598_vm7 = vcmp.lt.s32.totalorder %v3890_v30, 45  ;;  %vm655_vm8 = vcmp.lt.s32.totalorder %v3890_v30, 35 }
  0x6c   : > { %vm712_vm9 = vcmp.lt.s32.totalorder %v3890_v30, 34  ;;  %vm769_vm10 = vcmp.lt.s32.totalorder %v3890_v30, 33  ;;  %vm826_vm11 = vcmp.lt.s32.totalorder %v3890_v30, 32  ;;  %vm883_vm12 = vcmp.lt.s32.totalorder %v3890_v30, 31 }
  0x6d   : > { %vm940_vm13 = vcmp.lt.s32.totalorder %v3890_v30, 30  ;;  %vm997_vm14 = vcmp.lt.s32.totalorder %v3890_v30, 29  ;;  %vm1054_vm15 = vcmp.lt.s32.totalorder %v3890_v30, 19  ;;  %vm1111_vm0 = vcmp.lt.s32.totalorder %v3890_v30, 18 }
  0x6e   : > { %252 = vrot.lane.b32.xlu0 %v3657_v28, %s3450_s20  ;;  %318 = vrot.lane.b32.xlu1 %v3653_v25, %s3449_s18 }
  0x72   : > { %309 = vrot.lane.b32.xlu0 %v3657_v28, %s3449_s18  ;;  %375 = vrot.lane.b32.xlu1 %v3653_v25, %s3451_s25 }
  0x76   : > { %366 = vrot.lane.b32.xlu0 %v3657_v28, %s3451_s25  ;;  %311 = vrot.lane.b32.xlu1 %v3663_v31, %s3449_s18  ;;  %s3466_s18 = smov 16  }
  0x7a   : > { %423 = vrot.lane.b32.xlu0 %v3657_v28, %s3452_s27  ;;  %368 = vrot.lane.b32.xlu1 %v3663_v31, %s3451_s25  ;;  %s3468_s25 = smov 14  }
  0x7e   : > { %425 = vrot.lane.b32.xlu1 %v3663_v31, %s3452_s27  ;;  %254 = vrot.lane.b32.xlu0 %v3663_v31, %s3450_s20  ;;  %s3467_s20 = smov 15  }
  0x82   : > { %432 = vrot.lane.b32.xlu1 %v3653_v25, %s3452_s27  ;;  %430 = vrot.lane.b32.xlu0 %v3649_v23, %s3452_s27  ;;  %s3469_s27 = smov 13  }
  0x86   : > { %482 = vrot.lane.b32.xlu1 %v3663_v31, %s3453_s28  ;;  %480 = vrot.lane.b32.xlu0 %v3657_v28, %s3453_s28 }
  0x8a   : > { %489 = vrot.lane.b32.xlu1 %v3653_v25, %s3453_s28  ;;  %487 = vrot.lane.b32.xlu0 %v3649_v23, %s3453_s28  ;;  %s3470_s28 = smov 3  }
  0x8e   : > { %539 = vrot.lane.b32.xlu1 %v3663_v31, %s3454_s29  ;;  %537 = vrot.lane.b32.xlu0 %v3657_v28, %s3454_s29 }
  0x92   : > { %546 = vrot.lane.b32.xlu1 %v3653_v25, %s3454_s29  ;;  %544 = vrot.lane.b32.xlu0 %v3649_v23, %s3454_s29  ;;  %s3471_s29 = smov 2  }
  0x96   : > { %596 = vrot.lane.b32.xlu1 %v3663_v31, %s3455_s5  ;;  %594 = vrot.lane.b32.xlu0 %v3657_v28, %s3455_s5 }
  0x9a   : > { %603 = vrot.lane.b32.xlu1 %v3653_v25, %s3455_s5  ;;  %601 = vrot.lane.b32.xlu0 %v3649_v23, %s3455_s5  ;;  %s3472_s5 = smov 1  }
  0x9e   : > { %653 = vrot.lane.b32.xlu1 %v3663_v31, %s3456_s6  ;;  %651 = vrot.lane.b32.xlu0 %v3657_v28, %s3456_s6 }
  0xa2   : > { %660 = vrot.lane.b32.xlu1 %v3653_v25, %s3456_s6  ;;  %658 = vrot.lane.b32.xlu0 %v3649_v23, %s3456_s6  ;;  %s3473_s6 = smov 127  }
  0xa6   : > { %710 = vrot.lane.b32.xlu1 %v3663_v31, %s3457_s8  ;;  %708 = vrot.lane.b32.xlu0 %v3657_v28, %s3457_s8 }
  0xaa   : > { %717 = vrot.lane.b32.xlu1 %v3653_v25, %s3457_s8  ;;  %715 = vrot.lane.b32.xlu0 %v3649_v23, %s3457_s8  ;;  %s3474_s8 = smov 126  }
  0xae   : > { %767 = vrot.lane.b32.xlu1 %v3663_v31, %s3458_s9  ;;  %765 = vrot.lane.b32.xlu0 %v3657_v28, %s3458_s9 }
  0xb2   : > { %774 = vrot.lane.b32.xlu1 %v3653_v25, %s3458_s9  ;;  %772 = vrot.lane.b32.xlu0 %v3649_v23, %s3458_s9  ;;  %s3475_s9 = smov 125  }
  0xb6   : > { %824 = vrot.lane.b32.xlu1 %v3663_v31, %s3459_s21  ;;  %822 = vrot.lane.b32.xlu0 %v3657_v28, %s3459_s21 }
  0xba   : > { %831 = vrot.lane.b32.xlu1 %v3653_v25, %s3459_s21  ;;  %829 = vrot.lane.b32.xlu0 %v3649_v23, %s3459_s21  ;;  %s3476_s21 = smov 115  }
  0xbe   : > { %881 = vrot.lane.b32.xlu1 %v3663_v31, %s3460_s17  ;;  %879 = vrot.lane.b32.xlu0 %v3657_v28, %s3460_s17 }
  0xc2   : > { %888 = vrot.lane.b32.xlu1 %v3653_v25, %s3460_s17  ;;  %886 = vrot.lane.b32.xlu0 %v3649_v23, %s3460_s17  ;;  %s3477_s17 = smov 114  }
  0xc6   : > { %938 = vrot.lane.b32.xlu1 %v3663_v31, %s3461_s22  ;;  %936 = vrot.lane.b32.xlu0 %v3657_v28, %s3461_s22 }
  0xca   : > { %945 = vrot.lane.b32.xlu1 %v3653_v25, %s3461_s22  ;;  %943 = vrot.lane.b32.xlu0 %v3649_v23, %s3461_s22  ;;  %s3479_s22 = smov 113  }
  0xce   : > { %995 = vrot.lane.b32.xlu1 %v3663_v31, %s3462_s23  ;;  %993 = vrot.lane.b32.xlu0 %v3657_v28, %s3462_s23 }
  0xd2   : > { %1002 = vrot.lane.b32.xlu1 %v3653_v25, %s3462_s23  ;;  %1000 = vrot.lane.b32.xlu0 %v3649_v23, %s3462_s23  ;;  %s3480_s23 = smov 112  }
  0xd6   : > { %1052 = vrot.lane.b32.xlu1 %v3663_v31, %s3463_s26  ;;  %1050 = vrot.lane.b32.xlu0 %v3657_v28, %s3463_s26 }
  0xd8   : > { %v3715_v32 = vpop.permute.xlu0 %316  ;;  %v3717_v33 = vpop.permute.xlu1 %261 }
  0xda   : > { %1059 = vrot.lane.b32.xlu1 %v3653_v25, %s3463_s26  ;;  %1057 = vrot.lane.b32.xlu0 %v3649_v23, %s3463_s26  ;;  %s3481_s26 = smov 111  }
  0xdc   : > { %v3721_v34 = vpop.permute.xlu0 %373  ;;  %v3723_v35 = vpop.permute.xlu1 %263 }
  0xde   : > { %1109 = vrot.lane.b32.xlu1 %v3663_v31, %s3464_s30  ;;  %1107 = vrot.lane.b32.xlu0 %v3657_v28, %s3464_s30 }
  0xe0   : > { %v3727_v36 = vpop.permute.xlu0 %252  ;;  %v3729_v37 = vpop.permute.xlu1 %318 }
  0xe2   : > { %1116 = vrot.lane.b32.xlu1 %v3653_v25, %s3464_s30  ;;  %1114 = vrot.lane.b32.xlu0 %v3649_v23, %s3464_s30  ;;  %s3482_s30 = smov 110  }
  0xe4   : > { %v3733_v38 = vpop.permute.xlu0 %309  ;;  %v3735_v39 = vpop.permute.xlu1 %375 }
  0xe6   : > { %1166 = vrot.lane.b32.xlu1 %v3663_v31, %s3465_s4  ;;  %1164 = vrot.lane.b32.xlu0 %v3657_v28, %s3465_s4 }
  0xe8   : > { %v3739_v40 = vpop.permute.xlu0 %366  ;;  %v3741_v41 = vpop.permute.xlu1 %311 }
  0xea   : > { %1173 = vrot.lane.b32.xlu1 %v3653_v25, %s3465_s4  ;;  %1171 = vrot.lane.b32.xlu0 %v3649_v23, %s3465_s4  ;;  %s3483_s4 = smov 109  }
  0xec   : > { %v3745_v42 = vpop.permute.xlu0 %423  ;;  %v3747_v43 = vpop.permute.xlu1 %368 }
  0xee   : > { %1223 = vrot.lane.b32.xlu1 %v3663_v31, %s3466_s18  ;;  %1221 = vrot.lane.b32.xlu0 %v3657_v28, %s3466_s18 }
  0xf0   : > { %v3751_v44 = vpop.permute.xlu1 %425  ;;  %v3753_v45 = vpop.permute.xlu0 %254 }
  0xf2   : > { %1230 = vrot.lane.b32.xlu1 %v3653_v25, %s3466_s18  ;;  %1228 = vrot.lane.b32.xlu0 %v3649_v23, %s3466_s18  ;;  %s3484_s18 = smov 99  }
  0xf4   : > { %v3757_v46 = vpop.permute.xlu1 %432  ;;  %v3759_v47 = vpop.permute.xlu0 %430 }
  0xf6   : > { %1280 = vrot.lane.b32.xlu1 %v3663_v31, %s3467_s20  ;;  %1278 = vrot.lane.b32.xlu0 %v3657_v28, %s3467_s20 }
  0xf8   : > { %v3763_v48 = vpop.permute.xlu1 %482  ;;  %v3765_v49 = vpop.permute.xlu0 %480 }
  0xfa   : > { %1287 = vrot.lane.b32.xlu1 %v3653_v25, %s3467_s20  ;;  %1285 = vrot.lane.b32.xlu0 %v3649_v23, %s3467_s20  ;;  %s3485_s20 = smov 98  }
  0xfc   : > { %v3769_v50 = vpop.permute.xlu1 %489  ;;  %v3771_v51 = vpop.permute.xlu0 %487 }
  0xfe   : > { %1337 = vrot.lane.b32.xlu1 %v3663_v31, %s3468_s25  ;;  %1335 = vrot.lane.b32.xlu0 %v3657_v28, %s3468_s25 }
 0x100   : > { %v3775_v52 = vpop.permute.xlu1 %539  ;;  %v3777_v53 = vpop.permute.xlu0 %537 }
 0x102   : > { %1344 = vrot.lane.b32.xlu1 %v3653_v25, %s3468_s25  ;;  %1342 = vrot.lane.b32.xlu0 %v3649_v23, %s3468_s25  ;;  %s3486_s25 = smov 97  }
 0x104   : > { %v3781_v54 = vpop.permute.xlu1 %546  ;;  %v3783_v55 = vpop.permute.xlu0 %544 }
 0x106   : > { %1394 = vrot.lane.b32.xlu1 %v3663_v31, %s3469_s27  ;;  %1392 = vrot.lane.b32.xlu0 %v3657_v28, %s3469_s27 }
 0x108   : > { %v3787_v56 = vpop.permute.xlu1 %596  ;;  %v3789_v57 = vpop.permute.xlu0 %594 }
 0x10a   : > { %1401 = vrot.lane.b32.xlu1 %v3653_v25, %s3469_s27  ;;  %1399 = vrot.lane.b32.xlu0 %v3649_v23, %s3469_s27  ;;  %s3487_s27 = smov 96  }
 0x10c   : > { %v3793_v58 = vpop.permute.xlu1 %603  ;;  %v3795_v59 = vpop.permute.xlu0 %601 }
 0x10e   : > { %1451 = vrot.lane.b32.xlu1 %v3663_v31, %s3470_s28  ;;  %1449 = vrot.lane.b32.xlu0 %v3657_v28, %s3470_s28 }
 0x110   : > { %v3799_v60 = vpop.permute.xlu1 %653  ;;  %v3801_v61 = vpop.permute.xlu0 %651 }
 0x112   : > { %1458 = vrot.lane.b32.xlu1 %v3653_v25, %s3470_s28  ;;  %1456 = vrot.lane.b32.xlu0 %v3649_v23, %s3470_s28  ;;  %s3488_s28 = smov 95  }
 0x114   : > { %v3805_v62 = vpop.permute.xlu1 %660  ;;  %v3807_v63 = vpop.permute.xlu0 %658 }
 0x116   : > { %1508 = vrot.lane.b32.xlu1 %v3663_v31, %s3471_s29  ;;  %1506 = vrot.lane.b32.xlu0 %v3657_v28, %s3471_s29 }
 0x118   : > { %v3811_v0 = vpop.permute.xlu1 %710  ;;  %v3813_v1 = vpop.permute.xlu0 %708 }
 0x11a   : > { %1515 = vrot.lane.b32.xlu1 %v3653_v25, %s3471_s29  ;;  %1513 = vrot.lane.b32.xlu0 %v3649_v23, %s3471_s29  ;;  %s3489_s29 = smov 94  }
 0x11c   : > { %v3817_v2 = vpop.permute.xlu1 %717  ;;  %v3819_v3 = vpop.permute.xlu0 %715 }
 0x11e   : > { %1565 = vrot.lane.b32.xlu1 %v3663_v31, %s3472_s5  ;;  %1563 = vrot.lane.b32.xlu0 %v3657_v28, %s3472_s5 }
 0x120   : > { %v3823_v4 = vpop.permute.xlu1 %767  ;;  %v3825_v5 = vpop.permute.xlu0 %765 }
 0x122   : > { %1572 = vrot.lane.b32.xlu1 %v3653_v25, %s3472_s5  ;;  %1570 = vrot.lane.b32.xlu0 %v3649_v23, %s3472_s5  ;;  %s3490_s5 = smov 93  }
 0x124   : > { %v3829_v6 = vpop.permute.xlu1 %774  ;;  %v3831_v7 = vpop.permute.xlu0 %772 }
 0x126   : > { %1666 = vrot.lane.b32.xlu1 %v3663_v31, %s3473_s6  ;;  %1664 = vrot.lane.b32.xlu0 %v3657_v28, %s3473_s6 }
 0x128   : > { %v3835_v8 = vpop.permute.xlu1 %824  ;;  %v3837_v9 = vpop.permute.xlu0 %822 }
 0x12a   : > { %1673 = vrot.lane.b32.xlu1 %v3653_v25, %s3473_s6  ;;  %1671 = vrot.lane.b32.xlu0 %v3649_v23, %s3473_s6  ;;  %s3491_s6 = smov 83  }
 0x12c   : > { %v3841_v10 = vpop.permute.xlu1 %831  ;;  %v3843_v11 = vpop.permute.xlu0 %829 }
 0x12e   : > { %1723 = vrot.lane.b32.xlu1 %v3663_v31, %s3474_s8  ;;  %1721 = vrot.lane.b32.xlu0 %v3657_v28, %s3474_s8 }
 0x130   : > { %v3847_v12 = vpop.permute.xlu1 %881  ;;  %v3849_v13 = vpop.permute.xlu0 %879 }
 0x132   : > { %1730 = vrot.lane.b32.xlu1 %v3653_v25, %s3474_s8  ;;  %1728 = vrot.lane.b32.xlu0 %v3649_v23, %s3474_s8  ;;  %s3492_s8 = smov 82  }
 0x134   : > { %v3853_v14 = vpop.permute.xlu1 %888  ;;  %v3855_v15 = vpop.permute.xlu0 %886 }
 0x136   : > { %1780 = vrot.lane.b32.xlu1 %v3663_v31, %s3475_s9  ;;  %1778 = vrot.lane.b32.xlu0 %v3657_v28, %s3475_s9 }
 0x138   : > { %v3859_v16 = vpop.permute.xlu1 %938  ;;  %v3861_v17 = vpop.permute.xlu0 %936 }
 0x139   : > { %4998 = vst [vmem:[#allocation12_spill] sm:$0xff] %v3859_v16  ;;  %4999 = vst [vmem:[#allocation13_spill] sm:$0xff] %v3861_v17 }
 0x13a   : > { %1787 = vrot.lane.b32.xlu1 %v3653_v25, %s3475_s9  ;;  %1785 = vrot.lane.b32.xlu0 %v3649_v23, %s3475_s9  ;;  %s3493_s9 = smov 81  }
 0x13c   : > { %v3865_v18 = vpop.permute.xlu1 %945  ;;  %v3867_v19 = vpop.permute.xlu0 %943 }
 0x13d   : > { %5000 = vst [vmem:[#allocation14_spill] sm:$0xff] %v3865_v18  ;;  %5001 = vst [vmem:[#allocation15_spill] sm:$0xff] %v3867_v19  ;;  %v378_v19 = vsel %vm370_vm3, %v3735_v39, %v3721_v34 }
 0x13e   : > { %1837 = vrot.lane.b32.xlu1 %v3663_v31, %s3476_s21  ;;  %1835 = vrot.lane.b32.xlu0 %v3657_v28, %s3476_s21 }
 0x140   : > { %v3871_v20 = vpop.permute.xlu1 %995  ;;  %v3873_v21 = vpop.permute.xlu0 %993 }
 0x141   : > { %5002 = vst [vmem:[#allocation16_spill] sm:$0xff] %v3871_v20  ;;  %5003 = vst [vmem:[#allocation17_spill] sm:$0xff] %v3873_v21  ;;  %v3478_v21 = vmov 1966171168  }
 0x142   : > { %1844 = vrot.lane.b32.xlu1 %v3653_v25, %s3476_s21  ;;  %1842 = vrot.lane.b32.xlu0 %v3649_v23, %s3476_s21  ;;  %v273_v20 = vunpack.c.l.s4 %v3478_v21  ;;  %v265_v21 = vsel %vm258_vm1, %v3717_v33, %v3723_v35  ;;  %s3494_s21 = smov 80  }
 0x144   : > { %v3877_v22 = vpop.permute.xlu1 %1002  ;;  %v3879_v24 = vpop.permute.xlu0 %1000  ;;  %v274_v26 = vunpack.c.0.s8 %v273_v20  ;;  %v320_v20 = vsel %vm313_vm2, %v3715_v32, %v3729_v37 }
 0x145   : > { %5004 = vst [vmem:[#allocation18_spill] sm:$0xff] %v3877_v22  ;;  %5005 = vst [vmem:[#allocation19_spill] sm:$0xff] %v3879_v24 }
 0x146   : > { %1894 = vrot.lane.b32.xlu1 %v3663_v31, %s3477_s17  ;;  %1892 = vrot.lane.b32.xlu0 %v3657_v28, %s3477_s17 }
 0x148   : > { %v3883_v27 = vpop.permute.xlu1 %1052  ;;  %v3885_v29 = vpop.permute.xlu0 %1050 }
 0x149   : > { %5006 = vst [vmem:[#allocation20_spill] sm:$0xff] %v3883_v27  ;;  %5007 = vst [vmem:[#allocation21_spill] sm:$0xff] %v3885_v29 }
 0x14a   : > { %1901 = vrot.lane.b32.xlu1 %v3653_v25, %s3477_s17  ;;  %1899 = vrot.lane.b32.xlu0 %v3649_v23, %s3477_s17  ;;  %s3495_s17 = smov 79  }
 0x14c   : > { %v3892_v22 = vpop.permute.xlu1 %1059  ;;  %v3894_v24 = vpop.permute.xlu0 %1057 }
 0x14d   : > { %5008 = vst [vmem:[#allocation22_spill] sm:$0xff] %v3892_v22  ;;  %5009 = vst [vmem:[#allocation23_spill] sm:$0xff] %v3894_v24  ;;  %v5012_v22 = vlaneseq }
 0x14e   : > { %1951 = vrot.lane.b32.xlu1 %v3663_v31, %s3479_s22  ;;  %1949 = vrot.lane.b32.xlu0 %v3657_v28, %s3479_s22 }
 0x14f   : > { %v276_v24 = vshrl.u32 %v5012_v22, 7  ;;  %v321_v22 = vsel %vm313_vm2, %v3729_v37, %v3715_v32  ;;  %v428_v32 = vsel %vm427_vm4, %v3745_v42, %v3751_v44  ;;  %v259_v37 = vsel %vm258_vm1, %v3727_v36, %v3753_v45 }
 0x150   : > { %v3900_v29 = vpop.permute.xlu1 %1109  ;;  %v3902_v27 = vpop.permute.xlu0 %1107 }
 0x151   : > { %5010 = vst [vmem:[#allocation24_spill] sm:$0xff] %v3900_v29  ;;  %5011 = vst [vmem:[#allocation25_spill] sm:$0xff] %v3902_v27  ;;  %v266_v27 = vsel %vm258_vm1, %v3723_v35, %v3717_v33  ;;  %v377_v29 = vsel %vm370_vm3, %v3721_v34, %v3735_v39  ;;  %v371_v33 = vsel %vm370_vm3, %v3739_v40, %v3747_v43 }
 0x152   : > { %1958 = vrot.lane.b32.xlu1 %v3653_v25, %s3479_s22  ;;  %1956 = vrot.lane.b32.xlu0 %v3649_v23, %s3479_s22  ;;  %v372_v35 = vsel %vm370_vm3, %v3747_v43, %v3739_v40  ;;  %v429_v34 = vsel %vm427_vm4, %v3751_v44, %v3745_v42  ;;  %v260_v39 = vsel %vm258_vm1, %v3753_v45, %v3727_v36  ;;  %vm1168_vm1 = vcmp.lt.s32.totalorder %v3890_v30, 17  ;;  %s3496_s22 = smov 78  }
 0x153   : > { %v3954_v40 = vsub.s32 %v274_v26, %v276_v24  ;;  %v291_v43 = vcombine.low %v266_v27, %v265_v21  ;;  %v385_v16 = vcombine.low %v372_v35, %v371_v33  ;;  %v434_v42 = vsel %vm427_vm4, %v3759_v47, %v3757_v46 }
 0x154   : > { %v3934_v18 = vpop.permute.xlu1 %1116  ;;  %v3936_v17 = vpop.permute.xlu0 %1114  ;;  %v435_v44 = vsel %vm427_vm4, %v3757_v46, %v3759_v47  ;;  %v442_v36 = vcombine.low %v429_v34, %v428_v32  ;;  %v271_v45 = vcombine.low %v260_v39, %v259_v37  ;;  %v314_v46 = vsel %vm313_vm2, %v3733_v38, %v3741_v41 }
 0x155   : > { %5013 = vst [vmem:[#allocation26_spill] sm:$0xff] %v3934_v18  ;;  %5014 = vst [vmem:[#allocation27_spill] sm:$0xff] %v3936_v17  ;;  %v348_v17 = vcombine.low %v321_v22, %v320_v20  ;;  %v405_v18 = vcombine.low %v378_v19, %v377_v29  ;;  %v485_v19 = vsel %vm484_vm5, %v3765_v49, %v3763_v48  ;;  %vm1339_vm3 = vcmp.lt.s32.totalorder %v3890_v30, 14 }
 0x156   : > { %2008 = vrot.lane.b32.xlu1 %v3663_v31, %s3480_s23  ;;  %2006 = vrot.lane.b32.xlu0 %v3657_v28, %s3480_s23  ;;  %v486_v22 = vsel %vm484_vm5, %v3763_v48, %v3765_v49  ;;  %v315_v47 = vsel %vm313_vm2, %v3741_v41, %v3733_v38  ;;  %v298_v27 = vrot.slane %v291_v43, %v3954_v40  ;;  %vm1225_vm2 = vcmp.lt.s32.totalorder %v3890_v30, 16 }
 0x157   : > { %v355_v29 = vrot.slane %v348_v17, %v3954_v40  ;;  %v462_v21 = vcombine.low %v435_v44, %v434_v42  ;;  %v412_v48 = vrot.slane %v405_v18, %v3954_v40  ;;  %v499_v49 = vcombine.low %v486_v22, %v485_v19 }
 0x158   : > { %v3974_v24 = vpop.permute.xlu1 %1166  ;;  %v3976_v26 = vpop.permute.xlu0 %1164  ;;  %v328_v20 = vcombine.low %v315_v47, %v314_v46  ;;  %v392_v33 = vrot.slane %v385_v16, %v3954_v40  ;;  %v449_v35 = vrot.slane %v442_v36, %v3954_v40  ;;  %v278_v38 = vrot.slane %v271_v45, %v3954_v40  ;;  %v382_v36 = vld [vmem:[#allocation7 + $0x2] ss:$8 sm:$0x3] }
 0x159   : > { %v491_v32 = vsel %vm484_vm5, %v3771_v51, %v3769_v50  ;;  %v492_v18 = vsel %vm484_vm5, %v3769_v50, %v3771_v51  ;;  %v542_v16 = vsel %vm541_vm6, %v3777_v53, %v3775_v52  ;;  %v543_v34 = vsel %vm541_vm6, %v3775_v52, %v3777_v53  ;;  %v268_v50 = vld [vmem:[#allocation7] ss:$8 sm:$0x3]  ;;  %v325_v51 = vld [vmem:[#allocation7 + $0x1] ss:$8 sm:$0x3] }
 0x15a   : > { %2015 = vrot.lane.b32.xlu1 %v3653_v25, %s3480_s23  ;;  %2013 = vrot.lane.b32.xlu0 %v3649_v23, %s3480_s23  ;;  %v305_v37 = vrot.slane %v298_v27, %v3954_v40  ;;  %v362_v39 = vrot.slane %v355_v29, %v3954_v40  ;;  %v469_v43 = vrot.slane %v462_v21, %v3954_v40  ;;  %v380_v27 = vld [vmem:[#allocation5 + $0x2] ss:$8 sm:$0x3]  ;;  %v437_v21 = vld [vmem:[#allocation5 + $0x3] ss:$8 sm:$0x3] }
 0x15b   : > { %v419_v42 = vrot.slane %v412_v48, %v3954_v40  ;;  %v506_v44 = vrot.slane %v499_v49, %v3954_v40  ;;  %v548_v52 = vsel %vm541_vm6, %v3783_v55, %v3781_v54  ;;  %v549_v53 = vsel %vm541_vm6, %v3781_v54, %v3783_v55  ;;  %v267_v48 = vld [vmem:[#allocation5] ss:$8 sm:$0x3]  ;;  %s3497_s23 = smov 77  }
 0x15c   : > { %v3995_v41 = vpop.permute.xlu1 %1173  ;;  %v3997_v17 = vpop.permute.xlu0 %1171  ;;  %v519_v45 = vcombine.low %v492_v18, %v491_v32  ;;  %v556_v19 = vcombine.low %v543_v34, %v542_v16  ;;  %v335_v47 = vrot.slane %v328_v20, %v3954_v40  ;;  %v399_v29 = vrot.slane %v392_v33, %v3954_v40  ;;  %v439_v33 = vld [vmem:[#allocation7 + $0x3] ss:$8 sm:$0x3] }
 0x15d   : > { %v456_v54 = vrot.slane %v449_v35, %v3954_v40  ;;  %v285_v55 = vrot.slane %v278_v38, %v3954_v40  ;;  %v476_v49 = vrot.slane %v469_v43, %v3954_v40  ;;  %v576_v32 = vcombine.low %v549_v53, %v548_v52  ;;  %v494_v35 = vld [vmem:[#allocation5 + $0x4] ss:$8 sm:$0x3] }
 0x15e   : > { %2065 = vrot.lane.b32.xlu1 %v3663_v31, %s3481_s26  ;;  %2063 = vrot.lane.b32.xlu0 %v3657_v28, %s3481_s26  ;;  %v307_v20 = vmul.f32 %v305_v37, %v268_v50  ;;  %v364_v18 = vmul.f32 %v362_v39, %v325_v51  ;;  %v421_v16 = vmul.f32 %v419_v42, %v382_v36  ;;  %v323_v36 = vld [vmem:[#allocation5 + $0x1] ss:$8 sm:$0x3]  ;;  %vm1282_vm4 = vcmp.lt.s32.totalorder %v3890_v30, 15 }
 0x15f   : > { %v513_v34 = vrot.slane %v506_v44, %v3954_v40  ;;  %v526_v38 = vrot.slane %v519_v45, %v3954_v40  ;;  %v563_v43 = vrot.slane %v556_v19, %v3954_v40  ;;  %v599_v37 = vsel %vm598_vm7, %v3789_v57, %v3787_v56 }
 0x160   : > { %v4033_v22 = vpop.permute.xlu1 %1223  ;;  %v4035_v46 = vpop.permute.xlu0 %1221  ;;  %v600_v39 = vsel %vm598_vm7, %v3787_v56, %v3789_v57  ;;  %v342_v42 = vrot.slane %v335_v47, %v3954_v40  ;;  %v401_v44 = vmul.f32 %v399_v29, %v380_v27  ;;  %v458_v52 = vmul.f32 %v456_v54, %v437_v21 }
 0x161   : > { %v287_v53 = vmul.f32 %v285_v55, %v267_v48  ;;  %v478_v45 = vmul.f32 %v476_v49, %v439_v33  ;;  %v583_v19 = vrot.slane %v576_v32, %v3954_v40  ;;  %v605_v56 = vsel %vm598_vm7, %v3795_v59, %v3793_v58  ;;  %v551_v32 = vld [vmem:[#allocation5 + $0x5] ss:$8 sm:$0x3] }
 0x162   : > { %2072 = vrot.lane.b32.xlu1 %v3653_v25, %s3481_s26  ;;  %2070 = vrot.lane.b32.xlu0 %v3649_v23, %s3481_s26  ;;  %v606_v57 = vsel %vm598_vm7, %v3793_v58, %v3795_v59  ;;  %v515_v47 = vmul.f32 %v513_v34, %v494_v35  ;;  %v613_v27 = vcombine.low %v600_v39, %v599_v37  ;;  %vm1453_vm5 = vcmp.lt.s32.totalorder %v3890_v30, 3  ;;  %s3162_s26 = sshll.u32 %s3637_s24, 1 }
 0x163   : > { %v656_v29 = vsel %vm655_vm8, %v3801_v61, %v3799_v60  ;;  %v657_v21 = vsel %vm655_vm8, %v3799_v60, %v3801_v61  ;;  %v533_v54 = vrot.slane %v526_v38, %v3954_v40  ;;  %v570_v58 = vrot.slane %v563_v43, %v3954_v40  ;;  %v496_v61 = vld [vmem:[#allocation7 + $0x4] ss:$8 sm:$0x3] }
 0x164   : > { %v4060_v50 = vpop.permute.xlu1 %1230  ;;  %v4062_v51 = vpop.permute.xlu0 %1228  ;;  %v662_v59 = vsel %vm655_vm8, %v3807_v63, %v3805_v62  ;;  %v663_v55 = vsel %vm655_vm8, %v3805_v62, %v3807_v63  ;;  %v344_v60 = vmul.f32 %v342_v42, %v323_v36  ;;  %v633_v33 = vcombine.low %v606_v57, %v605_v56  ;;  %v553_v42 = vld [vmem:[#allocation7 + $0x5] ss:$8 sm:$0x3] }
 0x165   : > { %v713_v34 = vsel %vm712_vm9, %v3813_v1, %v3811_v0  ;;  %v714_v35 = vsel %vm712_vm9, %v3811_v0, %v3813_v1  ;;  %v422_v38 = vadd.f32 %v421_v16, %v307_v20  ;;  %v402_v62 = vadd.f32 %v401_v44, %v287_v53 }
 0x166   : > { %2122 = vrot.lane.b32.xlu1 %v3663_v31, %s3482_s30  ;;  %2120 = vrot.lane.b32.xlu0 %v3657_v28, %s3482_s30  ;;  %v590_v63 = vrot.slane %v583_v19, %v3954_v40  ;;  %v670_v43 = vcombine.low %v657_v21, %v656_v29  ;;  %v459_v37 = vadd.f32 %v458_v52, %v344_v60  ;;  %vm1567_vm6 = vcmp.lt.s32.totalorder %v3890_v30, 1 }
 0x167   : > { %v479_v39 = vadd.f32 %v478_v45, %v364_v18  ;;  %v620_v36 = vrot.slane %v613_v27, %v3954_v40  ;;  %v690_v56 = vcombine.low %v663_v55, %v662_v59  ;;  %v4112_v57 = vadd.f32 %v515_v47, %v402_v62  ;;  %v610_v62 = vld [vmem:[#allocation7 + $0x6] ss:$8 sm:$0x3] }
 0x168   : > { %v4095_v48 = vpop.permute.xlu1 %1280  ;;  %v4097_v49 = vpop.permute.xlu0 %1278  ;;  %v535_v0 = vmul.f32 %v533_v54, %v496_v61  ;;  %v572_v1 = vmul.f32 %v570_v58, %v551_v32  ;;  %v727_v20 = vcombine.low %v714_v35, %v713_v34  ;;  %v640_v44 = vrot.slane %v633_v33, %v3954_v40 }
 0x169   : > { %v719_v18 = vsel %vm712_vm9, %v3819_v3, %v3817_v2  ;;  %v720_v52 = vsel %vm712_vm9, %v3817_v2, %v3819_v3  ;;  %v1626_v45 = vcombine.low %v3657_v28, %v3663_v31  ;;  %v592_v19 = vmul.f32 %v590_v63, %v553_v42  ;;  %v665_v42 = vld [vmem:[#allocation5 + $0x7] ss:$8 sm:$0x3] }
 0x16a   : > { %2129 = vrot.lane.b32.xlu1 %v3653_v25, %s3482_s30  ;;  %2127 = vrot.lane.b32.xlu0 %v3649_v23, %s3482_s30  ;;  %v677_v47 = vrot.slane %v670_v43, %v3954_v40  ;;  %v770_v27 = vsel %vm769_vm10, %v3825_v5, %v3823_v4  ;;  %v771_v29 = vsel %vm769_vm10, %v3823_v4, %v3825_v5  ;;  %v608_v4 = vld [vmem:[#allocation5 + $0x6] ss:$8 sm:$0x3]  ;;  %vm1396_vm7 = vcmp.lt.s32.totalorder %v3890_v30, 13  ;;  %s3170_s30 = sshll.u32 %s3540_s16, 5 }
 0x16b   : > { %v627_v2 = vrot.slane %v620_v36, %v3954_v40  ;;  %v697_v3 = vrot.slane %v690_v56, %v3954_v40  ;;  %v776_v21 = vsel %vm769_vm10, %v3831_v7, %v3829_v6  ;;  %v777_v54 = vsel %vm769_vm10, %v3829_v6, %v3831_v7 }
 0x16c   : > { %v4114_v16 = vpop.permute.xlu1 %1287  ;;  %v4125_v53 = vpop.permute.xlu0 %1285  ;;  %v734_v5 = vrot.slane %v727_v20, %v3954_v40  ;;  %v747_v58 = vcombine.low %v720_v52, %v719_v18  ;;  %v827_v59 = vsel %vm826_vm11, %v3837_v9, %v3835_v8  ;;  %v828_v55 = vsel %vm826_vm11, %v3835_v8, %v3837_v9  ;;  %v722_v18 = vld [vmem:[#allocation5 + $0x10] ss:$8 sm:$0x3] }
 0x16d   : > { %v647_v6 = vrot.slane %v640_v44, %v3954_v40  ;;  %v784_v7 = vcombine.low %v771_v29, %v770_v27  ;;  %v1633_v32 = vrot.slane %v1626_v45, %v3954_v40  ;;  %v1646_v33 = vcombine.low %v3649_v23, %v3653_v25  ;;  %v667_v44 = vld [vmem:[#allocation7 + $0x7] ss:$8 sm:$0x3] }
 0x16e   : > { %2179 = vrot.lane.b32.xlu1 %v3663_v31, %s3483_s4  ;;  %2177 = vrot.lane.b32.xlu0 %v3657_v28, %s3483_s4  ;;  %v536_v34 = vadd.f32 %v535_v0, %v422_v38  ;;  %v573_v35 = vadd.f32 %v572_v1, %v459_v37  ;;  %v684_v63 = vrot.slane %v677_v47, %v3954_v40  ;;  %vm1668_vm8 = vcmp.lt.s32.totalorder %v3890_v30, 127 }
 0x16f   : > { %v804_v43 = vcombine.low %v777_v54, %v776_v21  ;;  %v593_v8 = vadd.f32 %v592_v19, %v479_v39  ;;  %v629_v9 = vmul.f32 %v627_v2, %v608_v4  ;;  %v704_v36 = vrot.slane %v697_v3, %v3954_v40 }
 0x170   : > { %v4160_v60 = vpop.permute.xlu1 %1337  ;;  %v4163_v61 = vpop.permute.xlu0 %1335  ;;  %v841_v56 = vcombine.low %v828_v55, %v827_v59  ;;  %v741_v20 = vrot.slane %v734_v5, %v3954_v40  ;;  %v754_v38 = vrot.slane %v747_v58, %v3954_v40  ;;  %v833_v37 = vsel %vm826_vm11, %v3843_v11, %v3841_v10  ;;  %v724_v55 = vld [vmem:[#allocation7 + $0x10] ss:$8 sm:$0x3] }
 0x171   : > { %v834_v39 = vsel %vm826_vm11, %v3841_v10, %v3843_v11  ;;  %v649_v1 = vmul.f32 %v647_v6, %v610_v62  ;;  %v791_v52 = vrot.slane %v784_v7, %v3954_v40  ;;  %v1640_v19 = vrot.slane %v1633_v32, %v3954_v40  ;;  %v5016_v32 = vld [vmem:[#allocation12_spill] sm:$0xff] }
 0x172   : > { %2186 = vrot.lane.b32.xlu1 %v3653_v25, %s3483_s4  ;;  %2184 = vrot.lane.b32.xlu0 %v3649_v23, %s3483_s4  ;;  %v4191_v47 = vrot.slane %v1646_v33, %v3954_v40  ;;  %v686_v27 = vmul.f32 %v684_v63, %v665_v42  ;;  %v811_v29 = vrot.slane %v804_v43, %v3954_v40  ;;  %v5017_v33 = vld [vmem:[#allocation13_spill] sm:$0xff]  ;;  %vm1510_vm9 = vcmp.lt.s32.totalorder %v3890_v30, 2  ;;  %s215_s4 = scalar_lea.vmem [#allocation8], %s3162_s26 }
 0x173   : > { %v884_v10 = vsel %vm883_vm12, %v3849_v13, %v3847_v12  ;;  %v885_v11 = vsel %vm883_vm12, %v3847_v12, %v3849_v13  ;;  %v848_v2 = vrot.slane %v841_v56, %v3954_v40  ;;  %v861_v3 = vcombine.low %v834_v39, %v833_v37  ;;  %v1621_v12 = vld [vmem:[#allocation5 + $0x30] ss:$8 sm:$0x3]  ;;  %v779_v63 = vld [vmem:[#allocation5 + $0x11] ss:$8 sm:$0x3] }
 0x174   : > { %v4183_v0 = vpop.permute.xlu1 %1344  ;;  %v4187_v45 = vpop.permute.xlu0 %1342  ;;  %5015 = vst [vmem:[#allocation28_spill] sm:$0xff] %v4191_v47  ;;  %v890_v21 = vsel %vm883_vm12, %v3855_v15, %v3853_v14  ;;  %v891_v54 = vsel %vm883_vm12, %v3853_v14, %v3855_v15  ;;  %v630_v13 = vadd.f32 %v629_v9, %v4112_v57  ;;  %v706_v4 = vmul.f32 %v704_v36, %v667_v44  ;;  %v781_v56 = vld [vmem:[#allocation7 + $0x11] ss:$8 sm:$0x3] }
 0x175   : > { %v743_v5 = vmul.f32 %v741_v20, %v722_v18  ;;  %v761_v58 = vrot.slane %v754_v38, %v3954_v40  ;;  %v798_v6 = vrot.slane %v791_v52, %v3954_v40  ;;  %v898_v7 = vcombine.low %v885_v11, %v884_v10  ;;  %v836_v44 = vld [vmem:[#allocation5 + $0x12] ss:$8 sm:$0x3] }
 0x176   : > { %2236 = vrot.lane.b32.xlu1 %v3663_v31, %s3484_s18  ;;  %2234 = vrot.lane.b32.xlu0 %v3657_v28, %s3484_s18  ;;  %v941_v14 = vsel %vm940_vm13, %v5017_v33, %v5016_v32  ;;  %v942_v15 = vsel %vm940_vm13, %v5016_v32, %v5017_v33  ;;  %v650_v62 = vadd.f32 %v649_v1, %v536_v34  ;;  %v838_v32 = vld [vmem:[#allocation7 + $0x12] ss:$8 sm:$0x3]  ;;  %vm1725_vm10 = vcmp.lt.s32.totalorder %v3890_v30, 126 }
 0x177   : > { %v818_v43 = vrot.slane %v811_v29, %v3954_v40  ;;  %v918_v9 = vcombine.low %v891_v54, %v890_v21  ;;  %v4231_v42 = vmul.f32 %v1640_v19, %v1621_v12  ;;  %v687_v36 = vadd.f32 %v686_v27, %v573_v35  ;;  %v5019_v27 = vld [vmem:[#allocation14_spill] sm:$0xff]  ;;  %v5020_v29 = vld [vmem:[#allocation15_spill] sm:$0xff]  ;;  %v5021_v21 = vld [vmem:[#allocation16_spill] sm:$0xff] }
 0x178   : > { %v4216_v59 = vpop.permute.xlu1 %1394  ;;  %v4227_v57 = vpop.permute.xlu0 %1392  ;;  %v855_v20 = vrot.slane %v848_v2, %v3954_v40  ;;  %v868_v38 = vrot.slane %v861_v3, %v3954_v40  ;;  %v707_v34 = vadd.f32 %v706_v4, %v593_v8  ;;  %v744_v39 = vadd.f32 %v743_v5, %v630_v13  ;;  %v5022_v54 = vld [vmem:[#allocation17_spill] sm:$0xff] }
 0x179   : > { %5018 = vst [vmem:[#allocation12_spill] sm:$0xff] %v4231_v42  ;;  %v763_v1 = vmul.f32 %v761_v58, %v724_v55  ;;  %v955_v18 = vcombine.low %v942_v15, %v941_v14  ;;  %v800_v35 = vmul.f32 %v798_v6, %v779_v63  ;;  %v905_v19 = vrot.slane %v898_v7, %v3954_v40  ;;  %v5023_v58 = vld [vmem:[#allocation18_spill] sm:$0xff]  ;;  %v5024_v55 = vld [vmem:[#allocation19_spill] sm:$0xff]  ;;  %v5025_v15 = vld [vmem:[#allocation20_spill] sm:$0xff] }
 0x17a   : > { %2243 = vrot.lane.b32.xlu1 %v3653_v25, %s3484_s18  ;;  %2241 = vrot.lane.b32.xlu0 %v3649_v23, %s3484_s18  ;;  %v947_v10 = vsel %vm940_vm13, %v5020_v29, %v5019_v27  ;;  %v948_v8 = vsel %vm940_vm13, %v5019_v27, %v5020_v29  ;;  %v820_v2 = vmul.f32 %v818_v43, %v781_v56  ;;  %v5026_v63 = vld [vmem:[#allocation21_spill] sm:$0xff]  ;;  %vm1782_vm11 = vcmp.lt.s32.totalorder %v3890_v30, 125  ;;  %s3061_s18 = sshll.u32 %s215_s4, 4  ;;  %s3062_s18 = int_to_ptr.vmem [resolvable:$true] %s3061_s18 }
 0x17b   : > { %v925_v3 = vrot.slane %v918_v9, %v3954_v40  ;;  %v998_v12 = vsel %vm997_vm14, %v5022_v54, %v5021_v21  ;;  %v999_v13 = vsel %vm997_vm14, %v5021_v21, %v5022_v54  ;;  %v857_v4 = vmul.f32 %v855_v20, %v836_v44  ;;  %v5027_v44 = vld [vmem:[#allocation24_spill] sm:$0xff]  ;;  %v5028_v27 = vld [vmem:[#allocation25_spill] sm:$0xff] }
 0x17c   : > { %v4239_v52 = vpop.permute.xlu1 %1401  ;;  %v4250_v11 = vpop.permute.xlu0 %1399  ;;  %v875_v5 = vrot.slane %v868_v38, %v3954_v40  ;;  %v1004_v6 = vsel %vm997_vm14, %v5024_v55, %v5023_v58  ;;  %v1005_v7 = vsel %vm997_vm14, %v5023_v58, %v5024_v55  ;;  %v962_v33 = vrot.slane %v955_v18, %v3954_v40  ;;  %v5029_v58 = vld [vmem:[#allocation26_spill] sm:$0xff]  ;;  %v5030_v55 = vld [vmem:[#allocation27_spill] sm:$0xff] }
 0x17d   : > { %v975_v14 = vcombine.low %v948_v8, %v947_v10  ;;  %v1055_v43 = vsel %vm1054_vm15, %v5026_v63, %v5025_v15  ;;  %v1056_v9 = vsel %vm1054_vm15, %v5025_v15, %v5026_v63  ;;  %v912_v20 = vrot.slane %v905_v19, %v3954_v40  ;;  %v893_v8 = vld [vmem:[#allocation5 + $0x13] ss:$8 sm:$0x3] }
 0x17e   : > { %2293 = vrot.lane.b32.xlu1 %v3663_v31, %s3485_s20  ;;  %2291 = vrot.lane.b32.xlu0 %v3657_v28, %s3485_s20  ;;  %v1012_v38 = vcombine.low %v999_v13, %v998_v12  ;;  %v1112_v18 = vsel %vm1111_vm0, %v5028_v27, %v5027_v44  ;;  %v1113_v29 = vsel %vm1111_vm0, %v5027_v44, %v5028_v27  ;;  %v895_v44 = vld [vmem:[#allocation7 + $0x13] ss:$8 sm:$0x3]  ;;  %vm1839_vm12 = vcmp.lt.s32.totalorder %v3890_v30, 115 }
 0x17f   : > { %v932_v21 = vrot.slane %v925_v3, %v3954_v40  ;;  %v1032_v54 = vcombine.low %v1005_v7, %v1004_v6  ;;  %v1118_v19 = vsel %vm1111_vm0, %v5030_v55, %v5029_v58  ;;  %v1119_v12 = vsel %vm1111_vm0, %v5029_v58, %v5030_v55  ;;  %v5031_v58 = vld [vmem:[#allocation22_spill] sm:$0xff]  ;;  %v5032_v55 = vld [vmem:[#allocation23_spill] sm:$0xff] }
 0x180   : > { %v4282_v56 = vpop.permute.xlu1 %1451  ;;  %v4293_v10 = vpop.permute.xlu0 %1449  ;;  %v764_v13 = vadd.f32 %v763_v1, %v650_v62  ;;  %v801_v15 = vadd.f32 %v800_v35, %v687_v36  ;;  %v877_v63 = vmul.f32 %v875_v5, %v838_v32  ;;  %v1069_v27 = vcombine.low %v1056_v9, %v1055_v43  ;;  %v950_v32 = vld [vmem:[#allocation5 + $0x14] ss:$8 sm:$0x3] }
 0x181   : > { %v821_v3 = vadd.f32 %v820_v2, %v707_v34  ;;  %v969_v6 = vrot.slane %v962_v33, %v3954_v40  ;;  %v982_v7 = vrot.slane %v975_v14, %v3954_v40  ;;  %v1126_v37 = vcombine.low %v1113_v29, %v1112_v18 }
 0x182   : > { %2300 = vrot.lane.b32.xlu1 %v3653_v25, %s3485_s20  ;;  %2298 = vrot.lane.b32.xlu0 %v3649_v23, %s3485_s20  ;;  %v1019_v47 = vrot.slane %v1012_v38, %v3954_v40  ;;  %v1061_v62 = vsel %vm1054_vm15, %v5032_v55, %v5031_v58  ;;  %v1062_v36 = vsel %vm1054_vm15, %v5031_v58, %v5032_v55  ;;  %vm1896_vm13 = vcmp.lt.s32.totalorder %v3890_v30, 114 }
 0x183   : > { %v1146_v34 = vcombine.low %v1119_v12, %v1118_v19  ;;  %v858_v35 = vadd.f32 %v857_v4, %v744_v39  ;;  %v914_v2 = vmul.f32 %v912_v20, %v893_v8  ;;  %v934_v5 = vmul.f32 %v932_v21, %v895_v44  ;;  %v952_v12 = vld [vmem:[#allocation7 + $0x14] ss:$8 sm:$0x3] }
 0x184   : > { %v4308_v42 = vpop.permute.xlu1 %1458  ;;  %v4320_v1 = vpop.permute.xlu0 %1456  ;;  %v1039_v33 = vrot.slane %v1032_v54, %v3954_v40  ;;  %v4325_v14 = vadd.f32 %v877_v63, %v764_v13  ;;  %v1076_v43 = vrot.slane %v1069_v27, %v3954_v40  ;;  %v1169_v9 = vsel %vm1168_vm1, %v3976_v26, %v3974_v24  ;;  %v1007_v13 = vld [vmem:[#allocation5 + $0x15] ss:$8 sm:$0x3]  ;;  %v1009_v27 = vld [vmem:[#allocation7 + $0x15] ss:$8 sm:$0x3] }
 0x185   : > { %v1170_v39 = vsel %vm1168_vm1, %v3974_v24, %v3976_v26  ;;  %v1089_v4 = vcombine.low %v1062_v36, %v1061_v62  ;;  %v1133_v20 = vrot.slane %v1126_v37, %v3954_v40  ;;  %v1232_v38 = vsel %vm1225_vm2, %v4062_v51, %v4060_v50 }
 0x186   : > { %2350 = vrot.lane.b32.xlu1 %v3663_v31, %s3486_s25  ;;  %2348 = vrot.lane.b32.xlu0 %v3657_v28, %s3486_s25  ;;  %v1233_v18 = vsel %vm1225_vm2, %v4060_v50, %v4062_v51  ;;  %v971_v24 = vmul.f32 %v969_v6, %v950_v32  ;;  %v989_v26 = vrot.slane %v982_v7, %v3954_v40  ;;  %v1123_v32 = vld [vmem:[#allocation7 + $0x17] ss:$8 sm:$0x3]  ;;  %vm1953_vm14 = vcmp.lt.s32.totalorder %v3890_v30, 113 }
 0x187   : > { %v1026_v8 = vrot.slane %v1019_v47, %v3954_v40  ;;  %v1153_v21 = vrot.slane %v1146_v34, %v3954_v40  ;;  %v915_v54 = vadd.f32 %v914_v2, %v801_v15  ;;  %v935_v19 = vadd.f32 %v934_v5, %v821_v3  ;;  %v1064_v3 = vld [vmem:[#allocation5 + $0x16] ss:$8 sm:$0x3]  ;;  %v1121_v34 = vld [vmem:[#allocation5 + $0x17] ss:$8 sm:$0x3] }
 0x188   : > { %v4347_v29 = vpop.permute.xlu1 %1508  ;;  %v4352_v37 = vpop.permute.xlu0 %1506  ;;  %v1046_v63 = vrot.slane %v1039_v33, %v3954_v40  ;;  %v1183_v44 = vcombine.low %v1170_v39, %v1169_v9  ;;  %v1083_v50 = vrot.slane %v1076_v43, %v3954_v40  ;;  %v1175_v51 = vsel %vm1168_vm1, %v3997_v17, %v3995_v41 }
 0x189   : > { %v1176_v47 = vsel %vm1168_vm1, %v3995_v41, %v3997_v17  ;;  %v1260_v15 = vcombine.low %v1233_v18, %v1232_v38  ;;  %v1096_v6 = vrot.slane %v1089_v4, %v3954_v40  ;;  %v1140_v7 = vrot.slane %v1133_v20, %v3954_v40 }
 0x18a   : > { %2357 = vrot.lane.b32.xlu1 %v3653_v25, %s3486_s25  ;;  %2355 = vrot.lane.b32.xlu0 %v3649_v23, %s3486_s25  ;;  %v1226_v58 = vsel %vm1225_vm2, %v4035_v46, %v4033_v22  ;;  %v1227_v55 = vsel %vm1225_vm2, %v4033_v22, %v4035_v46  ;;  %v972_v17 = vadd.f32 %v971_v24, %v858_v35  ;;  %v1066_v24 = vld [vmem:[#allocation7 + $0x16] ss:$8 sm:$0x3]  ;;  %vm2010_vm15 = vcmp.lt.s32.totalorder %v3890_v30, 112 }
 0x18b   : > { %v991_v62 = vmul.f32 %v989_v26, %v952_v12  ;;  %v1028_v36 = vmul.f32 %v1026_v8, %v1007_v13  ;;  %v1160_v2 = vrot.slane %v1153_v21, %v3954_v40  ;;  %v1190_v33 = vrot.slane %v1183_v44, %v3954_v40 }
 0x18c   : > { %v4376_v41 = vpop.permute.xlu1 %1515  ;;  %v4379_v5 = vpop.permute.xlu0 %1513  ;;  %v1203_v43 = vcombine.low %v1176_v47, %v1175_v51  ;;  %v1346_v22 = vsel %vm1339_vm3, %v4187_v45, %v4183_v0  ;;  %v1347_v46 = vsel %vm1339_vm3, %v4183_v0, %v4187_v45  ;;  %v1048_v35 = vmul.f32 %v1046_v63, %v1009_v27  ;;  %v1178_v51 = vld [vmem:[#allocation5 + $0x20] ss:$8 sm:$0x3]  ;;  %v1237_v27 = vld [vmem:[#allocation7 + $0x21] ss:$8 sm:$0x3] }
 0x18d   : > { %v1085_v9 = vmul.f32 %v1083_v50, %v1064_v3  ;;  %v1240_v39 = vcombine.low %v1227_v55, %v1226_v58  ;;  %v1267_v4 = vrot.slane %v1260_v15, %v3954_v40  ;;  %v1103_v20 = vrot.slane %v1096_v6, %v3954_v40 }
 0x18e   : > { %2407 = vrot.lane.b32.xlu1 %v3663_v31, %s3487_s27  ;;  %2405 = vrot.lane.b32.xlu0 %v3657_v28, %s3487_s27  ;;  %v1142_v38 = vmul.f32 %v1140_v7, %v1121_v34  ;;  %v1460_v0 = vsel %vm1453_vm5, %v4320_v1, %v4308_v42  ;;  %v1461_v45 = vsel %vm1453_vm5, %v4308_v42, %v4320_v1  ;;  %vm2067_vm0 = vcmp.lt.s32.totalorder %v3890_v30, 111 }
 0x18f   : > { %v1162_v26 = vmul.f32 %v1160_v2, %v1123_v32  ;;  %v1283_v8 = vsel %vm1282_vm4, %v4097_v49, %v4095_v48  ;;  %v1284_v21 = vsel %vm1282_vm4, %v4095_v48, %v4097_v49  ;;  %v1374_v12 = vcombine.low %v1347_v46, %v1346_v22 }
 0x190   : > { %v1566_v18 = vpop.permute.xlu1 %1565  ;;  %v1564_v13 = vpop.permute.xlu0 %1563  ;;  %v4414_v63 = vadd.f32 %v991_v62, %v4325_v14  ;;  %v1029_v44 = vadd.f32 %v1028_v36, %v915_v54  ;;  %v1197_v42 = vrot.slane %v1190_v33, %v3954_v40  ;;  %v4418_v1 = vrot.slane %v1203_v43, %v3954_v40 }
 0x191   : > { %v1049_v50 = vadd.f32 %v1048_v35, %v935_v19  ;;  %v1247_v47 = vrot.slane %v1240_v39, %v3954_v40  ;;  %v1274_v15 = vrot.slane %v1267_v4, %v3954_v40  ;;  %v1488_v48 = vcombine.low %v1461_v45, %v1460_v0  ;;  %v1235_v39 = vld [vmem:[#allocation5 + $0x21] ss:$8 sm:$0x3] }
 0x192   : > { %2414 = vrot.lane.b32.xlu1 %v3653_v25, %s3487_s27  ;;  %2412 = vrot.lane.b32.xlu0 %v3649_v23, %s3487_s27  ;;  %v4424_v49 = vadd.f32 %v1085_v9, %v972_v17  ;;  %v4426_v14 = vmul.f32 %v1103_v20, %v1066_v24  ;;  %v4428_v54 = vadd.f32 %v1142_v38, %v1029_v44  ;;  %vm2124_vm1 = vcmp.lt.s32.totalorder %v3890_v30, 110  ;;  %s4923_s27 = scalar_lea.hbm %s4963_s3, %s3170_s30 }
 0x193   : > { %v1297_v3 = vcombine.low %v1284_v21, %v1283_v8  ;;  %v1163_v19 = vadd.f32 %v1162_v26, %v1049_v50  ;;  %v1340_v7 = vsel %vm1339_vm3, %v4163_v61, %v4160_v60  ;;  %v1341_v58 = vsel %vm1339_vm3, %v4160_v60, %v4163_v61  ;;  %v1465_v50 = vld [vmem:[#allocation7 + $0x25] ss:$8 sm:$0x3] }
 0x194   : > { %v1573_v6 = vpop.permute.xlu1 %1572  ;;  %v1381_v55 = vrot.slane %v1374_v12, %v3954_v40  ;;  %v1571_v17 = vpop.permute.xlu0 %1570  ;;  %v4440_v62 = vmul.f32 %v1197_v42, %v1178_v51  ;;  %v1217_v36 = vrot.slane %v4418_v1, %v3954_v40  ;;  %v1254_v32 = vrot.slane %v1247_v47, %v3954_v40 }
 0x195   : > { %v1574_v34 = vsel %vm1567_vm6, %v1571_v17, %v1573_v6  ;;  %v1575_v2 = vsel %vm1567_vm6, %v1573_v6, %v1571_v17  ;;  %v1276_v60 = vmul.f32 %v1274_v15, %v1237_v27  ;;  %v1495_v61 = vrot.slane %v1488_v48, %v3954_v40  ;;  %v1579_v6 = vld [vmem:[#allocation7 + $0x27] ss:$8 sm:$0x3] }
 0x196   : > { %2464 = vrot.lane.b32.xlu1 %v3663_v31, %s3488_s28  ;;  %v1602_v33 = vcombine.low %v1575_v2, %v1574_v34  ;;  %2462 = vrot.lane.b32.xlu0 %v3657_v28, %s3488_s28  ;;  %v4454_v43 = vrot.slane %v1297_v3, %v3954_v40  ;;  %v4460_v22 = vsel %vm1282_vm4, %v4125_v53, %v4114_v16  ;;  %vm2181_vm2 = vcmp.lt.s32.totalorder %v3890_v30, 109 }
 0x197   : > { %v4466_v46 = vsel %vm1282_vm4, %v4114_v16, %v4125_v53  ;;  %v1354_v35 = vcombine.low %v1341_v58, %v1340_v7  ;;  %v1388_v4 = vrot.slane %v1381_v55, %v3954_v40  ;;  %v1454_v20 = vsel %vm1453_vm5, %v4293_v10, %v4282_v56  ;;  %v1351_v16 = vld [vmem:[#allocation7 + $0x23] ss:$8 sm:$0x3] }
 0x198   : > { %v1667_v9 = vpop.permute.xlu1 %1666  ;;  %v1455_v38 = vsel %vm1453_vm5, %v4282_v56, %v4293_v10  ;;  %v1609_v0 = vrot.slane %v1602_v33, %v3954_v40  ;;  %v1665_v45 = vpop.permute.xlu0 %1664  ;;  %v1397_v53 = vsel %vm1396_vm7, %v4227_v57, %v4216_v59  ;;  %v1398_v24 = vsel %vm1396_vm7, %v4216_v59, %v4227_v57 }
 0x199   : > { %v1669_v26 = vsel %vm1668_vm8, %v1665_v45, %v1667_v9  ;;  %v1670_v56 = vsel %vm1668_vm8, %v1667_v9, %v1665_v45  ;;  %v1502_v10 = vrot.slane %v1495_v61, %v3954_v40  ;;  %v1568_v8 = vsel %vm1567_vm6, %v1564_v13, %v1566_v18  ;;  %v1349_v9 = vld [vmem:[#allocation5 + $0x23] ss:$8 sm:$0x3] }
 0x19a   : > { %2471 = vrot.lane.b32.xlu1 %v3653_v25, %s3488_s28  ;;  %v1569_v21 = vsel %vm1567_vm6, %v1566_v18, %v1564_v13  ;;  %v1683_v12 = vcombine.low %v1669_v26, %v1670_v56  ;;  %2469 = vrot.lane.b32.xlu0 %v3649_v23, %s3488_s28  ;;  %v4497_v59 = vmul.f32 %v1254_v32, %v1235_v39  ;;  %vm2238_vm3 = vcmp.lt.s32.totalorder %v3890_v30, 99  ;;  %s3047_s28 = scalar_lea.sflag [#allocation4], %s3637_s24 }
 0x19b   : > { %v1277_v57 = vadd.f32 %v1276_v60, %v1163_v19  ;;  %v1361_v44 = vrot.slane %v1354_v35, %v3954_v40  ;;  %v1468_v42 = vcombine.low %v1455_v38, %v1454_v20  ;;  %v1311_v47 = vrot.slane %v4454_v43, %v3954_v40  ;;  %v1680_v20 = vld [vmem:[#allocation7 + $0x31] ss:$8 sm:$0x3] }
 0x19c   : > { %v1674_v51 = vpop.permute.xlu1 %1673  ;;  %v1390_v15 = vmul.f32 %v1388_v4, %v1351_v16  ;;  %v1411_v48 = vcombine.low %v1398_v24, %v1397_v53  ;;  %v1616_v27 = vrot.slane %v1609_v0, %v3954_v40  ;;  %v1672_v3 = vpop.permute.xlu0 %1671  ;;  %v1317_v18 = vcombine.low %v4466_v46, %v4460_v22 }
 0x19d   : > { %v1582_v13 = vcombine.low %v1569_v21, %v1568_v8  ;;  %v1675_v19 = vsel %vm1668_vm8, %v1672_v3, %v1674_v51  ;;  %v1676_v7 = vsel %vm1668_vm8, %v1674_v51, %v1672_v3  ;;  %v1504_v58 = vmul.f32 %v1502_v10, %v1465_v50  ;;  %v1292_v51 = vld [vmem:[#allocation5 + $0x22] ss:$8 sm:$0x3]  ;;  %v1577_v3 = vld [vmem:[#allocation5 + $0x27] ss:$8 sm:$0x3] }
 0x19e   : > { %2521 = vrot.lane.b32.xlu1 %v3663_v31, %s3489_s29  ;;  %v1511_v55 = vsel %vm1510_vm9, %v4352_v37, %v4347_v29  ;;  %v1512_v17 = vsel %vm1510_vm9, %v4347_v29, %v4352_v37  ;;  %v1703_v34 = vcombine.low %v1675_v19, %v1676_v7  ;;  %2519 = vrot.lane.b32.xlu0 %v3657_v28, %s3489_s29  ;;  %vm2295_vm4 = vcmp.lt.s32.totalorder %v3890_v30, 98 }
 0x19f   : > { %v1368_v2 = vrot.slane %v1361_v44, %v3954_v40  ;;  %v1403_v32 = vsel %vm1396_vm7, %v4250_v11, %v4239_v52  ;;  %v1404_v60 = vsel %vm1396_vm7, %v4239_v52, %v4250_v11  ;;  %v1475_v61 = vrot.slane %v1468_v42, %v3954_v40 }
 0x1a0   : > { %v1724_v29 = vpop.permute.xlu1 %1723  ;;  %v1391_v37 = vadd.f32 %v1390_v15, %v1277_v57  ;;  %v4531_v33 = vrot.slane %v1411_v48, %v3954_v40  ;;  %v1618_v22 = vmul.f32 %v1616_v27, %v1579_v6  ;;  %v1710_v46 = vrot.slane %v1703_v34, %v3954_v40  ;;  %v1722_v35 = vpop.permute.xlu0 %1721  ;;  %v1463_v57 = vld [vmem:[#allocation5 + $0x25] ss:$8 sm:$0x3]  ;;  %v1180_v6 = vld [vmem:[#allocation7 + $0x20] ss:$8 sm:$0x3] }
 0x1a1   : > { %v1525_v39 = vcombine.low %v1512_v17, %v1511_v55  ;;  %v1589_v4 = vrot.slane %v1582_v13, %v3954_v40  ;;  %v4537_v38 = vsel %vm1725_vm10, %v1722_v35, %v1724_v29  ;;  %v4541_v52 = vsel %vm1725_vm10, %v1724_v29, %v1722_v35  ;;  %v1294_v29 = vld [vmem:[#allocation7 + $0x22] ss:$8 sm:$0x3] }
 0x1a2   : > { %2528 = vrot.lane.b32.xlu1 %v3653_v25, %s3489_s29  ;;  %v1431_v11 = vcombine.low %v1404_v60, %v1403_v32  ;;  %v1505_v0 = vadd.f32 %v1504_v58, %v1391_v37  ;;  %v1717_v45 = vrot.slane %v1710_v46, %v3954_v40  ;;  %v1740_v16 = vcombine.low %v4537_v38, %v4541_v52  ;;  %v1406_v32 = vld [vmem:[#allocation5 + $0x24] ss:$8 sm:$0x3]  ;;  %v1678_v60 = vld [vmem:[#allocation5 + $0x31] ss:$8 sm:$0x3] }
 0x1a3   : > { %2526 = vrot.lane.b32.xlu0 %v3649_v23, %s3489_s29  ;;  %v1482_v53 = vrot.slane %v1475_v61, %v3954_v40  ;;  %v1517_v24 = vsel %vm1510_vm9, %v4379_v5, %v4376_v41  ;;  %v1518_v26 = vsel %vm1510_vm9, %v4376_v41, %v4379_v5  ;;  %v1690_v56 = vrot.slane %v1683_v12, %v3954_v40  ;;  %s3374_s29 = scalar_lea.vmem %s3062_s18, 32 }
 0x1a4   : > { %v1731_v10 = vpop.permute.xlu1 %1730  ;;  %v1324_v8 = vrot.slane %v1317_v18, %v3954_v40  ;;  %v1370_v21 = vmul.f32 %v1368_v2, %v1349_v9  ;;  %v1619_v44 = vadd.f32 %v1618_v22, %v1505_v0  ;;  %v1719_v42 = vmul.f32 %v1717_v45, %v1680_v20  ;;  %v1729_v50 = vpop.permute.xlu0 %1728  ;;  %p3375_p3 = scmp.ne.s32.totalorder %s3062_s18, %s3374_s29 }
 0x1a5   : > { %v1532_v15 = vrot.slane %v1525_v39, %v3954_v40  ;;  %v1596_v48 = vrot.slane %v1589_v4, %v3954_v40  ;;  %v4563_v27 = vsel %vm1725_vm10, %v1729_v50, %v1731_v10  ;;  %v4567_v41 = vsel %vm1725_vm10, %v1731_v10, %v1729_v50 }
 0x1a6   : > { %2578 = vrot.lane.b32.xlu1 %v3663_v31, %s3490_s5  ;;  %v1257_v5 = vadd.f32 %v4497_v59, %v4428_v54  ;;  %v1545_v12 = vcombine.low %v1518_v26, %v1517_v24  ;;  %v4573_v18 = vadd.f32 %v1719_v42, %v1619_v44  ;;  %v1760_v13 = vcombine.low %v4563_v27, %v4567_v41  ;;  %v1522_v44 = vld [vmem:[#allocation7 + $0x26] ss:$8 sm:$0x3]  ;;  %p3376_p1 = pnand %p3375_p3, %p5037_p11 }
 0x1a7   : > { %2576 = vrot.lane.b32.xlu0 %v3657_v28, %s3490_s5  ;;  %v1425_v19 = vrot.slane %v4531_v33, %v3954_v40  ;;  %v1438_v7 = vrot.slane %v1431_v11, %v3954_v40  ;;  %v1484_v58 = vmul.f32 %v1482_v53, %v1463_v57  ;;  %v1697_v55 = vrot.slane %v1690_v56, %v3954_v40  ;;  %v1792_v53 = vld [vmem:[#allocation5 + $0x33] ss:$8 sm:$0x3] }
 0x1a8   : > { %v1781_v54 = vpop.permute.xlu1 %1780  ;;  %v1106_v59 = vadd.f32 %v4426_v14, %v4414_v63  ;;  %v1313_v17 = vmul.f32 %v1311_v47, %v1292_v51  ;;  %v1331_v34 = vrot.slane %v1324_v8, %v3954_v40  ;;  %v1371_v2 = vadd.f32 %v1370_v21, %v1257_v5  ;;  %v1779_v61 = vpop.permute.xlu0 %1778  ;;  %v1520_v47 = vld [vmem:[#allocation5 + $0x26] ss:$8 sm:$0x3]  ;;  %p3377_p2 = pneg %p3376_p1 }
 0x1a9   : > { %v1539_v37 = vrot.slane %v1532_v15, %v3954_v40  ;;  %v1598_v33 = vmul.f32 %v1596_v48, %v1577_v3  ;;  %v1783_v22 = vsel %vm1782_vm11, %v1779_v61, %v1781_v54  ;;  %v1784_v63 = vsel %vm1782_vm11, %v1781_v54, %v1779_v61  ;;  %v1623_v15 = vld [vmem:[#allocation7 + $0x30] ss:$8 sm:$0x3] }
 0x1aa   : > { %2585 = vrot.lane.b32.xlu1 %v3653_v25, %s3490_s5  ;;  %v1200_v14 = vadd.f32 %v4440_v62, %v4424_v49  ;;  %v1219_v43 = vmul.f32 %v1217_v36, %v1180_v6  ;;  %v1552_v46 = vrot.slane %v1545_v12, %v3954_v40  ;;  %v1797_v35 = vcombine.low %v1783_v22, %v1784_v63  ;;  %v1408_v49 = vld [vmem:[#allocation7 + $0x24] ss:$8 sm:$0x3]  ;;  %v1735_v6 = vld [vmem:[#allocation5 + $0x32] ss:$8 sm:$0x3] }
 0x1ab   : > { %2583 = vrot.lane.b32.xlu0 %v3649_v23, %s3490_s5  ;;  %v1427_v9 = vmul.f32 %v1425_v19, %v1406_v32  ;;  %v1445_v39 = vrot.slane %v1438_v7, %v3954_v40  ;;  %v1485_v4 = vadd.f32 %v1484_v58, %v1371_v2  ;;  %v1699_v20 = vmul.f32 %v1697_v55, %v1678_v60  ;;  %v1794_v19 = vld [vmem:[#allocation7 + $0x33] ss:$8 sm:$0x3]  ;;  %s3498_s5 = smov [#allocation8]  }
 0x1ac   : > { %v1788_v38 = vpop.permute.xlu1 %1787  ;;  %v1314_v52 = vadd.f32 %v1313_v17, %v1200_v14  ;;  %v1333_v11 = vmul.f32 %v1331_v34, %v1294_v29  ;;  %v1747_v62 = vrot.slane %v1740_v16, %v3954_v40  ;;  %v1804_v1 = vrot.slane %v1797_v35, %v3954_v40  ;;  %v1786_v36 = vpop.permute.xlu0 %1785  ;;  %v5033_v34 = vld [vmem:[#allocation28_spill] sm:$0xff]  ;;  %s3378_s16 = sshll.u32 %s3498_s5, 4  ;;  %s3379_s16 = int_to_ptr.vmem [resolvable:$false] %s3378_s16 }
 0x1ad   : > { %v1541_v0 = vmul.f32 %v1539_v37, %v1520_v47  ;;  %v1599_v45 = vadd.f32 %v1598_v33, %v1485_v4  ;;  %v1789_v24 = vsel %vm1782_vm11, %v1786_v36, %v1788_v38  ;;  %v1790_v26 = vsel %vm1782_vm11, %v1788_v38, %v1786_v36  ;;  %v1737_v29 = vld [vmem:[#allocation7 + $0x32] ss:$8 sm:$0x3]  ;;  %v1849_v47 = vld [vmem:[#allocation5 + $0x34] ss:$8 sm:$0x3]  ;;  %p3381_p6 = scmp.lt.s32.totalorder %s3062_s18, %s3379_s16 }
 0x1ae   : > { %2635 = vrot.lane.b32.xlu1 %v3663_v31, %s3491_s6  ;;  %v1559_v56 = vrot.slane %v1552_v46, %v3954_v40  ;;  %v1811_v10 = vrot.slane %v1804_v1, %v3954_v40  ;;  %v1817_v16 = vcombine.low %v1789_v24, %v1790_v26  ;;  %v1220_v8 = vadd.f32 %v1219_v43, %v1106_v59  ;;  %v5035_v14 = vld [vmem:[#allocation12_spill] sm:$0xff] }
 0x1af   : > { %2633 = vrot.lane.b32.xlu0 %v3657_v28, %s3491_s6  ;;  %v1428_v21 = vadd.f32 %v1427_v9, %v1314_v52  ;;  %v1447_v57 = vmul.f32 %v1445_v39, %v1408_v49  ;;  %v1700_v42 = vadd.f32 %v1699_v20, %v1599_v45  ;;  %v1754_v51 = vrot.slane %v1747_v62, %v3954_v40  ;;  %v1851_v36 = vld [vmem:[#allocation7 + $0x34] ss:$8 sm:$0x3] }
 0x1b0   : > { %v1838_v50 = vpop.permute.xlu1 %1837  ;;  %v1767_v48 = vrot.slane %v1760_v13, %v3954_v40  ;;  %v1813_v27 = vmul.f32 %v1811_v10, %v1792_v53  ;;  %v1824_v41 = vrot.slane %v1817_v16, %v3954_v40  ;;  %v1836_v5 = vpop.permute.xlu0 %1835  ;;  %v1334_v12 = vadd.f32 %v1333_v11, %v1220_v8 }
 0x1b1   : > { %v1542_v3 = vadd.f32 %v1541_v0, %v1428_v21  ;;  %v1840_v7 = vsel %vm1839_vm12, %v1836_v5, %v1838_v50  ;;  %v1841_v58 = vsel %vm1839_vm12, %v1838_v50, %v1836_v5  ;;  %v1561_v55 = vmul.f32 %v1559_v56, %v1522_v44 }
 0x1b2   : > { %2642 = vrot.lane.b32.xlu1 %v3653_v25, %s3491_s6  ;;  %v4624_v54 = vadd.f32 %v1813_v27, %v1700_v42  ;;  %v1831_v13 = vrot.slane %v1824_v41, %v3954_v40  ;;  %v1854_v59 = vcombine.low %v1840_v7, %v1841_v58  ;;  %v1448_v17 = vadd.f32 %v1447_v57, %v1334_v12  ;;  %v1906_v57 = vld [vmem:[#allocation5 + $0x35] ss:$8 sm:$0x3]  ;;  %v1908_v12 = vld [vmem:[#allocation7 + $0x35] ss:$8 sm:$0x3] }
 0x1b3   : > { %2640 = vrot.lane.b32.xlu0 %v3649_v23, %s3491_s6  ;;  %v5034_v2 = vrot.slane %v5033_v34, %v3954_v40  ;;  %v1756_v61 = vmul.f32 %v1754_v51, %v1735_v6  ;;  %v1774_v37 = vrot.slane %v1767_v48, %v3954_v40  ;;  %v1643_v43 = vadd.f32 %v5035_v14, %v1542_v3  ;;  %v1963_v34 = vld [vmem:[#allocation5 + $0x36] ss:$8 sm:$0x3]  ;;  %s3380_s6 = scalar_lea.vmem %s3379_s16, 64 }
 0x1b4   : > { %v1845_v60 = vpop.permute.xlu1 %1844  ;;  %v1833_v33 = vmul.f32 %v1831_v13, %v1794_v19  ;;  %v1861_v22 = vrot.slane %v1854_v59, %v3954_v40  ;;  %v1843_v63 = vpop.permute.xlu0 %1842  ;;  %v1562_v9 = vadd.f32 %v1561_v55, %v1448_v17  ;;  %vm2352_vm5 = vcmp.lt.s32.totalorder %v3890_v30, 97  ;;  %p3382_p12 = scmp.lt.s32.totalorder %s3380_s6, %s3374_s29 }
 0x1b5   : > { %v1662_v32 = vmul.f32 %v5034_v2, %v1623_v15  ;;  %v1846_v46 = vsel %vm1839_vm12, %v1843_v63, %v1845_v60  ;;  %v1847_v35 = vsel %vm1839_vm12, %v1845_v60, %v1843_v63  ;;  %v1757_v52 = vadd.f32 %v1756_v61, %v1643_v43  ;;  %v1965_v63 = vld [vmem:[#allocation7 + $0x36] ss:$8 sm:$0x3] }
 0x1b6   : > { %2692 = vrot.lane.b32.xlu1 %v3663_v31, %s3492_s8  ;;  %v1834_v39 = vadd.f32 %v1833_v33, %v4573_v18  ;;  %v1868_v4 = vrot.slane %v1861_v22, %v3954_v40  ;;  %v1874_v20 = vcombine.low %v1846_v46, %v1847_v35  ;;  %v1776_v11 = vmul.f32 %v1774_v37, %v1737_v29  ;;  %p3383_p7 = por %p3382_p12, %p3381_p6 }
 0x1b7   : > { %2690 = vrot.lane.b32.xlu0 %v3657_v28, %s3492_s8  ;;  %v1663_v18 = vadd.f32 %v1662_v32, %v1562_v9  ;;  %vm2409_vm6 = vcmp.lt.s32.totalorder %v3890_v30, 96  ;;  %vm2466_vm7 = vcmp.lt.s32.totalorder %v3890_v30, 95  ;;  %vm2523_vm8 = vcmp.lt.s32.totalorder %v3890_v30, 94 }
 0x1b8   : > { %v1895_v38 = vpop.permute.xlu1 %1894  ;;  %v1870_v49 = vmul.f32 %v1868_v4, %v1849_v47  ;;  %v1881_v62 = vrot.slane %v1874_v20, %v3954_v40  ;;  %v1893_v1 = vpop.permute.xlu0 %1892  ;;  %vm2580_vm9 = vcmp.lt.s32.totalorder %v3890_v30, 93  ;;  %vm2694_vm10 = vcmp.lt.s32.totalorder %v3890_v30, 82  ;;  %p3384_p9 = pnand %p3383_p7, %p3377_p2 }
 0x1b9   : > { %v1897_v0 = vsel %vm1896_vm13, %v1893_v1, %v1895_v38  ;;  %v1898_v45 = vsel %vm1896_vm13, %v1895_v38, %v1893_v1  ;;  %v1777_v10 = vadd.f32 %v1776_v11, %v1663_v18  ;;  %v2020_v38 = vld [vmem:[#allocation5 + $0x37] ss:$8 sm:$0x3]  ;;  %vm2808_vm11 = vcmp.lt.s32.totalorder %v3890_v30, 80 }
 0x1ba   : > { %2699 = vrot.lane.b32.xlu1 %v3653_v25, %s3492_s8  ;;  %v1871_v53 = vadd.f32 %v1870_v49, %v1757_v52  ;;  %v1888_v24 = vrot.slane %v1881_v62, %v3954_v40  ;;  %v1911_v26 = vcombine.low %v1897_v0, %v1898_v45  ;;  %vm2637_vm12 = vcmp.lt.s32.totalorder %v3890_v30, 83 }
 0x1bb   : > { %2697 = vrot.lane.b32.xlu0 %v3649_v23, %s3492_s8 }
 0x1bc   : > { %v1902_v56 = vpop.permute.xlu1 %1901  ;;  %v1890_v16 = vmul.f32 %v1888_v24, %v1851_v36  ;;  %v1918_v8 = vrot.slane %v1911_v26, %v3954_v40  ;;  %v1900_v21 = vpop.permute.xlu0 %1899 }
 0x1bd   : > { %v1903_v44 = vsel %vm1896_vm13, %v1900_v21, %v1902_v56  ;;  %v1904_v42 = vsel %vm1896_vm13, %v1902_v56, %v1900_v21  ;;  %vm2751_vm13 = vcmp.lt.s32.totalorder %v3890_v30, 81 }
 0x1be   : > { %2749 = vrot.lane.b32.xlu1 %v3663_v31, %s3493_s9  ;;  %v1891_v50 = vadd.f32 %v1890_v16, %v1777_v10  ;;  %v1925_v51 = vrot.slane %v1918_v8, %v3954_v40  ;;  %v1931_v15 = vcombine.low %v1903_v44, %v1904_v42  ;;  %v2077_v42 = vld [vmem:[#allocation5 + $0x40] ss:$8 sm:$0x3] }
 0x1bf   : > { %2747 = vrot.lane.b32.xlu0 %v3657_v28, %s3493_s9 }
 0x1c0   : > { %v1952_v48 = vpop.permute.xlu1 %1951  ;;  %v1927_v27 = vmul.f32 %v1925_v51, %v1906_v57  ;;  %v1938_v41 = vrot.slane %v1931_v15, %v3954_v40  ;;  %v1950_v5 = vpop.permute.xlu0 %1949 }
 0x1c1   : > { %v1954_v3 = vsel %vm1953_vm14, %v1950_v5, %v1952_v48  ;;  %v1955_v6 = vsel %vm1953_vm14, %v1952_v48, %v1950_v5 }
 0x1c2   : > { %2756 = vrot.lane.b32.xlu1 %v3653_v25, %s3493_s9  ;;  %v1928_v19 = vadd.f32 %v1927_v27, %v4624_v54  ;;  %v1945_v7 = vrot.slane %v1938_v41, %v3954_v40  ;;  %v1968_v58 = vcombine.low %v1954_v3, %v1955_v6  ;;  %v2079_v6 = vld [vmem:[#allocation7 + $0x40] ss:$8 sm:$0x3] }
 0x1c3   : > { %2754 = vrot.lane.b32.xlu0 %v3649_v23, %s3493_s9 }
 0x1c4   : > { %v1959_v55 = vpop.permute.xlu1 %1958  ;;  %v1947_v13 = vmul.f32 %v1945_v7, %v1908_v12  ;;  %v1975_v59 = vrot.slane %v1968_v58, %v3954_v40  ;;  %v1957_v17 = vpop.permute.xlu0 %1956 }
 0x1c5   : > { %v1960_v2 = vsel %vm1953_vm14, %v1957_v17, %v1959_v55  ;;  %v1961_v32 = vsel %vm1953_vm14, %v1959_v55, %v1957_v17  ;;  %vm2865_vm14 = vcmp.lt.s32.totalorder %v3890_v30, 79 }
 0x1c6   : > { %2806 = vrot.lane.b32.xlu1 %v3663_v31, %s3494_s21  ;;  %v1948_v54 = vadd.f32 %v1947_v13, %v1834_v39  ;;  %v1982_v60 = vrot.slane %v1975_v59, %v3954_v40  ;;  %v1988_v61 = vcombine.low %v1960_v2, %v1961_v32  ;;  %v2134_v32 = vld [vmem:[#allocation5 + $0x41] ss:$8 sm:$0x3] }
 0x1c7   : > { %2804 = vrot.lane.b32.xlu0 %v3657_v28, %s3494_s21 }
 0x1c8   : > { %v2009_v29 = vpop.permute.xlu1 %2008  ;;  %v1984_v37 = vmul.f32 %v1982_v60, %v1963_v34  ;;  %v1995_v33 = vrot.slane %v1988_v61, %v3954_v40  ;;  %v2007_v22 = vpop.permute.xlu0 %2006 }
 0x1c9   : > { %v2011_v14 = vsel %vm2010_vm15, %v2007_v22, %v2009_v29  ;;  %v2012_v43 = vsel %vm2010_vm15, %v2009_v29, %v2007_v22 }
 0x1ca   : > { %2813 = vrot.lane.b32.xlu1 %v3653_v25, %s3494_s21  ;;  %v1985_v47 = vadd.f32 %v1984_v37, %v1871_v53  ;;  %v2002_v46 = vrot.slane %v1995_v33, %v3954_v40  ;;  %v2025_v35 = vcombine.low %v2011_v14, %v2012_v43  ;;  %v2022_v53 = vld [vmem:[#allocation7 + $0x37] ss:$8 sm:$0x3]  ;;  %v2136_v43 = vld [vmem:[#allocation7 + $0x41] ss:$8 sm:$0x3] }
 0x1cb   : > { %2811 = vrot.lane.b32.xlu0 %v3649_v23, %s3494_s21 }
 0x1cc   : > { %v2016_v9 = vpop.permute.xlu1 %2015  ;;  %v2004_v39 = vmul.f32 %v2002_v46, %v1965_v63  ;;  %v2032_v4 = vrot.slane %v2025_v35, %v3954_v40  ;;  %v2014_v20 = vpop.permute.xlu0 %2013 }
 0x1cd   : > { %v2017_v52 = vsel %vm2010_vm15, %v2014_v20, %v2016_v9  ;;  %v2018_v11 = vsel %vm2010_vm15, %v2016_v9, %v2014_v20  ;;  %vm2922_vm15 = vcmp.lt.s32.totalorder %v3890_v30, 78 }
 0x1ce   : > { %2863 = vrot.lane.b32.xlu1 %v3663_v31, %s3495_s17  ;;  %v2005_v49 = vadd.f32 %v2004_v39, %v1891_v50  ;;  %v2039_v62 = vrot.slane %v2032_v4, %v3954_v40  ;;  %v2045_v1 = vcombine.low %v2017_v52, %v2018_v11 }
 0x1cf   : > { %2861 = vrot.lane.b32.xlu0 %v3657_v28, %s3495_s17 }
 0x1d0   : > { %v2066_v36 = vpop.permute.xlu1 %2065  ;;  %v2041_v0 = vmul.f32 %v2039_v62, %v2020_v38  ;;  %v2052_v45 = vrot.slane %v2045_v1, %v3954_v40  ;;  %v2064_v18 = vpop.permute.xlu0 %2063  ;;  %v2191_v38 = vld [vmem:[#allocation5 + $0x42] ss:$8 sm:$0x3] }
 0x1d1   : > { %v2068_v24 = vsel %vm2067_vm0, %v2064_v18, %v2066_v36  ;;  %v2069_v26 = vsel %vm2067_vm0, %v2066_v36, %v2064_v18 }
 0x1d2   : > { %2870 = vrot.lane.b32.xlu1 %v3653_v25, %s3495_s17  ;;  %v2042_v56 = vadd.f32 %v2041_v0, %v1928_v19  ;;  %v2059_v10 = vrot.slane %v2052_v45, %v3954_v40  ;;  %v2082_v16 = vcombine.low %v2068_v24, %v2069_v26  ;;  %v2193_v45 = vld [vmem:[#allocation7 + $0x42] ss:$8 sm:$0x3] }
 0x1d3   : > { %2868 = vrot.lane.b32.xlu0 %v3649_v23, %s3495_s17 }
 0x1d4   : > { %v2073_v8 = vpop.permute.xlu1 %2072  ;;  %v2061_v21 = vmul.f32 %v2059_v10, %v2022_v53  ;;  %v2089_v57 = vrot.slane %v2082_v16, %v3954_v40  ;;  %v2071_v44 = vpop.permute.xlu0 %2070 }
 0x1d5   : > { %v2074_v50 = vsel %vm2067_vm0, %v2071_v44, %v2073_v8  ;;  %v2075_v51 = vsel %vm2067_vm0, %v2073_v8, %v2071_v44  ;;  %vm2979_vm0 = vcmp.lt.s32.totalorder %v3890_v30, 77 }
 0x1d6   : > { %2920 = vrot.lane.b32.xlu1 %v3663_v31, %s3496_s22  ;;  %v2062_v15 = vadd.f32 %v2061_v21, %v1948_v54  ;;  %v2096_v48 = vrot.slane %v2089_v57, %v3954_v40  ;;  %v2102_v27 = vcombine.low %v2074_v50, %v2075_v51  ;;  %v2248_v57 = vld [vmem:[#allocation5 + $0x43] ss:$8 sm:$0x3] }
 0x1d7   : > { %2918 = vrot.lane.b32.xlu0 %v3657_v28, %s3496_s22 }
 0x1d8   : > { %v2123_v41 = vpop.permute.xlu1 %2122  ;;  %v2098_v5 = vmul.f32 %v2096_v48, %v2077_v42  ;;  %v2109_v12 = vrot.slane %v2102_v27, %v3954_v40  ;;  %v2121_v3 = vpop.permute.xlu0 %2120 }
 0x1d9   : > { %v2125_v19 = vsel %vm2124_vm1, %v2121_v3, %v2123_v41  ;;  %v2126_v7 = vsel %vm2124_vm1, %v2123_v41, %v2121_v3 }
 0x1da   : > { %2927 = vrot.lane.b32.xlu1 %v3653_v25, %s3496_s22  ;;  %v2099_v58 = vadd.f32 %v2098_v5, %v1985_v47  ;;  %v2116_v55 = vrot.slane %v2109_v12, %v3954_v40  ;;  %v2139_v13 = vcombine.low %v2125_v19, %v2126_v7  ;;  %v2250_v12 = vld [vmem:[#allocation7 + $0x43] ss:$8 sm:$0x3] }
 0x1db   : > { %2925 = vrot.lane.b32.xlu0 %v3649_v23, %s3496_s22 }
 0x1dc   : > { %v2130_v59 = vpop.permute.xlu1 %2129  ;;  %v2118_v17 = vmul.f32 %v2116_v55, %v2079_v6  ;;  %v2146_v34 = vrot.slane %v2139_v13, %v3954_v40  ;;  %v2128_v2 = vpop.permute.xlu0 %2127 }
 0x1dd   : > { %v2131_v54 = vsel %vm2124_vm1, %v2128_v2, %v2130_v59  ;;  %v2132_v60 = vsel %vm2124_vm1, %v2130_v59, %v2128_v2 }
 0x1de   : > { %2977 = vrot.lane.b32.xlu1 %v3663_v31, %s3497_s23  ;;  %v2119_v61 = vadd.f32 %v2118_v17, %v2005_v49  ;;  %v2153_v29 = vrot.slane %v2146_v34, %v3954_v40  ;;  %v2159_v37 = vcombine.low %v2131_v54, %v2132_v60  ;;  %v2305_v34 = vld [vmem:[#allocation5 + $0x44] ss:$8 sm:$0x3] }
 0x1df   : > { %2975 = vrot.lane.b32.xlu0 %v3657_v28, %s3497_s23 }
 0x1e0   : > { %v2180_v33 = vpop.permute.xlu1 %2179  ;;  %v2155_v22 = vmul.f32 %v2153_v29, %v2134_v32  ;;  %v2166_v63 = vrot.slane %v2159_v37, %v3954_v40  ;;  %v2178_v14 = vpop.permute.xlu0 %2177 }
 0x1e1   : > { %v2182_v47 = vsel %vm2181_vm2, %v2178_v14, %v2180_v33  ;;  %v2183_v31 = vsel %vm2181_vm2, %v2180_v33, %v2178_v14 }
 0x1e2   : > { %2984 = vrot.lane.b32.xlu1 %v3653_v25, %s3497_s23  ;;  %v2156_v46 = vadd.f32 %v2155_v22, %v2042_v56  ;;  %v2173_v35 = vrot.slane %v2166_v63, %v3954_v40  ;;  %v2196_v28 = vcombine.low %v2182_v47, %v2183_v31  ;;  %v2307_v63 = vld [vmem:[#allocation7 + $0x44] ss:$8 sm:$0x3] }
 0x1e3   : > { %2982 = vrot.lane.b32.xlu0 %v3649_v23, %s3497_s23 }
 0x1e4   : > { %v2187_v9 = vpop.permute.xlu1 %2186  ;;  %v2175_v39 = vmul.f32 %v2173_v35, %v2136_v43  ;;  %v2203_v4 = vrot.slane %v2196_v28, %v3954_v40  ;;  %v2185_v20 = vpop.permute.xlu0 %2184 }
 0x1e5   : > { %v2188_v52 = vsel %vm2181_vm2, %v2185_v20, %v2187_v9  ;;  %v2189_v11 = vsel %vm2181_vm2, %v2187_v9, %v2185_v20 }
 0x1e6   : > { %v2176_v49 = vadd.f32 %v2175_v39, %v2062_v15  ;;  %v2210_v25 = vrot.slane %v2203_v4, %v3954_v40  ;;  %v2216_v62 = vcombine.low %v2188_v52, %v2189_v11  ;;  %v2362_v4 = vld [vmem:[#allocation5 + $0x45] ss:$8 sm:$0x3] }
 0x1e8   : > { %v2237_v1 = vpop.permute.xlu1 %2236  ;;  %v2212_v23 = vmul.f32 %v2210_v25, %v2191_v38  ;;  %v2223_v36 = vrot.slane %v2216_v62, %v3954_v40  ;;  %v2235_v0 = vpop.permute.xlu0 %2234 }
 0x1e9   : > { %v2239_v18 = vsel %vm2238_vm3, %v2235_v0, %v2237_v1  ;;  %v2240_v53 = vsel %vm2238_vm3, %v2237_v1, %v2235_v0 }
 0x1ea   : > { %v2213_v24 = vadd.f32 %v2212_v23, %v2099_v58  ;;  %v2230_v26 = vrot.slane %v2223_v36, %v3954_v40  ;;  %v2253_v56 = vcombine.low %v2239_v18, %v2240_v53  ;;  %v2364_v36 = vld [vmem:[#allocation7 + $0x45] ss:$8 sm:$0x3] }
 0x1ec   : > { %v2244_v10 = vpop.permute.xlu1 %2243  ;;  %v2232_v16 = vmul.f32 %v2230_v26, %v2193_v45  ;;  %v2260_v8 = vrot.slane %v2253_v56, %v3954_v40  ;;  %v2242_v21 = vpop.permute.xlu0 %2241 }
 0x1ed   : > { %v2245_v44 = vsel %vm2238_vm3, %v2242_v21, %v2244_v10  ;;  %v2246_v42 = vsel %vm2238_vm3, %v2244_v10, %v2242_v21 }
 0x1ee   : > { %v2233_v50 = vadd.f32 %v2232_v16, %v2119_v61  ;;  %v2267_v51 = vrot.slane %v2260_v8, %v3954_v40  ;;  %v2273_v15 = vcombine.low %v2245_v44, %v2246_v42  ;;  %v2419_v8 = vld [vmem:[#allocation5 + $0x46] ss:$8 sm:$0x3] }
 0x1f0   : > { %v2294_v48 = vpop.permute.xlu1 %2293  ;;  %v2269_v27 = vmul.f32 %v2267_v51, %v2248_v57  ;;  %v2280_v41 = vrot.slane %v2273_v15, %v3954_v40  ;;  %v2292_v5 = vpop.permute.xlu0 %2291 }
 0x1f1   : > { %v2296_v3 = vsel %vm2295_vm4, %v2292_v5, %v2294_v48  ;;  %v2297_v6 = vsel %vm2295_vm4, %v2294_v48, %v2292_v5 }
 0x1f2   : > { %v2270_v19 = vadd.f32 %v2269_v27, %v2156_v46  ;;  %v2287_v7 = vrot.slane %v2280_v41, %v3954_v40  ;;  %v2310_v58 = vcombine.low %v2296_v3, %v2297_v6  ;;  %v2421_v41 = vld [vmem:[#allocation7 + $0x46] ss:$8 sm:$0x3] }
 0x1f4   : > { %v2301_v55 = vpop.permute.xlu1 %2300  ;;  %v2289_v13 = vmul.f32 %v2287_v7, %v2250_v12  ;;  %v2317_v59 = vrot.slane %v2310_v58, %v3954_v40  ;;  %v2299_v17 = vpop.permute.xlu0 %2298 }
 0x1f5   : > { %v2302_v2 = vsel %vm2295_vm4, %v2299_v17, %v2301_v55  ;;  %v2303_v32 = vsel %vm2295_vm4, %v2301_v55, %v2299_v17 }
 0x1f6   : > { %v2290_v54 = vadd.f32 %v2289_v13, %v2176_v49  ;;  %v2324_v60 = vrot.slane %v2317_v59, %v3954_v40  ;;  %v2330_v61 = vcombine.low %v2302_v2, %v2303_v32  ;;  %v2476_v59 = vld [vmem:[#allocation5 + $0x47] ss:$8 sm:$0x3] }
 0x1f8   : > { %v2351_v29 = vpop.permute.xlu1 %2350  ;;  %v2326_v37 = vmul.f32 %v2324_v60, %v2305_v34  ;;  %v2337_v33 = vrot.slane %v2330_v61, %v3954_v40  ;;  %v2349_v22 = vpop.permute.xlu0 %2348 }
 0x1f9   : > { %v2353_v14 = vsel %vm2352_vm5, %v2349_v22, %v2351_v29  ;;  %v2354_v43 = vsel %vm2352_vm5, %v2351_v29, %v2349_v22 }
 0x1fa   : > { %v2327_v47 = vadd.f32 %v2326_v37, %v2213_v24  ;;  %v2344_v31 = vrot.slane %v2337_v33, %v3954_v40  ;;  %v2367_v46 = vcombine.low %v2353_v14, %v2354_v43  ;;  %v2478_v33 = vld [vmem:[#allocation7 + $0x47] ss:$8 sm:$0x3] }
 0x1fc   : > { %v2358_v35 = vpop.permute.xlu1 %2357  ;;  %v2346_v28 = vmul.f32 %v2344_v31, %v2307_v63  ;;  %v2374_v9 = vrot.slane %v2367_v46, %v3954_v40  ;;  %v2356_v39 = vpop.permute.xlu0 %2355 }
 0x1fd   : > { %v2359_v20 = vsel %vm2352_vm5, %v2356_v39, %v2358_v35  ;;  %v2360_v38 = vsel %vm2352_vm5, %v2358_v35, %v2356_v39 }
 0x1fe   : > { %v2347_v52 = vadd.f32 %v2346_v28, %v2233_v50  ;;  %v2381_v11 = vrot.slane %v2374_v9, %v3954_v40  ;;  %v2387_v49 = vcombine.low %v2359_v20, %v2360_v38 }
 0x200   : > { %v2408_v25 = vpop.permute.xlu1 %2407  ;;  %v2383_v62 = vmul.f32 %v2381_v11, %v2362_v4  ;;  %v2394_v1 = vrot.slane %v2387_v49, %v3954_v40  ;;  %v2406_v23 = vpop.permute.xlu0 %2405 }
 0x201   : > { %v2410_v0 = vsel %vm2409_vm6, %v2406_v23, %v2408_v25  ;;  %v2411_v45 = vsel %vm2409_vm6, %v2408_v25, %v2406_v23 }
 0x202   : > { %v2384_v18 = vadd.f32 %v2383_v62, %v2270_v19  ;;  %v2401_v53 = vrot.slane %v2394_v1, %v3954_v40  ;;  %v2424_v24 = vcombine.low %v2410_v0, %v2411_v45 }
 0x204   : > { %v2415_v26 = vpop.permute.xlu1 %2414  ;;  %v2403_v56 = vmul.f32 %v2401_v53, %v2364_v36  ;;  %v2431_v10 = vrot.slane %v2424_v24, %v3954_v40  ;;  %v2413_v16 = vpop.permute.xlu0 %2412 }
 0x205   : > { %v2416_v21 = vsel %vm2409_vm6, %v2413_v16, %v2415_v26  ;;  %v2417_v57 = vsel %vm2409_vm6, %v2415_v26, %v2413_v16 }
 0x206   : > { %v2404_v44 = vadd.f32 %v2403_v56, %v2290_v54  ;;  %v2438_v42 = vrot.slane %v2431_v10, %v3954_v40  ;;  %v2444_v50 = vcombine.low %v2416_v21, %v2417_v57 }
 0x208   : > { %v2465_v51 = vpop.permute.xlu1 %2464  ;;  %v2440_v15 = vmul.f32 %v2438_v42, %v2419_v8  ;;  %v2451_v48 = vrot.slane %v2444_v50, %v3954_v40  ;;  %v2463_v27 = vpop.permute.xlu0 %2462 }
 0x209   : > { %v2467_v5 = vsel %vm2466_vm7, %v2463_v27, %v2465_v51  ;;  %v2468_v12 = vsel %vm2466_vm7, %v2465_v51, %v2463_v27 }
 0x20a   : > { %v4801_v3 = vadd.f32 %v2440_v15, %v2327_v47  ;;  %v2458_v6 = vrot.slane %v2451_v48, %v3954_v40  ;;  %v2481_v19 = vcombine.low %v2467_v5, %v2468_v12  ;;  %v2533_v48 = vld [vmem:[#allocation5 + $0x50] ss:$8 sm:$0x3] }
 0x20c   : > { %v2472_v7 = vpop.permute.xlu1 %2471  ;;  %v2460_v58 = vmul.f32 %v2458_v6, %v2421_v41  ;;  %v2488_v55 = vrot.slane %v2481_v19, %v3954_v40  ;;  %v2470_v13 = vpop.permute.xlu0 %2469 }
 0x20d   : > { %v2473_v17 = vsel %vm2466_vm7, %v2470_v13, %v2472_v7  ;;  %v2474_v34 = vsel %vm2466_vm7, %v2472_v7, %v2470_v13 }
 0x20e   : > { %v4809_v2 = vadd.f32 %v2460_v58, %v2347_v52  ;;  %v2495_v32 = vrot.slane %v2488_v55, %v3954_v40  ;;  %v2501_v54 = vcombine.low %v2473_v17, %v2474_v34 }
 0x210   : > { %v2522_v60 = vpop.permute.xlu1 %2521  ;;  %v2497_v61 = vmul.f32 %v2495_v32, %v2476_v59  ;;  %v2508_v29 = vrot.slane %v2501_v54, %v3954_v40  ;;  %v2520_v37 = vpop.permute.xlu0 %2519 }
 0x211   : > { %v2524_v1 = vsel %vm2523_vm8, %v2520_v37, %v2522_v60  ;;  %v2525_v23 = vsel %vm2523_vm8, %v2522_v60, %v2520_v37 }
 0x212   : > { %v4813_v22 = vadd.f32 %v2497_v61, %v2384_v18  ;;  %v2515_v63 = vrot.slane %v2508_v29, %v3954_v40  ;;  %v2538_v0 = vcombine.low %v2524_v1, %v2525_v23  ;;  %v2535_v29 = vld [vmem:[#allocation7 + $0x50] ss:$8 sm:$0x3] }
 0x214   : > { %v2529_v14 = vpop.permute.xlu1 %2528  ;;  %v2517_v43 = vmul.f32 %v2515_v63, %v2478_v33  ;;  %v2545_v10 = vrot.slane %v2538_v0, %v3954_v40 }
 0x215   : > { %v2527_v47 = vpop.permute.xlu0 %2526 }
 0x216   : > { %v4816_v31 = vadd.f32 %v2517_v43, %v2404_v44  ;;  %v2530_v18 = vsel %vm2523_vm8, %v2527_v47, %v2529_v14  ;;  %v2531_v53 = vsel %vm2523_vm8, %v2529_v14, %v2527_v47  ;;  %v2552_v50 = vrot.slane %v2545_v10, %v3954_v40 }
 0x217   : > { %v2558_v16 = vcombine.low %v2530_v18, %v2531_v53  ;;  %v2592_v53 = vld [vmem:[#allocation7 + $0x51] ss:$8 sm:$0x3] }
 0x218   : > { %v2579_v46 = vpop.permute.xlu1 %2578  ;;  %v2554_v58 = vmul.f32 %v2552_v50, %v2533_v48 }
 0x219   : > { %v2577_v35 = vpop.permute.xlu0 %2576  ;;  %v2565_v51 = vrot.slane %v2558_v16, %v3954_v40  ;;  %v2704_v16 = vld [vmem:[#allocation5 + $0x53] ss:$8 sm:$0x3] }
 0x21a   : > { %v2581_v26 = vsel %vm2580_vm9, %v2577_v35, %v2579_v46  ;;  %v2582_v56 = vsel %vm2580_vm9, %v2579_v46, %v2577_v35  ;;  %v2590_v46 = vld [vmem:[#allocation5 + $0x51] ss:$8 sm:$0x3] }
 0x21b   : > { %v2595_v57 = vcombine.low %v2581_v26, %v2582_v56  ;;  %v2572_v55 = vrot.slane %v2565_v51, %v3954_v40 }
 0x21c   : > { %v2586_v28 = vpop.permute.xlu1 %2585 }
 0x21d   : > { %v2584_v9 = vpop.permute.xlu0 %2583  ;;  %v2602_v19 = vrot.slane %v2595_v57, %v3954_v40 }
 0x21e   : > { %v2587_v44 = vsel %vm2580_vm9, %v2584_v9, %v2586_v28  ;;  %v2588_v42 = vsel %vm2580_vm9, %v2586_v28, %v2584_v9 }
 0x21f   : > { %v2615_v7 = vcombine.low %v2587_v44, %v2588_v42  ;;  %v2609_v37 = vrot.slane %v2602_v19, %v3954_v40  ;;  %v2706_v44 = vld [vmem:[#allocation7 + $0x53] ss:$8 sm:$0x3] }
 0x220   : > { %v2636_v39 = vpop.permute.xlu1 %2635 }
 0x221   : > { %v2634_v4 = vpop.permute.xlu0 %2633  ;;  %v2622_v33 = vrot.slane %v2615_v7, %v3954_v40  ;;  %v2611_v1 = vmul.f32 %v2609_v37, %v2590_v46 }
 0x222   : > { %v2638_v63 = vsel %vm2637_vm12, %v2634_v4, %v2636_v39  ;;  %v2639_v14 = vsel %vm2637_vm12, %v2636_v39, %v2634_v4 }
 0x223   : > { %v2629_v23 = vrot.slane %v2622_v33, %v3954_v40  ;;  %v2652_v0 = vcombine.low %v2638_v63, %v2639_v14  ;;  %v2612_v48 = vadd.f32 %v2611_v1, %v4813_v22 }
 0x224   : > { %v2643_v20 = vpop.permute.xlu1 %2642 }
 0x225   : > { %v2641_v38 = vpop.permute.xlu0 %2640 }
 0x226   : > { %v2644_v43 = vsel %vm2637_vm12, %v2641_v38, %v2643_v20  ;;  %v2645_v47 = vsel %vm2637_vm12, %v2643_v20, %v2641_v38 }
 0x227   : > { %v2672_v18 = vcombine.low %v2644_v43, %v2645_v47 }
 0x228   : > { %v2693_v52 = vpop.permute.xlu1 %2692 }
 0x229   : > { %v2691_v11 = vpop.permute.xlu0 %2690 }
 0x22a   : > { %v2695_v27 = vsel %vm2694_vm10, %v2691_v11, %v2693_v52  ;;  %v2696_v41 = vsel %vm2694_vm10, %v2693_v52, %v2691_v11 }
 0x22b   : > { %v2709_v13 = vcombine.low %v2695_v27, %v2696_v41  ;;  %v2631_v27 = vmul.f32 %v2629_v23, %v2592_v53  ;;  %v2659_v41 = vrot.slane %v2652_v0, %v3954_v40  ;;  %v2934_v23 = vld [vmem:[#allocation7 + $0x57] ss:$8 sm:$0x3] }
 0x22c   : > { %v2700_v49 = vpop.permute.xlu1 %2699 }
 0x22d   : > { %v2698_v25 = vpop.permute.xlu0 %2697  ;;  %v2716_v35 = vrot.slane %v2709_v13, %v3954_v40  ;;  %v2818_v13 = vld [vmem:[#allocation5 + $0x55] ss:$8 sm:$0x3]  ;;  %v2632_v37 = vadd.f32 %v2631_v27, %v4816_v31  ;;  %v2666_v33 = vrot.slane %v2659_v41, %v3954_v40 }
 0x22e   : > { %v2701_v5 = vsel %vm2694_vm10, %v2698_v25, %v2700_v49  ;;  %v2702_v12 = vsel %vm2694_vm10, %v2700_v49, %v2698_v25  ;;  %v4844_v49 = vadd.f32 %v2554_v58, %v4801_v3  ;;  %v4846_v25 = vmul.f32 %v2572_v55, %v2535_v29 }
 0x22f   : > { %v2729_v59 = vcombine.low %v2701_v5, %v2702_v12  ;;  %v2723_v26 = vrot.slane %v2716_v35, %v3954_v40  ;;  %v2679_v12 = vrot.slane %v2672_v18, %v3954_v40 }
 0x230   : > { %v4819_v62 = vpop.permute.xlu1 %2749  ;;  %v2575_v53 = vadd.f32 %v4846_v25, %v4809_v2 }
 0x231   : > { %v2748_v36 = vpop.permute.xlu0 %2747  ;;  %v2736_v28 = vrot.slane %v2729_v59, %v3954_v40  ;;  %v2820_v59 = vld [vmem:[#allocation7 + $0x55] ss:$8 sm:$0x3]  ;;  %v2686_v43 = vrot.slane %v2679_v12, %v3954_v40 }
 0x232   : > { %v2752_v4 = vsel %vm2751_vm13, %v2748_v36, %v4819_v62  ;;  %v2753_v20 = vsel %vm2751_vm13, %v4819_v62, %v2748_v36 }
 0x233   : > { %v2743_v56 = vrot.slane %v2736_v28, %v3954_v40  ;;  %v2932_v28 = vld [vmem:[#allocation5 + $0x57] ss:$8 sm:$0x3] }
 0x234   : > { %v2757_v45 = vpop.permute.xlu1 %2756 }
 0x235   : > { %v2755_v24 = vpop.permute.xlu0 %2754  ;;  %v2745_v55 = vmul.f32 %v2743_v56, %v2706_v44  ;;  %v2763_v56 = vld [vmem:[#allocation7 + $0x54] ss:$8 sm:$0x3] }
 0x236   : > { %v2758_v38 = vsel %vm2751_vm13, %v2755_v24, %v2757_v45  ;;  %v2759_v3 = vsel %vm2751_vm13, %v2757_v45, %v2755_v24 }
 0x237   : > { %v2786_v45 = vcombine.low %v2758_v38, %v2759_v3 }
 0x238   : > { %v2807_v8 = vpop.permute.xlu1 %2806 }
 0x239   : > { %v2805_v21 = vpop.permute.xlu0 %2804 }
 0x23a   : > { %v2809_v34 = vsel %vm2808_vm11, %v2805_v21, %v2807_v8  ;;  %v2810_v32 = vsel %vm2808_vm11, %v2807_v8, %v2805_v21  ;;  %v2766_v8 = vcombine.low %v2752_v4, %v2753_v20 }
 0x23b   : > { %v2823_v9 = vcombine.low %v2809_v34, %v2810_v32 }
 0x23c   : > { %v2814_v15 = vpop.permute.xlu1 %2813 }
 0x23d   : > { %v2812_v6 = vpop.permute.xlu0 %2811  ;;  %v2830_v62 = vrot.slane %v2823_v9, %v3954_v40 }
 0x23e   : > { %v2815_v54 = vsel %vm2808_vm11, %v2812_v6, %v2814_v15  ;;  %v2816_v60 = vsel %vm2808_vm11, %v2814_v15, %v2812_v6  ;;  %v2725_v6 = vmul.f32 %v2723_v26, %v2704_v16  ;;  %v2761_v26 = vld [vmem:[#allocation5 + $0x54] ss:$8 sm:$0x3] }
 0x23f   : > { %v2843_v52 = vcombine.low %v2815_v54, %v2816_v60  ;;  %v2837_v19 = vrot.slane %v2830_v62, %v3954_v40  ;;  %v2773_v54 = vrot.slane %v2766_v8, %v3954_v40  ;;  %v2793_v60 = vrot.slane %v2786_v45, %v3954_v40 }
 0x240   : > { %v2864_v17 = vpop.permute.xlu1 %2863  ;;  %v2726_v47 = vadd.f32 %v2725_v6, %v2612_v48  ;;  %v2877_v48 = vld [vmem:[#allocation7 + $0x56] ss:$8 sm:$0x3] }
 0x241   : > { %v2862_v61 = vpop.permute.xlu0 %2861  ;;  %v2850_v36 = vrot.slane %v2843_v52, %v3954_v40  ;;  %v2839_v46 = vmul.f32 %v2837_v19, %v2818_v13  ;;  %v2647_v52 = vld [vmem:[#allocation5 + $0x52] ss:$8 sm:$0x3]  ;;  %v2780_v3 = vrot.slane %v2773_v54, %v3954_v40  ;;  %v2800_v1 = vrot.slane %v2793_v60, %v3954_v40 }
 0x242   : > { %v2866_v24 = vsel %vm2865_vm14, %v2862_v61, %v2864_v17  ;;  %v2867_v21 = vsel %vm2865_vm14, %v2864_v17, %v2862_v61  ;;  %v2668_v16 = vmul.f32 %v2666_v33, %v2647_v52 }
 0x243   : > { %v2857_v7 = vrot.slane %v2850_v36, %v3954_v40  ;;  %v2880_v17 = vcombine.low %v2866_v24, %v2867_v21  ;;  %v2840_v45 = vadd.f32 %v2839_v46, %v2726_v47  ;;  %v2782_v2 = vmul.f32 %v2780_v3, %v2761_v26 }
 0x244   : > { %v2871_v11 = vpop.permute.xlu1 %2870  ;;  %v2802_v25 = vmul.f32 %v2800_v1, %v2763_v56 }
 0x245   : > { %v2869_v39 = vpop.permute.xlu0 %2868  ;;  %v2859_v35 = vmul.f32 %v2857_v7, %v2820_v59  ;;  %v2887_v4 = vrot.slane %v2880_v17, %v3954_v40  ;;  %v2669_v7 = vadd.f32 %v2668_v16, %v4844_v49 }
 0x246   : > { %v2872_v42 = vsel %vm2865_vm14, %v2869_v39, %v2871_v11  ;;  %v2873_v50 = vsel %vm2865_vm14, %v2871_v11, %v2869_v39  ;;  %v2649_v11 = vld [vmem:[#allocation7 + $0x52] ss:$8 sm:$0x3]  ;;  %v2746_v39 = vadd.f32 %v2745_v55, %v2632_v37  ;;  %v2989_v55 = vld [vmem:[#allocation5 + $0x60] ss:$8 sm:$0x3] }
 0x247   : > { %v2900_v34 = vcombine.low %v2872_v42, %v2873_v50  ;;  %v2688_v8 = vmul.f32 %v2686_v43, %v2649_v11 }
 0x248   : > { %v2921_v10 = vpop.permute.xlu1 %2920  ;;  %v2860_v24 = vadd.f32 %v2859_v35, %v2746_v39  ;;  %v5036_v35 = vlaneseq }
 0x249   : > { %v2919_v57 = vpop.permute.xlu0 %2918  ;;  %v2907_v20 = vrot.slane %v2900_v34, %v3954_v40 }
 0x24a   : > { %v2923_v51 = vsel %vm2922_vm15, %v2919_v57, %v2921_v10  ;;  %v2924_v15 = vsel %vm2922_vm15, %v2921_v10, %v2919_v57  ;;  %v2894_v57 = vrot.slane %v2887_v4, %v3954_v40  ;;  %vm3043_vm1 = vcmp.lt.s32.totalorder %v5036_v35, 256 }
 0x24b   : > { %v2937_v5 = vcombine.low %v2923_v51, %v2924_v15  ;;  %v2914_v44 = vrot.slane %v2907_v20, %v3954_v40  ;;  %v2875_v15 = vld [vmem:[#allocation5 + $0x56] ss:$8 sm:$0x3] }
 0x24c   : > { %v2928_v58 = vpop.permute.xlu1 %2927  ;;  %v2896_v13 = vmul.f32 %v2894_v57, %v2875_v15 }
 0x24d   : > { %v2944_v32 = vrot.slane %v2937_v5, %v3954_v40  ;;  %v2926_v22 = vpop.permute.xlu0 %2925  ;;  %v2916_v59 = vmul.f32 %v2914_v44, %v2877_v48 }
 0x24e   : > { %v2929_v61 = vsel %vm2922_vm15, %v2926_v22, %v2928_v58  ;;  %v2930_v29 = vsel %vm2922_vm15, %v2928_v58, %v2926_v22  ;;  %v2689_v58 = vadd.f32 %v2688_v8, %v2575_v53  ;;  %v2783_v22 = vadd.f32 %v2782_v2, %v2669_v7 }
 0x24f   : > { %v2951_v63 = vrot.slane %v2944_v32, %v3954_v40  ;;  %v2957_v14 = vcombine.low %v2929_v61, %v2930_v29  ;;  %v2991_v32 = vld [vmem:[#allocation7 + $0x60] ss:$8 sm:$0x3] }
 0x250   : > { %v2978_v9 = vpop.permute.xlu1 %2977  ;;  %v2803_v54 = vadd.f32 %v2802_v25, %v2689_v58  ;;  %v2897_v61 = vadd.f32 %v2896_v13, %v2783_v22 }
 0x251   : > { %v2964_v31 = vrot.slane %v2957_v14, %v3954_v40  ;;  %v2976_v38 = vpop.permute.xlu0 %2975  ;;  %v2953_v62 = vmul.f32 %v2951_v63, %v2932_v28 }
 0x252   : > { %v2980_v0 = vsel %vm2979_vm0, %v2976_v38, %v2978_v9  ;;  %v2981_v18 = vsel %vm2979_vm0, %v2978_v9, %v2976_v38  ;;  %v2917_v29 = vadd.f32 %v2916_v59, %v2803_v54 }
 0x253   : > { %v2971_v36 = vrot.slane %v2964_v31, %v3954_v40  ;;  %v2994_v10 = vcombine.low %v2980_v0, %v2981_v18  ;;  %v2954_v5 = vadd.f32 %v2953_v62, %v2840_v45 }
 0x254   : > { %v2985_v21 = vpop.permute.xlu1 %2984 }
 0x255   : > { %v2973_v42 = vmul.f32 %v2971_v36, %v2934_v23  ;;  %v3001_v50 = vrot.slane %v2994_v10, %v3954_v40  ;;  %v2983_v51 = vpop.permute.xlu0 %2982 }
 0x256   : > { %v2986_v27 = vsel %vm2979_vm0, %v2983_v51, %v2985_v21  ;;  %v2987_v41 = vsel %vm2979_vm0, %v2985_v21, %v2983_v51 }
 0x257   : > { %v2974_v12 = vadd.f32 %v2973_v42, %v2860_v24  ;;  %v3008_v6 = vrot.slane %v3001_v50, %v3954_v40  ;;  %v3014_v19 = vcombine.low %v2986_v27, %v2987_v41 }
 0x259   : > { %v3033_v17 = vadd.f32 %v2974_v12, %v2954_v5  ;;  %v3021_v34 = vrot.slane %v3014_v19, %v3954_v40  ;;  %v3010_v30 = vmul.f32 %v3008_v6, %v2989_v55 }
 0x25b   : > { %v3028_v60 = vrot.slane %v3021_v34, %v3954_v40  ;;  %v3011_v33 = vadd.f32 %v3010_v30, %v2897_v61 }
 0x25d   : > { %v3030_v37 = vmul.f32 %v3028_v60, %v2991_v32 }
 0x25f   : > { %v3031_v49 = vadd.f32 %v3030_v37, %v2917_v29 }
 0x261   : > { %v3032_v63 = vadd.f32 %v3031_v49, %v3011_v33 }
 0x263   : > { %v3034_v14 = vadd.f32 %v3033_v17, %v3032_v63 }
 0x265   : > { %v3163_v43 = vmul.f32 -1.442695, %v3034_v14 }
 0x267   : > { %3290 = vpow2.f32 %v3163_v43 }
 0x274   : > { %v3291_v47 = vpop.eup %3290 }
 0x275   : > { %v3038_v46 = vadd.f32 1.0, %v3291_v47 }
 0x277   : > { %3292 = vrcp.f32 %v3038_v46 }
 0x284   : > { %v3293_v40 = vpop.eup %3292 }
 0x285   : > { %3045 = vst.msk [vmem:[%s215_s4] sm:$0x3] %vm3043_vm1, %v3293_v40 }
 0x286   : > { %3387 = shalt.err (!%p3384_p9)
}
 0x287   : > { %s3388_s8 = scalar_lea.hbm %s4923_s27, 32  ;;  %s3392_s21 = scalar_lea.hbm %s4963_s3, 64 }
 0x288   : > { %p3389_p13 = scmp.ne.s32.totalorder %s4923_s27, %s3388_s8  ;;  %p3393_p0 = scmp.lt.s32.totalorder %s4923_s27, %s4963_s3 }
 0x289   : > { %p3394_p4 = scmp.lt.s32.totalorder %s3392_s21, %s3388_s8 }
 0x28a   : > { %p3390_p5 = pnand %p3389_p13, %p5037_p11 }
 0x28b   : > { %p3395_p8 = por %p3394_p4, %p3393_p0 }
 0x28c   : > { %p3391_p10 = pneg %p3390_p5 }
 0x28e   : > { %p3396_p3 = pnand %p3395_p8, %p3391_p10 }
 0x290   : > { %3399 = shalt.err (!%p3396_p3)
}
 0x291   : > { %3181 = dma.vmem_to_hbm [thread:$0]  (%p5037_p11), %s3062_s18, 32, %s4923_s27, %s3047_s28  }
 0x292 PF: > { %s3073_s23 = sand.u32 1, %s3430_s12   ;;  %p5038_p1 = scmp.ne.s32.totalorder %s4988_s19, 0 }
 0x293   : > { %p5039_p2 = scmp.ge.s32.totalorder %s3442_s15, 2  ;;  %s3074_s26 = scalar_lea.sflag [#allocation4], %s3073_s23 }
 0x295   : > { %p3195_p6 = pnand %p5039_p2, %p5038_p1 }
 0x297   : > { %p3196_p12 = pneg %p3195_p6 }
 0x299   : > { %3425 = dma.done.wait (%p3196_p12), %s3074_s26, 32  }
 0x29a   : > { %3427 = vsyncadd (%p3196_p12), %s3074_s26, 4294967264  ;;  %p17_p7 = scmp.ge.s32.totalorder %s3591_s7, 4   ;;  %s5040_s12 = smov %s3434_s13 }
 0x29b   : > { %s5041_s13 = smov %s3438_s14  ;;  %s5042_s14 = smov %s3607_s11 }
 0x29c   : > { %s5043_s15 = smov %s3591_s7  ;;  %19 = sbr.rel (!%p17_p7) target bundleno = 6 (0x6), region = 181 }
 0x2a1   :  { %3079 = vsyncpa [#allocation3], 1 }
 0x2a2   :  { %3081 = vsyncpa [#allocation3 + $0x1], 1 }
 0x2a3   :  { %3082 = vsyncpa [#allocation6], 1 }
 0x2a4   :  { %3083 = vsyncpa [#allocation4], 1 }
 0x2a5   :  { %3085 = vsyncpa [#allocation4 + $0x1], 1 }

</bundles_post_ra>
